<compile_context>
chip_gen: v6e
topology: v6e:2x2x1
jax: 0.10.0
libtpu: 0.0.40
codegen_flags: <defaults>
</compile_context>

<pallas_src>
import numpy as np
import jax
import jax.numpy as jnp
from jax import lax
from jax.experimental import pallas as pl
from jax.experimental.pallas import tpu as pltpu

BN_EPS = 1e-5


# ------------------------------ Pallas kernel --------------------------------

def _make_resnet_kernel(block_has_shortcut):
    """Fused whole-network kernel.

    Ref order (must match the flat parameter list built by init_model):
      x_ref,
      [S, Wf, bias] for: stem, then per block: conv1, (shortcut), conv2,
      R, Wfc_fold, bfc,
      out_ref
    """

    def kernel(*refs):
        x_ref = refs[0]
        out_ref = refs[-1]
        it = iter(refs[1:-1])

        def conv(x_f32, relu, residual=None):
            s_ref = next(it)      # [k, N*H_out, N*H_in]           bf16 (0/1)
            w_ref = next(it)      # [k, W_in*C_in, W_out*C_out]    bf16
            b_ref = next(it)      # [1, W_out*C_out]               f32
            xb = x_f32.astype(jnp.bfloat16)
            acc = None
            for di in range(s_ref.shape[0]):          # static, unrolled
                xs = jnp.dot(s_ref[di], xb,
                             preferred_element_type=jnp.float32)
                part = jnp.dot(xs.astype(jnp.bfloat16), w_ref[di],
                               preferred_element_type=jnp.float32)
                acc = part if acc is None else acc + part
            acc = acc + b_ref[...]                    # folded BN bias (f32)
            if residual is not None:
                acc = acc + residual                  # residual add (f32)
            if relu:
                acc = jnp.maximum(acc, 0.0)
            return acc

        a = conv(x_ref[...], relu=True)                # conv1 + bn1 + relu
        for has_sc in block_has_shortcut:              # the three BasicBlocks
            h = conv(a, relu=True)                     # conv1 + bn1 + relu
            sc = conv(a, relu=False) if has_sc else a  # 1x1 shortcut conv + bn
            a = conv(h, relu=True, residual=sc)        # conv2 + bn2 + add + relu

        # global average pool + flatten + fc as two small f32 matmuls.
        r_ref = next(it)      # [N, N*H]        f32 (1/H per image block)
        wfc_ref = next(it)    # [W*C, classes]  f32 (fc weight tiled / W)
        bfc_ref = next(it)    # [1, classes]    f32
        pooled = jnp.dot(r_ref[...], a, preferred_element_type=jnp.float32)
        out_ref[...] = (jnp.dot(pooled, wfc_ref[...],
                                preferred_element_type=jnp.float32)
                        + bfc_ref[...])

    return kernel


def _fullblock(shape):
    return pl.BlockSpec(shape, lambda i, _n=len(shape): (0,) * _n)


def resnet_forward(x_nchw, params):
    """Forward pass. x_nchw: [N, 3, H, W] f32 -> logits [N, num_classes]."""
    flat, block_has_shortcut, num_classes = params
    N, C, H, W = x_nchw.shape
    # NCHW -> NHWC -> 2-D activation matrix [N*H, W*C] (rows=(n,h), cols=(w,c)).
    x2d = jnp.transpose(x_nchw, (0, 2, 3, 1)).reshape(N * H, W * C)

    inputs = [x2d] + list(flat)
    return pl.pallas_call(
        _make_resnet_kernel(block_has_shortcut),
        grid=(1,),
        in_specs=[_fullblock(a.shape) for a in inputs],
        out_specs=_fullblock((N, num_classes)),
        out_shape=jax.ShapeDtypeStruct((N, num_classes), jnp.float32),
        compiler_params=pltpu.CompilerParams(
            dimension_semantics=("arbitrary",),
            vmem_limit_bytes=32 * 1024 * 1024),
    )(*inputs)


# --------------------------- parameter construction --------------------------

def _kaiming_conv(key, k, cin, cout):
    # kaiming_normal_(mode='fan_out', nonlinearity='relu'): std = sqrt(2/(k*k*cout))
    std = (2.0 / (k * k * cout)) ** 0.5
    return std * jax.random.normal(key, (k, k, cin, cout), dtype=jnp.float32)


def _bn_fold(cout):
    # eval-mode BN fold with weight=1, bias=0, running_mean=0, running_var=1.
    scale = np.full((cout,), 1.0 / np.sqrt(1.0 + BN_EPS), dtype=np.float32)
    bias = np.zeros((cout,), dtype=np.float32)
    return scale, bias


def _fold_conv(w, stride, pad, H_in, W_in, N, bn_scale, bn_bias):
    """Lower conv+BN to (S, Wf, bias_row) kernel params + a reference entry."""
    w = np.asarray(w, dtype=np.float32)                  # [k, k, cin, cout]
    k = w.shape[0]
    cin, cout = w.shape[2], w.shape[3]
    H_out = (H_in + 2 * pad - k) // stride + 1
    W_out = (W_in + 2 * pad - k) // stride + 1

    # Row-selection matrices (vertical tap / stride / zero padding).
    S = np.zeros((k, N * H_out, N * H_in), np.float32)
    for di in range(k):
        for n in range(N):
            for io in range(H_out):
                ii = stride * io + di - pad
                if 0 <= ii < H_in:
                    S[di, n * H_out + io, n * H_in + ii] = 1.0

    # Block-banded weights (horizontal taps / stride / zero pad + BN scale).
    ws = w * bn_scale[None, None, None, :]
    Wf = np.zeros((k, W_in * cin, W_out * cout), np.float32)
    for di in range(k):
        for jo in range(W_out):
            for dj in range(k):
                ji = stride * jo + dj - pad
                if 0 <= ji < W_in:
                    Wf[di, ji * cin:(ji + 1) * cin,
                       jo * cout:(jo + 1) * cout] = ws[di, dj]

    b_row = np.tile(bn_bias, W_out)[None, :]             # [1, W_out*cout]

    triple = (jnp.asarray(S, jnp.bfloat16),
              jnp.asarray(Wf, jnp.bfloat16),
              jnp.asarray(b_row, jnp.float32))
    # Reference entry mirrors the kernel's bf16 rounding of the folded weights.
    ref_entry = (jnp.asarray(ws, jnp.bfloat16).astype(jnp.float32),
                 jnp.asarray(bn_bias, jnp.float32), stride, pad)
    return triple, ref_entry, H_out, W_out


def init_model(key, N, H, W, num_classes=10):
    keys = jax.random.split(key, 5)
    flat, ref_convs = [], []
    Hc, Wc = H, W

    # stem: conv3x3(3->16, stride 1, pad 1) + bn + relu
    s, b = _bn_fold(16)
    t, r, Hc, Wc = _fold_conv(_kaiming_conv(keys[0], 3, 3, 16), 1, 1,
                              Hc, Wc, N, s, b)
    flat.extend(t); ref_convs.append(r)

    # num_blocks = [1, 1, 1] -> one block_original (BasicBlock) per layer.
    block_cfg = [(16, 16, 1), (16, 32, 2), (32, 64, 2)]
    block_has_shortcut = []
    for idx, (cin, cout, stride) in enumerate(block_cfg):
        k1, k2, k3 = jax.random.split(keys[1 + idx], 3)
        has_sc = (stride != 1) or (cin != cout)
        block_has_shortcut.append(has_sc)

        s1, b1 = _bn_fold(cout)
        t1, r1, H1, W1 = _fold_conv(_kaiming_conv(k1, 3, cin, cout), stride, 1,
                                    Hc, Wc, N, s1, b1)
        flat.extend(t1); ref_convs.append(r1)            # conv1 + bn1
        if has_sc:
            ss, bs = _bn_fold(cout)
            tsc, rsc, _, _ = _fold_conv(_kaiming_conv(k3, 1, cin, cout), stride, 0,
                                        Hc, Wc, N, ss, bs)
            flat.extend(tsc); ref_convs.append(rsc)      # 1x1 shortcut + bn
        s2, b2 = _bn_fold(cout)
        t2, r2, Hc, Wc = _fold_conv(_kaiming_conv(k2, 3, cout, cout), 1, 1,
                                    H1, W1, N, s2, b2)
        flat.extend(t2); ref_convs.append(r2)            # conv2 + bn2

    # avg-pool + fc, folded into two matmuls (R over rows, tiled fc over cols).
    c_last = block_cfg[-1][1]
    kw, kb = jax.random.split(keys[4])
    bound = 1.0 / (c_last ** 0.5)
    wfc = jax.random.uniform(kw, (c_last, num_classes), minval=-bound,
                             maxval=bound, dtype=jnp.float32)
    bfc = jax.random.uniform(kb, (num_classes,), minval=-bound,
                             maxval=bound, dtype=jnp.float32)

    R = np.zeros((N, N * Hc), np.float32)
    for n in range(N):
        R[n, n * Hc:(n + 1) * Hc] = 1.0 / Hc
    wfc_fold = np.tile(np.asarray(wfc), (Wc, 1)) / float(Wc)   # [Wc*c_last, cls]

    flat.append(jnp.asarray(R, jnp.float32))
    flat.append(jnp.asarray(wfc_fold, jnp.float32))
    flat.append(bfc.reshape(1, num_classes))

    params = (tuple(flat), tuple(block_has_shortcut), num_classes)
    ref_params = (tuple(ref_convs), tuple(block_has_shortcut), (wfc, bfc))
    return params, ref_params


# ------------------------- pure-JAX reference (check) -------------------------

def reference_forward(x_nchw, ref_params):
    """Pure-JAX reference mirroring the kernel's bf16 rounding on the MXU path."""
    convs, block_has_shortcut, (wfc, bfc) = ref_params
    it = iter(convs)

    def conv(x, relu, residual=None):
        w, bias, stride, pad = next(it)
        xb = x.astype(jnp.bfloat16).astype(jnp.float32)
        y = lax.conv_general_dilated(
            xb, w, window_strides=(stride, stride),
            padding=[(pad, pad), (pad, pad)],
            dimension_numbers=("NHWC", "HWIO", "NHWC"),
            precision=lax.Precision.HIGHEST)
        y = y + bias[None, None, None, :]
        if residual is not None:
            y = y + residual
        if relu:
            y = jnp.maximum(y, 0.0)
        return y

    x = jnp.transpose(x_nchw, (0, 2, 3, 1))
    a = conv(x, relu=True)
    for has_sc in block_has_shortcut:
        h = conv(a, relu=True)
        sc = conv(a, relu=False) if has_sc else a
        a = conv(h, relu=True, residual=sc)
    pooled = jnp.mean(a, axis=(1, 2))
    return jnp.dot(pooled, wfc, precision=lax.Precision.HIGHEST) + bfc


# ---------------------------------- main --------------------------------------

if __name__ == "__main__":
    key = jax.random.PRNGKey(0)
    kx, kp = jax.random.split(key)

    N, C, H, W = 2, 3, 16, 16          # small CIFAR-like input (NCHW, as PyTorch)
    x = jax.random.normal(kx, (N, C, H, W), dtype=jnp.float32)
    params, ref_params = init_model(kp, N, H, W, num_classes=10)

    fwd = jax.jit(lambda xx: resnet_forward(xx, params))
    out = jax.block_until_ready(fwd(x))
    assert out.shape == (N, 10) and out.dtype == jnp.float32

    # Correctness check against a pure-JAX reference (same bf16 rounding).
    ref = jax.block_until_ready(
        jax.jit(lambda xx: reference_forward(xx, ref_params))(x))
    np.testing.assert_allclose(np.asarray(out), np.asarray(ref),
                               rtol=5e-2, atol=5e-2)
    print("KERNEL_OK")
</pallas_src>

<mosaic_0001>
module attributes {stable_mosaic.version = 11 : i64} {
  func.func @kernel(%arg0: i32, %arg1: memref<32x48xf32, #tpu.memory_space<vmem>>, %arg2: memref<3x32x32xbf16, #tpu.memory_space<vmem>>, %arg3: memref<3x48x256xbf16, #tpu.memory_space<vmem>>, %arg4: memref<1x256xf32, #tpu.memory_space<vmem>>, %arg5: memref<3x32x32xbf16, #tpu.memory_space<vmem>>, %arg6: memref<3x256x256xbf16, #tpu.memory_space<vmem>>, %arg7: memref<1x256xf32, #tpu.memory_space<vmem>>, %arg8: memref<3x32x32xbf16, #tpu.memory_space<vmem>>, %arg9: memref<3x256x256xbf16, #tpu.memory_space<vmem>>, %arg10: memref<1x256xf32, #tpu.memory_space<vmem>>, %arg11: memref<3x16x32xbf16, #tpu.memory_space<vmem>>, %arg12: memref<3x256x256xbf16, #tpu.memory_space<vmem>>, %arg13: memref<1x256xf32, #tpu.memory_space<vmem>>, %arg14: memref<1x16x32xbf16, #tpu.memory_space<vmem>>, %arg15: memref<1x256x256xbf16, #tpu.memory_space<vmem>>, %arg16: memref<1x256xf32, #tpu.memory_space<vmem>>, %arg17: memref<3x16x16xbf16, #tpu.memory_space<vmem>>, %arg18: memref<3x256x256xbf16, #tpu.memory_space<vmem>>, %arg19: memref<1x256xf32, #tpu.memory_space<vmem>>, %arg20: memref<3x8x16xbf16, #tpu.memory_space<vmem>>, %arg21: memref<3x256x256xbf16, #tpu.memory_space<vmem>>, %arg22: memref<1x256xf32, #tpu.memory_space<vmem>>, %arg23: memref<1x8x16xbf16, #tpu.memory_space<vmem>>, %arg24: memref<1x256x256xbf16, #tpu.memory_space<vmem>>, %arg25: memref<1x256xf32, #tpu.memory_space<vmem>>, %arg26: memref<3x8x8xbf16, #tpu.memory_space<vmem>>, %arg27: memref<3x256x256xbf16, #tpu.memory_space<vmem>>, %arg28: memref<1x256xf32, #tpu.memory_space<vmem>>, %arg29: memref<2x8xf32, #tpu.memory_space<vmem>>, %arg30: memref<256x10xf32, #tpu.memory_space<vmem>>, %arg31: memref<1x10xf32, #tpu.memory_space<vmem>>, %arg32: memref<2x10xf32, #tpu.memory_space<vmem>>) attributes {dimension_semantics = [#tpu.dimension_semantics<arbitrary>], iteration_bounds = array<i64: 1>, scalar_prefetch = 0 : i64, scratch_operands = 0 : i64, tpu.core_type = #tpu.core_type<tc>, window_params = [{pipeline_mode = #tpu.pipeline_mode<synchronous>, transform_indices = @transform_0, window_bounds = array<i64: 32, 48>}, {pipeline_mode = #tpu.pipeline_mode<synchronous>, transform_indices = @transform_1, window_bounds = array<i64: 3, 32, 32>}, {pipeline_mode = #tpu.pipeline_mode<synchronous>, transform_indices = @transform_2, window_bounds = array<i64: 3, 48, 256>}, {pipeline_mode = #tpu.pipeline_mode<synchronous>, transform_indices = @transform_3, window_bounds = array<i64: 1, 256>}, {pipeline_mode = #tpu.pipeline_mode<synchronous>, transform_indices = @transform_4, window_bounds = array<i64: 3, 32, 32>}, {pipeline_mode = #tpu.pipeline_mode<synchronous>, transform_indices = @transform_5, window_bounds = array<i64: 3, 256, 256>}, {pipeline_mode = #tpu.pipeline_mode<synchronous>, transform_indices = @transform_6, window_bounds = array<i64: 1, 256>}, {pipeline_mode = #tpu.pipeline_mode<synchronous>, transform_indices = @transform_7, window_bounds = array<i64: 3, 32, 32>}, {pipeline_mode = #tpu.pipeline_mode<synchronous>, transform_indices = @transform_8, window_bounds = array<i64: 3, 256, 256>}, {pipeline_mode = #tpu.pipeline_mode<synchronous>, transform_indices = @transform_9, window_bounds = array<i64: 1, 256>}, {pipeline_mode = #tpu.pipeline_mode<synchronous>, transform_indices = @transform_10, window_bounds = array<i64: 3, 16, 32>}, {pipeline_mode = #tpu.pipeline_mode<synchronous>, transform_indices = @transform_11, window_bounds = array<i64: 3, 256, 256>}, {pipeline_mode = #tpu.pipeline_mode<synchronous>, transform_indices = @transform_12, window_bounds = array<i64: 1, 256>}, {pipeline_mode = #tpu.pipeline_mode<synchronous>, transform_indices = @transform_13, window_bounds = array<i64: 1, 16, 32>}, {pipeline_mode = #tpu.pipeline_mode<synchronous>, transform_indices = @transform_14, window_bounds = array<i64: 1, 256, 256>}, {pipeline_mode = #tpu.pipeline_mode<synchronous>, transform_indices = @transform_15, window_bounds = array<i64: 1, 256>}, {pipeline_mode = #tpu.pipeline_mode<synchronous>, transform_indices = @transform_16, window_bounds = array<i64: 3, 16, 16>}, {pipeline_mode = #tpu.pipeline_mode<synchronous>, transform_indices = @transform_17, window_bounds = array<i64: 3, 256, 256>}, {pipeline_mode = #tpu.pipeline_mode<synchronous>, transform_indices = @transform_18, window_bounds = array<i64: 1, 256>}, {pipeline_mode = #tpu.pipeline_mode<synchronous>, transform_indices = @transform_19, window_bounds = array<i64: 3, 8, 16>}, {pipeline_mode = #tpu.pipeline_mode<synchronous>, transform_indices = @transform_20, window_bounds = array<i64: 3, 256, 256>}, {pipeline_mode = #tpu.pipeline_mode<synchronous>, transform_indices = @transform_21, window_bounds = array<i64: 1, 256>}, {pipeline_mode = #tpu.pipeline_mode<synchronous>, transform_indices = @transform_22, window_bounds = array<i64: 1, 8, 16>}, {pipeline_mode = #tpu.pipeline_mode<synchronous>, transform_indices = @transform_23, window_bounds = array<i64: 1, 256, 256>}, {pipeline_mode = #tpu.pipeline_mode<synchronous>, transform_indices = @transform_24, window_bounds = array<i64: 1, 256>}, {pipeline_mode = #tpu.pipeline_mode<synchronous>, transform_indices = @transform_25, window_bounds = array<i64: 3, 8, 8>}, {pipeline_mode = #tpu.pipeline_mode<synchronous>, transform_indices = @transform_26, window_bounds = array<i64: 3, 256, 256>}, {pipeline_mode = #tpu.pipeline_mode<synchronous>, transform_indices = @transform_27, window_bounds = array<i64: 1, 256>}, {pipeline_mode = #tpu.pipeline_mode<synchronous>, transform_indices = @transform_28, window_bounds = array<i64: 2, 8>}, {pipeline_mode = #tpu.pipeline_mode<synchronous>, transform_indices = @transform_29, window_bounds = array<i64: 256, 10>}, {pipeline_mode = #tpu.pipeline_mode<synchronous>, transform_indices = @transform_30, window_bounds = array<i64: 1, 10>}, {pipeline_mode = #tpu.pipeline_mode<synchronous>, transform_indices = @transform_31, window_bounds = array<i64: 2, 10>}]} {
    %c0 = arith.constant 0 : index
    %c0_0 = arith.constant 0 : index
    %0 = vector.load %arg1[%c0, %c0_0] : memref<32x48xf32, #tpu.memory_space<vmem>>, vector<32x48xf32>
    %1 = arith.truncf %0 : vector<32x48xf32> to vector<32x48xbf16>
    %c0_1 = arith.constant 0 : index
    %c0_2 = arith.constant 0 : index
    %c0_3 = arith.constant 0 : index
    %2 = vector.load %arg2[%c0_1, %c0_2, %c0_3] : memref<3x32x32xbf16, #tpu.memory_space<vmem>>, vector<1x32x32xbf16>
    %3 = vector.shape_cast %2 : vector<1x32x32xbf16> to vector<32x32xbf16>
    %cst = arith.constant dense<0.000000e+00> : vector<32x48xf32>
    %4 = tpu.matmul %3, %1, %cst {dimension_numbers = #tpu.dot_dimension_numbers<[1], [0], [0], [1], [0, 0, 1, 1], [], []>} : vector<32x32xbf16>, vector<32x48xbf16>, vector<32x48xf32> -> vector<32x48xf32>
    %5 = arith.truncf %4 : vector<32x48xf32> to vector<32x48xbf16>
    %c0_4 = arith.constant 0 : index
    %c0_5 = arith.constant 0 : index
    %c0_6 = arith.constant 0 : index
    %6 = vector.load %arg3[%c0_4, %c0_5, %c0_6] : memref<3x48x256xbf16, #tpu.memory_space<vmem>>, vector<1x48x256xbf16>
    %7 = vector.shape_cast %6 : vector<1x48x256xbf16> to vector<48x256xbf16>
    %cst_7 = arith.constant dense<0.000000e+00> : vector<32x256xf32>
    %8 = tpu.matmul %5, %7, %cst_7 {dimension_numbers = #tpu.dot_dimension_numbers<[1], [0], [0], [1], [0, 0, 1, 1], [], []>} : vector<32x48xbf16>, vector<48x256xbf16>, vector<32x256xf32> -> vector<32x256xf32>
    %c1 = arith.constant 1 : index
    %c0_8 = arith.constant 0 : index
    %c0_9 = arith.constant 0 : index
    %9 = vector.load %arg2[%c1, %c0_8, %c0_9] : memref<3x32x32xbf16, #tpu.memory_space<vmem>>, vector<1x32x32xbf16>
    %10 = vector.shape_cast %9 : vector<1x32x32xbf16> to vector<32x32xbf16>
    %cst_10 = arith.constant dense<0.000000e+00> : vector<32x48xf32>
    %11 = tpu.matmul %10, %1, %cst_10 {dimension_numbers = #tpu.dot_dimension_numbers<[1], [0], [0], [1], [0, 0, 1, 1], [], []>} : vector<32x32xbf16>, vector<32x48xbf16>, vector<32x48xf32> -> vector<32x48xf32>
    %12 = arith.truncf %11 : vector<32x48xf32> to vector<32x48xbf16>
    %c1_11 = arith.constant 1 : index
    %c0_12 = arith.constant 0 : index
    %c0_13 = arith.constant 0 : index
    %13 = vector.load %arg3[%c1_11, %c0_12, %c0_13] : memref<3x48x256xbf16, #tpu.memory_space<vmem>>, vector<1x48x256xbf16>
    %14 = vector.shape_cast %13 : vector<1x48x256xbf16> to vector<48x256xbf16>
    %cst_14 = arith.constant dense<0.000000e+00> : vector<32x256xf32>
    %15 = tpu.matmul %12, %14, %cst_14 {dimension_numbers = #tpu.dot_dimension_numbers<[1], [0], [0], [1], [0, 0, 1, 1], [], []>} : vector<32x48xbf16>, vector<48x256xbf16>, vector<32x256xf32> -> vector<32x256xf32>
    %16 = arith.addf %8, %15 : vector<32x256xf32>
    %c2 = arith.constant 2 : index
    %c0_15 = arith.constant 0 : index
    %c0_16 = arith.constant 0 : index
    %17 = vector.load %arg2[%c2, %c0_15, %c0_16] : memref<3x32x32xbf16, #tpu.memory_space<vmem>>, vector<1x32x32xbf16>
    %18 = vector.shape_cast %17 : vector<1x32x32xbf16> to vector<32x32xbf16>
    %cst_17 = arith.constant dense<0.000000e+00> : vector<32x48xf32>
    %19 = tpu.matmul %18, %1, %cst_17 {dimension_numbers = #tpu.dot_dimension_numbers<[1], [0], [0], [1], [0, 0, 1, 1], [], []>} : vector<32x32xbf16>, vector<32x48xbf16>, vector<32x48xf32> -> vector<32x48xf32>
    %20 = arith.truncf %19 : vector<32x48xf32> to vector<32x48xbf16>
    %c2_18 = arith.constant 2 : index
    %c0_19 = arith.constant 0 : index
    %c0_20 = arith.constant 0 : index
    %21 = vector.load %arg3[%c2_18, %c0_19, %c0_20] : memref<3x48x256xbf16, #tpu.memory_space<vmem>>, vector<1x48x256xbf16>
    %22 = vector.shape_cast %21 : vector<1x48x256xbf16> to vector<48x256xbf16>
    %cst_21 = arith.constant dense<0.000000e+00> : vector<32x256xf32>
    %23 = tpu.matmul %20, %22, %cst_21 {dimension_numbers = #tpu.dot_dimension_numbers<[1], [0], [0], [1], [0, 0, 1, 1], [], []>} : vector<32x48xbf16>, vector<48x256xbf16>, vector<32x256xf32> -> vector<32x256xf32>
    %24 = arith.addf %16, %23 : vector<32x256xf32>
    %c0_22 = arith.constant 0 : index
    %c0_23 = arith.constant 0 : index
    %25 = vector.load %arg4[%c0_22, %c0_23] : memref<1x256xf32, #tpu.memory_space<vmem>>, vector<1x256xf32>
    %26 = vector.broadcast %25 : vector<1x256xf32> to vector<32x256xf32>
    %27 = arith.addf %24, %26 : vector<32x256xf32>
    %cst_24 = arith.constant 0.000000e+00 : f32
    %28 = vector.broadcast %cst_24 : f32 to vector<32x256xf32>
    %29 = arith.maximumf %27, %28 : vector<32x256xf32>
    %30 = arith.truncf %29 : vector<32x256xf32> to vector<32x256xbf16>
    %c0_25 = arith.constant 0 : index
    %c0_26 = arith.constant 0 : index
    %c0_27 = arith.constant 0 : index
    %31 = vector.load %arg5[%c0_25, %c0_26, %c0_27] : memref<3x32x32xbf16, #tpu.memory_space<vmem>>, vector<1x32x32xbf16>
    %32 = vector.shape_cast %31 : vector<1x32x32xbf16> to vector<32x32xbf16>
    %cst_28 = arith.constant dense<0.000000e+00> : vector<32x256xf32>
    %33 = tpu.matmul %32, %30, %cst_28 {dimension_numbers = #tpu.dot_dimension_numbers<[1], [0], [0], [1], [0, 0, 1, 1], [], []>} : vector<32x32xbf16>, vector<32x256xbf16>, vector<32x256xf32> -> vector<32x256xf32>
    %34 = arith.truncf %33 : vector<32x256xf32> to vector<32x256xbf16>
    %c0_29 = arith.constant 0 : index
    %c0_30 = arith.constant 0 : index
    %c0_31 = arith.constant 0 : index
    %35 = vector.load %arg6[%c0_29, %c0_30, %c0_31] : memref<3x256x256xbf16, #tpu.memory_space<vmem>>, vector<1x256x256xbf16>
    %36 = vector.shape_cast %35 : vector<1x256x256xbf16> to vector<256x256xbf16>
    %cst_32 = arith.constant dense<0.000000e+00> : vector<32x256xf32>
    %37 = tpu.matmul %34, %36, %cst_32 {dimension_numbers = #tpu.dot_dimension_numbers<[1], [0], [0], [1], [0, 0, 1, 1], [], []>} : vector<32x256xbf16>, vector<256x256xbf16>, vector<32x256xf32> -> vector<32x256xf32>
    %c1_33 = arith.constant 1 : index
    %c0_34 = arith.constant 0 : index
    %c0_35 = arith.constant 0 : index
    %38 = vector.load %arg5[%c1_33, %c0_34, %c0_35] : memref<3x32x32xbf16, #tpu.memory_space<vmem>>, vector<1x32x32xbf16>
    %39 = vector.shape_cast %38 : vector<1x32x32xbf16> to vector<32x32xbf16>
    %cst_36 = arith.constant dense<0.000000e+00> : vector<32x256xf32>
    %40 = tpu.matmul %39, %30, %cst_36 {dimension_numbers = #tpu.dot_dimension_numbers<[1], [0], [0], [1], [0, 0, 1, 1], [], []>} : vector<32x32xbf16>, vector<32x256xbf16>, vector<32x256xf32> -> vector<32x256xf32>
    %41 = arith.truncf %40 : vector<32x256xf32> to vector<32x256xbf16>
    %c1_37 = arith.constant 1 : index
    %c0_38 = arith.constant 0 : index
    %c0_39 = arith.constant 0 : index
    %42 = vector.load %arg6[%c1_37, %c0_38, %c0_39] : memref<3x256x256xbf16, #tpu.memory_space<vmem>>, vector<1x256x256xbf16>
    %43 = vector.shape_cast %42 : vector<1x256x256xbf16> to vector<256x256xbf16>
    %cst_40 = arith.constant dense<0.000000e+00> : vector<32x256xf32>
    %44 = tpu.matmul %41, %43, %cst_40 {dimension_numbers = #tpu.dot_dimension_numbers<[1], [0], [0], [1], [0, 0, 1, 1], [], []>} : vector<32x256xbf16>, vector<256x256xbf16>, vector<32x256xf32> -> vector<32x256xf32>
    %45 = arith.addf %37, %44 : vector<32x256xf32>
    %c2_41 = arith.constant 2 : index
    %c0_42 = arith.constant 0 : index
    %c0_43 = arith.constant 0 : index
    %46 = vector.load %arg5[%c2_41, %c0_42, %c0_43] : memref<3x32x32xbf16, #tpu.memory_space<vmem>>, vector<1x32x32xbf16>
    %47 = vector.shape_cast %46 : vector<1x32x32xbf16> to vector<32x32xbf16>
    %cst_44 = arith.constant dense<0.000000e+00> : vector<32x256xf32>
    %48 = tpu.matmul %47, %30, %cst_44 {dimension_numbers = #tpu.dot_dimension_numbers<[1], [0], [0], [1], [0, 0, 1, 1], [], []>} : vector<32x32xbf16>, vector<32x256xbf16>, vector<32x256xf32> -> vector<32x256xf32>
    %49 = arith.truncf %48 : vector<32x256xf32> to vector<32x256xbf16>
    %c2_45 = arith.constant 2 : index
    %c0_46 = arith.constant 0 : index
    %c0_47 = arith.constant 0 : index
    %50 = vector.load %arg6[%c2_45, %c0_46, %c0_47] : memref<3x256x256xbf16, #tpu.memory_space<vmem>>, vector<1x256x256xbf16>
    %51 = vector.shape_cast %50 : vector<1x256x256xbf16> to vector<256x256xbf16>
    %cst_48 = arith.constant dense<0.000000e+00> : vector<32x256xf32>
    %52 = tpu.matmul %49, %51, %cst_48 {dimension_numbers = #tpu.dot_dimension_numbers<[1], [0], [0], [1], [0, 0, 1, 1], [], []>} : vector<32x256xbf16>, vector<256x256xbf16>, vector<32x256xf32> -> vector<32x256xf32>
    %53 = arith.addf %45, %52 : vector<32x256xf32>
    %c0_49 = arith.constant 0 : index
    %c0_50 = arith.constant 0 : index
    %54 = vector.load %arg7[%c0_49, %c0_50] : memref<1x256xf32, #tpu.memory_space<vmem>>, vector<1x256xf32>
    %55 = vector.broadcast %54 : vector<1x256xf32> to vector<32x256xf32>
    %56 = arith.addf %53, %55 : vector<32x256xf32>
    %cst_51 = arith.constant 0.000000e+00 : f32
    %57 = vector.broadcast %cst_51 : f32 to vector<32x256xf32>
    %58 = arith.maximumf %56, %57 : vector<32x256xf32>
    %59 = arith.truncf %58 : vector<32x256xf32> to vector<32x256xbf16>
    %c0_52 = arith.constant 0 : index
    %c0_53 = arith.constant 0 : index
    %c0_54 = arith.constant 0 : index
    %60 = vector.load %arg8[%c0_52, %c0_53, %c0_54] : memref<3x32x32xbf16, #tpu.memory_space<vmem>>, vector<1x32x32xbf16>
    %61 = vector.shape_cast %60 : vector<1x32x32xbf16> to vector<32x32xbf16>
    %cst_55 = arith.constant dense<0.000000e+00> : vector<32x256xf32>
    %62 = tpu.matmul %61, %59, %cst_55 {dimension_numbers = #tpu.dot_dimension_numbers<[1], [0], [0], [1], [0, 0, 1, 1], [], []>} : vector<32x32xbf16>, vector<32x256xbf16>, vector<32x256xf32> -> vector<32x256xf32>
    %63 = arith.truncf %62 : vector<32x256xf32> to vector<32x256xbf16>
    %c0_56 = arith.constant 0 : index
    %c0_57 = arith.constant 0 : index
    %c0_58 = arith.constant 0 : index
    %64 = vector.load %arg9[%c0_56, %c0_57, %c0_58] : memref<3x256x256xbf16, #tpu.memory_space<vmem>>, vector<1x256x256xbf16>
    %65 = vector.shape_cast %64 : vector<1x256x256xbf16> to vector<256x256xbf16>
    %cst_59 = arith.constant dense<0.000000e+00> : vector<32x256xf32>
    %66 = tpu.matmul %63, %65, %cst_59 {dimension_numbers = #tpu.dot_dimension_numbers<[1], [0], [0], [1], [0, 0, 1, 1], [], []>} : vector<32x256xbf16>, vector<256x256xbf16>, vector<32x256xf32> -> vector<32x256xf32>
    %c1_60 = arith.constant 1 : index
    %c0_61 = arith.constant 0 : index
    %c0_62 = arith.constant 0 : index
    %67 = vector.load %arg8[%c1_60, %c0_61, %c0_62] : memref<3x32x32xbf16, #tpu.memory_space<vmem>>, vector<1x32x32xbf16>
    %68 = vector.shape_cast %67 : vector<1x32x32xbf16> to vector<32x32xbf16>
    %cst_63 = arith.constant dense<0.000000e+00> : vector<32x256xf32>
    %69 = tpu.matmul %68, %59, %cst_63 {dimension_numbers = #tpu.dot_dimension_numbers<[1], [0], [0], [1], [0, 0, 1, 1], [], []>} : vector<32x32xbf16>, vector<32x256xbf16>, vector<32x256xf32> -> vector<32x256xf32>
    %70 = arith.truncf %69 : vector<32x256xf32> to vector<32x256xbf16>
    %c1_64 = arith.constant 1 : index
    %c0_65 = arith.constant 0 : index
    %c0_66 = arith.constant 0 : index
    %71 = vector.load %arg9[%c1_64, %c0_65, %c0_66] : memref<3x256x256xbf16, #tpu.memory_space<vmem>>, vector<1x256x256xbf16>
    %72 = vector.shape_cast %71 : vector<1x256x256xbf16> to vector<256x256xbf16>
    %cst_67 = arith.constant dense<0.000000e+00> : vector<32x256xf32>
    %73 = tpu.matmul %70, %72, %cst_67 {dimension_numbers = #tpu.dot_dimension_numbers<[1], [0], [0], [1], [0, 0, 1, 1], [], []>} : vector<32x256xbf16>, vector<256x256xbf16>, vector<32x256xf32> -> vector<32x256xf32>
    %74 = arith.addf %66, %73 : vector<32x256xf32>
    %c2_68 = arith.constant 2 : index
    %c0_69 = arith.constant 0 : index
    %c0_70 = arith.constant 0 : index
    %75 = vector.load %arg8[%c2_68, %c0_69, %c0_70] : memref<3x32x32xbf16, #tpu.memory_space<vmem>>, vector<1x32x32xbf16>
    %76 = vector.shape_cast %75 : vector<1x32x32xbf16> to vector<32x32xbf16>
    %cst_71 = arith.constant dense<0.000000e+00> : vector<32x256xf32>
    %77 = tpu.matmul %76, %59, %cst_71 {dimension_numbers = #tpu.dot_dimension_numbers<[1], [0], [0], [1], [0, 0, 1, 1], [], []>} : vector<32x32xbf16>, vector<32x256xbf16>, vector<32x256xf32> -> vector<32x256xf32>
    %78 = arith.truncf %77 : vector<32x256xf32> to vector<32x256xbf16>
    %c2_72 = arith.constant 2 : index
    %c0_73 = arith.constant 0 : index
    %c0_74 = arith.constant 0 : index
    %79 = vector.load %arg9[%c2_72, %c0_73, %c0_74] : memref<3x256x256xbf16, #tpu.memory_space<vmem>>, vector<1x256x256xbf16>
    %80 = vector.shape_cast %79 : vector<1x256x256xbf16> to vector<256x256xbf16>
    %cst_75 = arith.constant dense<0.000000e+00> : vector<32x256xf32>
    %81 = tpu.matmul %78, %80, %cst_75 {dimension_numbers = #tpu.dot_dimension_numbers<[1], [0], [0], [1], [0, 0, 1, 1], [], []>} : vector<32x256xbf16>, vector<256x256xbf16>, vector<32x256xf32> -> vector<32x256xf32>
    %82 = arith.addf %74, %81 : vector<32x256xf32>
    %c0_76 = arith.constant 0 : index
    %c0_77 = arith.constant 0 : index
    %83 = vector.load %arg10[%c0_76, %c0_77] : memref<1x256xf32, #tpu.memory_space<vmem>>, vector<1x256xf32>
    %84 = vector.broadcast %83 : vector<1x256xf32> to vector<32x256xf32>
    %85 = arith.addf %82, %84 : vector<32x256xf32>
    %86 = arith.addf %85, %29 : vector<32x256xf32>
    %cst_78 = arith.constant 0.000000e+00 : f32
    %87 = vector.broadcast %cst_78 : f32 to vector<32x256xf32>
    %88 = arith.maximumf %86, %87 : vector<32x256xf32>
    %89 = arith.truncf %88 : vector<32x256xf32> to vector<32x256xbf16>
    %c0_79 = arith.constant 0 : index
    %c0_80 = arith.constant 0 : index
    %c0_81 = arith.constant 0 : index
    %90 = vector.load %arg11[%c0_79, %c0_80, %c0_81] : memref<3x16x32xbf16, #tpu.memory_space<vmem>>, vector<1x16x32xbf16>
    %91 = vector.shape_cast %90 : vector<1x16x32xbf16> to vector<16x32xbf16>
    %cst_82 = arith.constant dense<0.000000e+00> : vector<16x256xf32>
    %92 = tpu.matmul %91, %89, %cst_82 {dimension_numbers = #tpu.dot_dimension_numbers<[1], [0], [0], [1], [0, 0, 1, 1], [], []>} : vector<16x32xbf16>, vector<32x256xbf16>, vector<16x256xf32> -> vector<16x256xf32>
    %93 = arith.truncf %92 : vector<16x256xf32> to vector<16x256xbf16>
    %c0_83 = arith.constant 0 : index
    %c0_84 = arith.constant 0 : index
    %c0_85 = arith.constant 0 : index
    %94 = vector.load %arg12[%c0_83, %c0_84, %c0_85] : memref<3x256x256xbf16, #tpu.memory_space<vmem>>, vector<1x256x256xbf16>
    %95 = vector.shape_cast %94 : vector<1x256x256xbf16> to vector<256x256xbf16>
    %cst_86 = arith.constant dense<0.000000e+00> : vector<16x256xf32>
    %96 = tpu.matmul %93, %95, %cst_86 {dimension_numbers = #tpu.dot_dimension_numbers<[1], [0], [0], [1], [0, 0, 1, 1], [], []>} : vector<16x256xbf16>, vector<256x256xbf16>, vector<16x256xf32> -> vector<16x256xf32>
    %c1_87 = arith.constant 1 : index
    %c0_88 = arith.constant 0 : index
    %c0_89 = arith.constant 0 : index
    %97 = vector.load %arg11[%c1_87, %c0_88, %c0_89] : memref<3x16x32xbf16, #tpu.memory_space<vmem>>, vector<1x16x32xbf16>
    %98 = vector.shape_cast %97 : vector<1x16x32xbf16> to vector<16x32xbf16>
    %cst_90 = arith.constant dense<0.000000e+00> : vector<16x256xf32>
    %99 = tpu.matmul %98, %89, %cst_90 {dimension_numbers = #tpu.dot_dimension_numbers<[1], [0], [0], [1], [0, 0, 1, 1], [], []>} : vector<16x32xbf16>, vector<32x256xbf16>, vector<16x256xf32> -> vector<16x256xf32>
    %100 = arith.truncf %99 : vector<16x256xf32> to vector<16x256xbf16>
    %c1_91 = arith.constant 1 : index
    %c0_92 = arith.constant 0 : index
    %c0_93 = arith.constant 0 : index
    %101 = vector.load %arg12[%c1_91, %c0_92, %c0_93] : memref<3x256x256xbf16, #tpu.memory_space<vmem>>, vector<1x256x256xbf16>
    %102 = vector.shape_cast %101 : vector<1x256x256xbf16> to vector<256x256xbf16>
    %cst_94 = arith.constant dense<0.000000e+00> : vector<16x256xf32>
    %103 = tpu.matmul %100, %102, %cst_94 {dimension_numbers = #tpu.dot_dimension_numbers<[1], [0], [0], [1], [0, 0, 1, 1], [], []>} : vector<16x256xbf16>, vector<256x256xbf16>, vector<16x256xf32> -> vector<16x256xf32>
    %104 = arith.addf %96, %103 : vector<16x256xf32>
    %c2_95 = arith.constant 2 : index
    %c0_96 = arith.constant 0 : index
    %c0_97 = arith.constant 0 : index
    %105 = vector.load %arg11[%c2_95, %c0_96, %c0_97] : memref<3x16x32xbf16, #tpu.memory_space<vmem>>, vector<1x16x32xbf16>
    %106 = vector.shape_cast %105 : vector<1x16x32xbf16> to vector<16x32xbf16>
    %cst_98 = arith.constant dense<0.000000e+00> : vector<16x256xf32>
    %107 = tpu.matmul %106, %89, %cst_98 {dimension_numbers = #tpu.dot_dimension_numbers<[1], [0], [0], [1], [0, 0, 1, 1], [], []>} : vector<16x32xbf16>, vector<32x256xbf16>, vector<16x256xf32> -> vector<16x256xf32>
    %108 = arith.truncf %107 : vector<16x256xf32> to vector<16x256xbf16>
    %c2_99 = arith.constant 2 : index
    %c0_100 = arith.constant 0 : index
    %c0_101 = arith.constant 0 : index
    %109 = vector.load %arg12[%c2_99, %c0_100, %c0_101] : memref<3x256x256xbf16, #tpu.memory_space<vmem>>, vector<1x256x256xbf16>
    %110 = vector.shape_cast %109 : vector<1x256x256xbf16> to vector<256x256xbf16>
    %cst_102 = arith.constant dense<0.000000e+00> : vector<16x256xf32>
    %111 = tpu.matmul %108, %110, %cst_102 {dimension_numbers = #tpu.dot_dimension_numbers<[1], [0], [0], [1], [0, 0, 1, 1], [], []>} : vector<16x256xbf16>, vector<256x256xbf16>, vector<16x256xf32> -> vector<16x256xf32>
    %112 = arith.addf %104, %111 : vector<16x256xf32>
    %c0_103 = arith.constant 0 : index
    %c0_104 = arith.constant 0 : index
    %113 = vector.load %arg13[%c0_103, %c0_104] : memref<1x256xf32, #tpu.memory_space<vmem>>, vector<1x256xf32>
    %114 = vector.broadcast %113 : vector<1x256xf32> to vector<16x256xf32>
    %115 = arith.addf %112, %114 : vector<16x256xf32>
    %cst_105 = arith.constant 0.000000e+00 : f32
    %116 = vector.broadcast %cst_105 : f32 to vector<16x256xf32>
    %117 = arith.maximumf %115, %116 : vector<16x256xf32>
    %118 = arith.truncf %88 : vector<32x256xf32> to vector<32x256xbf16>
    %c0_106 = arith.constant 0 : index
    %c0_107 = arith.constant 0 : index
    %c0_108 = arith.constant 0 : index
    %119 = vector.load %arg14[%c0_106, %c0_107, %c0_108] : memref<1x16x32xbf16, #tpu.memory_space<vmem>>, vector<1x16x32xbf16>
    %120 = vector.shape_cast %119 : vector<1x16x32xbf16> to vector<16x32xbf16>
    %cst_109 = arith.constant dense<0.000000e+00> : vector<16x256xf32>
    %121 = tpu.matmul %120, %118, %cst_109 {dimension_numbers = #tpu.dot_dimension_numbers<[1], [0], [0], [1], [0, 0, 1, 1], [], []>} : vector<16x32xbf16>, vector<32x256xbf16>, vector<16x256xf32> -> vector<16x256xf32>
    %122 = arith.truncf %121 : vector<16x256xf32> to vector<16x256xbf16>
    %c0_110 = arith.constant 0 : index
    %c0_111 = arith.constant 0 : index
    %c0_112 = arith.constant 0 : index
    %123 = vector.load %arg15[%c0_110, %c0_111, %c0_112] : memref<1x256x256xbf16, #tpu.memory_space<vmem>>, vector<1x256x256xbf16>
    %124 = vector.shape_cast %123 : vector<1x256x256xbf16> to vector<256x256xbf16>
    %cst_113 = arith.constant dense<0.000000e+00> : vector<16x256xf32>
    %125 = tpu.matmul %122, %124, %cst_113 {dimension_numbers = #tpu.dot_dimension_numbers<[1], [0], [0], [1], [0, 0, 1, 1], [], []>} : vector<16x256xbf16>, vector<256x256xbf16>, vector<16x256xf32> -> vector<16x256xf32>
    %c0_114 = arith.constant 0 : index
    %c0_115 = arith.constant 0 : index
    %126 = vector.load %arg16[%c0_114, %c0_115] : memref<1x256xf32, #tpu.memory_space<vmem>>, vector<1x256xf32>
    %127 = vector.broadcast %126 : vector<1x256xf32> to vector<16x256xf32>
    %128 = arith.addf %125, %127 : vector<16x256xf32>
    %129 = arith.truncf %117 : vector<16x256xf32> to vector<16x256xbf16>
    %c0_116 = arith.constant 0 : index
    %c0_117 = arith.constant 0 : index
    %c0_118 = arith.constant 0 : index
    %130 = vector.load %arg17[%c0_116, %c0_117, %c0_118] : memref<3x16x16xbf16, #tpu.memory_space<vmem>>, vector<1x16x16xbf16>
    %131 = vector.shape_cast %130 : vector<1x16x16xbf16> to vector<16x16xbf16>
    %cst_119 = arith.constant dense<0.000000e+00> : vector<16x256xf32>
    %132 = tpu.matmul %131, %129, %cst_119 {dimension_numbers = #tpu.dot_dimension_numbers<[1], [0], [0], [1], [0, 0, 1, 1], [], []>} : vector<16x16xbf16>, vector<16x256xbf16>, vector<16x256xf32> -> vector<16x256xf32>
    %133 = arith.truncf %132 : vector<16x256xf32> to vector<16x256xbf16>
    %c0_120 = arith.constant 0 : index
    %c0_121 = arith.constant 0 : index
    %c0_122 = arith.constant 0 : index
    %134 = vector.load %arg18[%c0_120, %c0_121, %c0_122] : memref<3x256x256xbf16, #tpu.memory_space<vmem>>, vector<1x256x256xbf16>
    %135 = vector.shape_cast %134 : vector<1x256x256xbf16> to vector<256x256xbf16>
    %cst_123 = arith.constant dense<0.000000e+00> : vector<16x256xf32>
    %136 = tpu.matmul %133, %135, %cst_123 {dimension_numbers = #tpu.dot_dimension_numbers<[1], [0], [0], [1], [0, 0, 1, 1], [], []>} : vector<16x256xbf16>, vector<256x256xbf16>, vector<16x256xf32> -> vector<16x256xf32>
    %c1_124 = arith.constant 1 : index
    %c0_125 = arith.constant 0 : index
    %c0_126 = arith.constant 0 : index
    %137 = vector.load %arg17[%c1_124, %c0_125, %c0_126] : memref<3x16x16xbf16, #tpu.memory_space<vmem>>, vector<1x16x16xbf16>
    %138 = vector.shape_cast %137 : vector<1x16x16xbf16> to vector<16x16xbf16>
    %cst_127 = arith.constant dense<0.000000e+00> : vector<16x256xf32>
    %139 = tpu.matmul %138, %129, %cst_127 {dimension_numbers = #tpu.dot_dimension_numbers<[1], [0], [0], [1], [0, 0, 1, 1], [], []>} : vector<16x16xbf16>, vector<16x256xbf16>, vector<16x256xf32> -> vector<16x256xf32>
    %140 = arith.truncf %139 : vector<16x256xf32> to vector<16x256xbf16>
    %c1_128 = arith.constant 1 : index
    %c0_129 = arith.constant 0 : index
    %c0_130 = arith.constant 0 : index
    %141 = vector.load %arg18[%c1_128, %c0_129, %c0_130] : memref<3x256x256xbf16, #tpu.memory_space<vmem>>, vector<1x256x256xbf16>
    %142 = vector.shape_cast %141 : vector<1x256x256xbf16> to vector<256x256xbf16>
    %cst_131 = arith.constant dense<0.000000e+00> : vector<16x256xf32>
    %143 = tpu.matmul %140, %142, %cst_131 {dimension_numbers = #tpu.dot_dimension_numbers<[1], [0], [0], [1], [0, 0, 1, 1], [], []>} : vector<16x256xbf16>, vector<256x256xbf16>, vector<16x256xf32> -> vector<16x256xf32>
    %144 = arith.addf %136, %143 : vector<16x256xf32>
    %c2_132 = arith.constant 2 : index
    %c0_133 = arith.constant 0 : index
    %c0_134 = arith.constant 0 : index
    %145 = vector.load %arg17[%c2_132, %c0_133, %c0_134] : memref<3x16x16xbf16, #tpu.memory_space<vmem>>, vector<1x16x16xbf16>
    %146 = vector.shape_cast %145 : vector<1x16x16xbf16> to vector<16x16xbf16>
    %cst_135 = arith.constant dense<0.000000e+00> : vector<16x256xf32>
    %147 = tpu.matmul %146, %129, %cst_135 {dimension_numbers = #tpu.dot_dimension_numbers<[1], [0], [0], [1], [0, 0, 1, 1], [], []>} : vector<16x16xbf16>, vector<16x256xbf16>, vector<16x256xf32> -> vector<16x256xf32>
    %148 = arith.truncf %147 : vector<16x256xf32> to vector<16x256xbf16>
    %c2_136 = arith.constant 2 : index
    %c0_137 = arith.constant 0 : index
    %c0_138 = arith.constant 0 : index
    %149 = vector.load %arg18[%c2_136, %c0_137, %c0_138] : memref<3x256x256xbf16, #tpu.memory_space<vmem>>, vector<1x256x256xbf16>
    %150 = vector.shape_cast %149 : vector<1x256x256xbf16> to vector<256x256xbf16>
    %cst_139 = arith.constant dense<0.000000e+00> : vector<16x256xf32>
    %151 = tpu.matmul %148, %150, %cst_139 {dimension_numbers = #tpu.dot_dimension_numbers<[1], [0], [0], [1], [0, 0, 1, 1], [], []>} : vector<16x256xbf16>, vector<256x256xbf16>, vector<16x256xf32> -> vector<16x256xf32>
    %152 = arith.addf %144, %151 : vector<16x256xf32>
    %c0_140 = arith.constant 0 : index
    %c0_141 = arith.constant 0 : index
    %153 = vector.load %arg19[%c0_140, %c0_141] : memref<1x256xf32, #tpu.memory_space<vmem>>, vector<1x256xf32>
    %154 = vector.broadcast %153 : vector<1x256xf32> to vector<16x256xf32>
    %155 = arith.addf %152, %154 : vector<16x256xf32>
    %156 = arith.addf %155, %128 : vector<16x256xf32>
    %cst_142 = arith.constant 0.000000e+00 : f32
    %157 = vector.broadcast %cst_142 : f32 to vector<16x256xf32>
    %158 = arith.maximumf %156, %157 : vector<16x256xf32>
    %159 = arith.truncf %158 : vector<16x256xf32> to vector<16x256xbf16>
    %c0_143 = arith.constant 0 : index
    %c0_144 = arith.constant 0 : index
    %c0_145 = arith.constant 0 : index
    %160 = vector.load %arg20[%c0_143, %c0_144, %c0_145] : memref<3x8x16xbf16, #tpu.memory_space<vmem>>, vector<1x8x16xbf16>
    %161 = vector.shape_cast %160 : vector<1x8x16xbf16> to vector<8x16xbf16>
    %cst_146 = arith.constant dense<0.000000e+00> : vector<8x256xf32>
    %162 = tpu.matmul %161, %159, %cst_146 {dimension_numbers = #tpu.dot_dimension_numbers<[1], [0], [0], [1], [0, 0, 1, 1], [], []>} : vector<8x16xbf16>, vector<16x256xbf16>, vector<8x256xf32> -> vector<8x256xf32>
    %163 = arith.truncf %162 : vector<8x256xf32> to vector<8x256xbf16>
    %c0_147 = arith.constant 0 : index
    %c0_148 = arith.constant 0 : index
    %c0_149 = arith.constant 0 : index
    %164 = vector.load %arg21[%c0_147, %c0_148, %c0_149] : memref<3x256x256xbf16, #tpu.memory_space<vmem>>, vector<1x256x256xbf16>
    %165 = vector.shape_cast %164 : vector<1x256x256xbf16> to vector<256x256xbf16>
    %cst_150 = arith.constant dense<0.000000e+00> : vector<8x256xf32>
    %166 = tpu.matmul %163, %165, %cst_150 {dimension_numbers = #tpu.dot_dimension_numbers<[1], [0], [0], [1], [0, 0, 1, 1], [], []>} : vector<8x256xbf16>, vector<256x256xbf16>, vector<8x256xf32> -> vector<8x256xf32>
    %c1_151 = arith.constant 1 : index
    %c0_152 = arith.constant 0 : index
    %c0_153 = arith.constant 0 : index
    %167 = vector.load %arg20[%c1_151, %c0_152, %c0_153] : memref<3x8x16xbf16, #tpu.memory_space<vmem>>, vector<1x8x16xbf16>
    %168 = vector.shape_cast %167 : vector<1x8x16xbf16> to vector<8x16xbf16>
    %cst_154 = arith.constant dense<0.000000e+00> : vector<8x256xf32>
    %169 = tpu.matmul %168, %159, %cst_154 {dimension_numbers = #tpu.dot_dimension_numbers<[1], [0], [0], [1], [0, 0, 1, 1], [], []>} : vector<8x16xbf16>, vector<16x256xbf16>, vector<8x256xf32> -> vector<8x256xf32>
    %170 = arith.truncf %169 : vector<8x256xf32> to vector<8x256xbf16>
    %c1_155 = arith.constant 1 : index
    %c0_156 = arith.constant 0 : index
    %c0_157 = arith.constant 0 : index
    %171 = vector.load %arg21[%c1_155, %c0_156, %c0_157] : memref<3x256x256xbf16, #tpu.memory_space<vmem>>, vector<1x256x256xbf16>
    %172 = vector.shape_cast %171 : vector<1x256x256xbf16> to vector<256x256xbf16>
    %cst_158 = arith.constant dense<0.000000e+00> : vector<8x256xf32>
    %173 = tpu.matmul %170, %172, %cst_158 {dimension_numbers = #tpu.dot_dimension_numbers<[1], [0], [0], [1], [0, 0, 1, 1], [], []>} : vector<8x256xbf16>, vector<256x256xbf16>, vector<8x256xf32> -> vector<8x256xf32>
    %174 = arith.addf %166, %173 : vector<8x256xf32>
    %c2_159 = arith.constant 2 : index
    %c0_160 = arith.constant 0 : index
    %c0_161 = arith.constant 0 : index
    %175 = vector.load %arg20[%c2_159, %c0_160, %c0_161] : memref<3x8x16xbf16, #tpu.memory_space<vmem>>, vector<1x8x16xbf16>
    %176 = vector.shape_cast %175 : vector<1x8x16xbf16> to vector<8x16xbf16>
    %cst_162 = arith.constant dense<0.000000e+00> : vector<8x256xf32>
    %177 = tpu.matmul %176, %159, %cst_162 {dimension_numbers = #tpu.dot_dimension_numbers<[1], [0], [0], [1], [0, 0, 1, 1], [], []>} : vector<8x16xbf16>, vector<16x256xbf16>, vector<8x256xf32> -> vector<8x256xf32>
    %178 = arith.truncf %177 : vector<8x256xf32> to vector<8x256xbf16>
    %c2_163 = arith.constant 2 : index
    %c0_164 = arith.constant 0 : index
    %c0_165 = arith.constant 0 : index
    %179 = vector.load %arg21[%c2_163, %c0_164, %c0_165] : memref<3x256x256xbf16, #tpu.memory_space<vmem>>, vector<1x256x256xbf16>
    %180 = vector.shape_cast %179 : vector<1x256x256xbf16> to vector<256x256xbf16>
    %cst_166 = arith.constant dense<0.000000e+00> : vector<8x256xf32>
    %181 = tpu.matmul %178, %180, %cst_166 {dimension_numbers = #tpu.dot_dimension_numbers<[1], [0], [0], [1], [0, 0, 1, 1], [], []>} : vector<8x256xbf16>, vector<256x256xbf16>, vector<8x256xf32> -> vector<8x256xf32>
    %182 = arith.addf %174, %181 : vector<8x256xf32>
    %c0_167 = arith.constant 0 : index
    %c0_168 = arith.constant 0 : index
    %183 = vector.load %arg22[%c0_167, %c0_168] : memref<1x256xf32, #tpu.memory_space<vmem>>, vector<1x256xf32>
    %184 = vector.broadcast %183 : vector<1x256xf32> to vector<8x256xf32>
    %185 = arith.addf %182, %184 : vector<8x256xf32>
    %cst_169 = arith.constant 0.000000e+00 : f32
    %186 = vector.broadcast %cst_169 : f32 to vector<8x256xf32>
    %187 = arith.maximumf %185, %186 : vector<8x256xf32>
    %188 = arith.truncf %158 : vector<16x256xf32> to vector<16x256xbf16>
    %c0_170 = arith.constant 0 : index
    %c0_171 = arith.constant 0 : index
    %c0_172 = arith.constant 0 : index
    %189 = vector.load %arg23[%c0_170, %c0_171, %c0_172] : memref<1x8x16xbf16, #tpu.memory_space<vmem>>, vector<1x8x16xbf16>
    %190 = vector.shape_cast %189 : vector<1x8x16xbf16> to vector<8x16xbf16>
    %cst_173 = arith.constant dense<0.000000e+00> : vector<8x256xf32>
    %191 = tpu.matmul %190, %188, %cst_173 {dimension_numbers = #tpu.dot_dimension_numbers<[1], [0], [0], [1], [0, 0, 1, 1], [], []>} : vector<8x16xbf16>, vector<16x256xbf16>, vector<8x256xf32> -> vector<8x256xf32>
    %192 = arith.truncf %191 : vector<8x256xf32> to vector<8x256xbf16>
    %c0_174 = arith.constant 0 : index
    %c0_175 = arith.constant 0 : index
    %c0_176 = arith.constant 0 : index
    %193 = vector.load %arg24[%c0_174, %c0_175, %c0_176] : memref<1x256x256xbf16, #tpu.memory_space<vmem>>, vector<1x256x256xbf16>
    %194 = vector.shape_cast %193 : vector<1x256x256xbf16> to vector<256x256xbf16>
    %cst_177 = arith.constant dense<0.000000e+00> : vector<8x256xf32>
    %195 = tpu.matmul %192, %194, %cst_177 {dimension_numbers = #tpu.dot_dimension_numbers<[1], [0], [0], [1], [0, 0, 1, 1], [], []>} : vector<8x256xbf16>, vector<256x256xbf16>, vector<8x256xf32> -> vector<8x256xf32>
    %c0_178 = arith.constant 0 : index
    %c0_179 = arith.constant 0 : index
    %196 = vector.load %arg25[%c0_178, %c0_179] : memref<1x256xf32, #tpu.memory_space<vmem>>, vector<1x256xf32>
    %197 = vector.broadcast %196 : vector<1x256xf32> to vector<8x256xf32>
    %198 = arith.addf %195, %197 : vector<8x256xf32>
    %199 = arith.truncf %187 : vector<8x256xf32> to vector<8x256xbf16>
    %c0_180 = arith.constant 0 : index
    %c0_181 = arith.constant 0 : index
    %c0_182 = arith.constant 0 : index
    %200 = vector.load %arg26[%c0_180, %c0_181, %c0_182] : memref<3x8x8xbf16, #tpu.memory_space<vmem>>, vector<1x8x8xbf16>
    %201 = vector.shape_cast %200 : vector<1x8x8xbf16> to vector<8x8xbf16>
    %cst_183 = arith.constant dense<0.000000e+00> : vector<8x256xf32>
    %202 = tpu.matmul %201, %199, %cst_183 {dimension_numbers = #tpu.dot_dimension_numbers<[1], [0], [0], [1], [0, 0, 1, 1], [], []>} : vector<8x8xbf16>, vector<8x256xbf16>, vector<8x256xf32> -> vector<8x256xf32>
    %203 = arith.truncf %202 : vector<8x256xf32> to vector<8x256xbf16>
    %c0_184 = arith.constant 0 : index
    %c0_185 = arith.constant 0 : index
    %c0_186 = arith.constant 0 : index
    %204 = vector.load %arg27[%c0_184, %c0_185, %c0_186] : memref<3x256x256xbf16, #tpu.memory_space<vmem>>, vector<1x256x256xbf16>
    %205 = vector.shape_cast %204 : vector<1x256x256xbf16> to vector<256x256xbf16>
    %cst_187 = arith.constant dense<0.000000e+00> : vector<8x256xf32>
    %206 = tpu.matmul %203, %205, %cst_187 {dimension_numbers = #tpu.dot_dimension_numbers<[1], [0], [0], [1], [0, 0, 1, 1], [], []>} : vector<8x256xbf16>, vector<256x256xbf16>, vector<8x256xf32> -> vector<8x256xf32>
    %c1_188 = arith.constant 1 : index
    %c0_189 = arith.constant 0 : index
    %c0_190 = arith.constant 0 : index
    %207 = vector.load %arg26[%c1_188, %c0_189, %c0_190] : memref<3x8x8xbf16, #tpu.memory_space<vmem>>, vector<1x8x8xbf16>
    %208 = vector.shape_cast %207 : vector<1x8x8xbf16> to vector<8x8xbf16>
    %cst_191 = arith.constant dense<0.000000e+00> : vector<8x256xf32>
    %209 = tpu.matmul %208, %199, %cst_191 {dimension_numbers = #tpu.dot_dimension_numbers<[1], [0], [0], [1], [0, 0, 1, 1], [], []>} : vector<8x8xbf16>, vector<8x256xbf16>, vector<8x256xf32> -> vector<8x256xf32>
    %210 = arith.truncf %209 : vector<8x256xf32> to vector<8x256xbf16>
    %c1_192 = arith.constant 1 : index
    %c0_193 = arith.constant 0 : index
    %c0_194 = arith.constant 0 : index
    %211 = vector.load %arg27[%c1_192, %c0_193, %c0_194] : memref<3x256x256xbf16, #tpu.memory_space<vmem>>, vector<1x256x256xbf16>
    %212 = vector.shape_cast %211 : vector<1x256x256xbf16> to vector<256x256xbf16>
    %cst_195 = arith.constant dense<0.000000e+00> : vector<8x256xf32>
    %213 = tpu.matmul %210, %212, %cst_195 {dimension_numbers = #tpu.dot_dimension_numbers<[1], [0], [0], [1], [0, 0, 1, 1], [], []>} : vector<8x256xbf16>, vector<256x256xbf16>, vector<8x256xf32> -> vector<8x256xf32>
    %214 = arith.addf %206, %213 : vector<8x256xf32>
    %c2_196 = arith.constant 2 : index
    %c0_197 = arith.constant 0 : index
    %c0_198 = arith.constant 0 : index
    %215 = vector.load %arg26[%c2_196, %c0_197, %c0_198] : memref<3x8x8xbf16, #tpu.memory_space<vmem>>, vector<1x8x8xbf16>
    %216 = vector.shape_cast %215 : vector<1x8x8xbf16> to vector<8x8xbf16>
    %cst_199 = arith.constant dense<0.000000e+00> : vector<8x256xf32>
    %217 = tpu.matmul %216, %199, %cst_199 {dimension_numbers = #tpu.dot_dimension_numbers<[1], [0], [0], [1], [0, 0, 1, 1], [], []>} : vector<8x8xbf16>, vector<8x256xbf16>, vector<8x256xf32> -> vector<8x256xf32>
    %218 = arith.truncf %217 : vector<8x256xf32> to vector<8x256xbf16>
    %c2_200 = arith.constant 2 : index
    %c0_201 = arith.constant 0 : index
    %c0_202 = arith.constant 0 : index
    %219 = vector.load %arg27[%c2_200, %c0_201, %c0_202] : memref<3x256x256xbf16, #tpu.memory_space<vmem>>, vector<1x256x256xbf16>
    %220 = vector.shape_cast %219 : vector<1x256x256xbf16> to vector<256x256xbf16>
    %cst_203 = arith.constant dense<0.000000e+00> : vector<8x256xf32>
    %221 = tpu.matmul %218, %220, %cst_203 {dimension_numbers = #tpu.dot_dimension_numbers<[1], [0], [0], [1], [0, 0, 1, 1], [], []>} : vector<8x256xbf16>, vector<256x256xbf16>, vector<8x256xf32> -> vector<8x256xf32>
    %222 = arith.addf %214, %221 : vector<8x256xf32>
    %c0_204 = arith.constant 0 : index
    %c0_205 = arith.constant 0 : index
    %223 = vector.load %arg28[%c0_204, %c0_205] : memref<1x256xf32, #tpu.memory_space<vmem>>, vector<1x256xf32>
    %224 = vector.broadcast %223 : vector<1x256xf32> to vector<8x256xf32>
    %225 = arith.addf %222, %224 : vector<8x256xf32>
    %226 = arith.addf %225, %198 : vector<8x256xf32>
    %cst_206 = arith.constant 0.000000e+00 : f32
    %227 = vector.broadcast %cst_206 : f32 to vector<8x256xf32>
    %228 = arith.maximumf %226, %227 : vector<8x256xf32>
    %c0_207 = arith.constant 0 : index
    %c0_208 = arith.constant 0 : index
    %229 = vector.load %arg29[%c0_207, %c0_208] : memref<2x8xf32, #tpu.memory_space<vmem>>, vector<2x8xf32>
    %cst_209 = arith.constant dense<0.000000e+00> : vector<2x256xf32>
    %230 = tpu.matmul %229, %228, %cst_209 {dimension_numbers = #tpu.dot_dimension_numbers<[1], [0], [0], [1], [0, 0, 1, 1], [], []>} : vector<2x8xf32>, vector<8x256xf32>, vector<2x256xf32> -> vector<2x256xf32>
    %c0_210 = arith.constant 0 : index
    %c0_211 = arith.constant 0 : index
    %231 = vector.load %arg30[%c0_210, %c0_211] : memref<256x10xf32, #tpu.memory_space<vmem>>, vector<256x10xf32>
    %cst_212 = arith.constant dense<0.000000e+00> : vector<2x10xf32>
    %232 = tpu.matmul %230, %231, %cst_212 {dimension_numbers = #tpu.dot_dimension_numbers<[1], [0], [0], [1], [0, 0, 1, 1], [], []>} : vector<2x256xf32>, vector<256x10xf32>, vector<2x10xf32> -> vector<2x10xf32>
    %c0_213 = arith.constant 0 : index
    %c0_214 = arith.constant 0 : index
    %233 = vector.load %arg31[%c0_213, %c0_214] : memref<1x10xf32, #tpu.memory_space<vmem>>, vector<1x10xf32>
    %234 = vector.broadcast %233 : vector<1x10xf32> to vector<2x10xf32>
    %235 = arith.addf %232, %234 : vector<2x10xf32>
    %c0_215 = arith.constant 0 : index
    %c0_216 = arith.constant 0 : index
    %236 = vector.load %arg32[%c0_215, %c0_216] : memref<2x10xf32, #tpu.memory_space<vmem>>, vector<2x10xf32>
    tpu.vector_store %arg32[%c0_215, %c0_216], %235 {strides = array<i32>} : memref<2x10xf32, #tpu.memory_space<vmem>>, vector<2x10xf32>,
    return
  }
  func.func @transform_0(%arg0: i32) -> (i32, i32) {
    %c0_i32 = arith.constant 0 : i32
    %c0_i32_0 = arith.constant 0 : i32
    %c0_i32_1 = arith.constant 0 : i32
    return %c0_i32, %c0_i32_0 : i32, i32
  }
  func.func @transform_1(%arg0: i32) -> (i32, i32, i32) {
    %c0_i32 = arith.constant 0 : i32
    %c0_i32_0 = arith.constant 0 : i32
    %c0_i32_1 = arith.constant 0 : i32
    %c0_i32_2 = arith.constant 0 : i32
    return %c0_i32, %c0_i32_0, %c0_i32_1 : i32, i32, i32
  }
  func.func @transform_2(%arg0: i32) -> (i32, i32, i32) {
    %c0_i32 = arith.constant 0 : i32
    %c0_i32_0 = arith.constant 0 : i32
    %c0_i32_1 = arith.constant 0 : i32
    %c0_i32_2 = arith.constant 0 : i32
    return %c0_i32, %c0_i32_0, %c0_i32_1 : i32, i32, i32
  }
  func.func @transform_3(%arg0: i32) -> (i32, i32) {
    %c0_i32 = arith.constant 0 : i32
    %c0_i32_0 = arith.constant 0 : i32
    %c0_i32_1 = arith.constant 0 : i32
    return %c0_i32, %c0_i32_0 : i32, i32
  }
  func.func @transform_4(%arg0: i32) -> (i32, i32, i32) {
    %c0_i32 = arith.constant 0 : i32
    %c0_i32_0 = arith.constant 0 : i32
    %c0_i32_1 = arith.constant 0 : i32
    %c0_i32_2 = arith.constant 0 : i32
    return %c0_i32, %c0_i32_0, %c0_i32_1 : i32, i32, i32
  }
  func.func @transform_5(%arg0: i32) -> (i32, i32, i32) {
    %c0_i32 = arith.constant 0 : i32
    %c0_i32_0 = arith.constant 0 : i32
    %c0_i32_1 = arith.constant 0 : i32
    %c0_i32_2 = arith.constant 0 : i32
    return %c0_i32, %c0_i32_0, %c0_i32_1 : i32, i32, i32
  }
  func.func @transform_6(%arg0: i32) -> (i32, i32) {
    %c0_i32 = arith.constant 0 : i32
    %c0_i32_0 = arith.constant 0 : i32
    %c0_i32_1 = arith.constant 0 : i32
    return %c0_i32, %c0_i32_0 : i32, i32
  }
  func.func @transform_7(%arg0: i32) -> (i32, i32, i32) {
    %c0_i32 = arith.constant 0 : i32
    %c0_i32_0 = arith.constant 0 : i32
    %c0_i32_1 = arith.constant 0 : i32
    %c0_i32_2 = arith.constant 0 : i32
    return %c0_i32, %c0_i32_0, %c0_i32_1 : i32, i32, i32
  }
  func.func @transform_8(%arg0: i32) -> (i32, i32, i32) {
    %c0_i32 = arith.constant 0 : i32
    %c0_i32_0 = arith.constant 0 : i32
    %c0_i32_1 = arith.constant 0 : i32
    %c0_i32_2 = arith.constant 0 : i32
    return %c0_i32, %c0_i32_0, %c0_i32_1 : i32, i32, i32
  }
  func.func @transform_9(%arg0: i32) -> (i32, i32) {
    %c0_i32 = arith.constant 0 : i32
    %c0_i32_0 = arith.constant 0 : i32
    %c0_i32_1 = arith.constant 0 : i32
    return %c0_i32, %c0_i32_0 : i32, i32
  }
  func.func @transform_10(%arg0: i32) -> (i32, i32, i32) {
    %c0_i32 = arith.constant 0 : i32
    %c0_i32_0 = arith.constant 0 : i32
    %c0_i32_1 = arith.constant 0 : i32
    %c0_i32_2 = arith.constant 0 : i32
    return %c0_i32, %c0_i32_0, %c0_i32_1 : i32, i32, i32
  }
  func.func @transform_11(%arg0: i32) -> (i32, i32, i32) {
    %c0_i32 = arith.constant 0 : i32
    %c0_i32_0 = arith.constant 0 : i32
    %c0_i32_1 = arith.constant 0 : i32
    %c0_i32_2 = arith.constant 0 : i32
    return %c0_i32, %c0_i32_0, %c0_i32_1 : i32, i32, i32
  }
  func.func @transform_12(%arg0: i32) -> (i32, i32) {
    %c0_i32 = arith.constant 0 : i32
    %c0_i32_0 = arith.constant 0 : i32
    %c0_i32_1 = arith.constant 0 : i32
    return %c0_i32, %c0_i32_0 : i32, i32
  }
  func.func @transform_13(%arg0: i32) -> (i32, i32, i32) {
    %c0_i32 = arith.constant 0 : i32
    %c0_i32_0 = arith.constant 0 : i32
    %c0_i32_1 = arith.constant 0 : i32
    %c0_i32_2 = arith.constant 0 : i32
    return %c0_i32, %c0_i32_0, %c0_i32_1 : i32, i32, i32
  }
  func.func @transform_14(%arg0: i32) -> (i32, i32, i32) {
    %c0_i32 = arith.constant 0 : i32
    %c0_i32_0 = arith.constant 0 : i32
    %c0_i32_1 = arith.constant 0 : i32
    %c0_i32_2 = arith.constant 0 : i32
    return %c0_i32, %c0_i32_0, %c0_i32_1 : i32, i32, i32
  }
  func.func @transform_15(%arg0: i32) -> (i32, i32) {
    %c0_i32 = arith.constant 0 : i32
    %c0_i32_0 = arith.constant 0 : i32
    %c0_i32_1 = arith.constant 0 : i32
    return %c0_i32, %c0_i32_0 : i32, i32
  }
  func.func @transform_16(%arg0: i32) -> (i32, i32, i32) {
    %c0_i32 = arith.constant 0 : i32
    %c0_i32_0 = arith.constant 0 : i32
    %c0_i32_1 = arith.constant 0 : i32
    %c0_i32_2 = arith.constant 0 : i32
    return %c0_i32, %c0_i32_0, %c0_i32_1 : i32, i32, i32
  }
  func.func @transform_17(%arg0: i32) -> (i32, i32, i32) {
    %c0_i32 = arith.constant 0 : i32
    %c0_i32_0 = arith.constant 0 : i32
    %c0_i32_1 = arith.constant 0 : i32
    %c0_i32_2 = arith.constant 0 : i32
    return %c0_i32, %c0_i32_0, %c0_i32_1 : i32, i32, i32
  }
  func.func @transform_18(%arg0: i32) -> (i32, i32) {
    %c0_i32 = arith.constant 0 : i32
    %c0_i32_0 = arith.constant 0 : i32
    %c0_i32_1 = arith.constant 0 : i32
    return %c0_i32, %c0_i32_0 : i32, i32
  }
  func.func @transform_19(%arg0: i32) -> (i32, i32, i32) {
    %c0_i32 = arith.constant 0 : i32
    %c0_i32_0 = arith.constant 0 : i32
    %c0_i32_1 = arith.constant 0 : i32
    %c0_i32_2 = arith.constant 0 : i32
    return %c0_i32, %c0_i32_0, %c0_i32_1 : i32, i32, i32
  }
  func.func @transform_20(%arg0: i32) -> (i32, i32, i32) {
    %c0_i32 = arith.constant 0 : i32
    %c0_i32_0 = arith.constant 0 : i32
    %c0_i32_1 = arith.constant 0 : i32
    %c0_i32_2 = arith.constant 0 : i32
    return %c0_i32, %c0_i32_0, %c0_i32_1 : i32, i32, i32
  }
  func.func @transform_21(%arg0: i32) -> (i32, i32) {
    %c0_i32 = arith.constant 0 : i32
    %c0_i32_0 = arith.constant 0 : i32
    %c0_i32_1 = arith.constant 0 : i32
    return %c0_i32, %c0_i32_0 : i32, i32
  }
  func.func @transform_22(%arg0: i32) -> (i32, i32, i32) {
    %c0_i32 = arith.constant 0 : i32
    %c0_i32_0 = arith.constant 0 : i32
    %c0_i32_1 = arith.constant 0 : i32
    %c0_i32_2 = arith.constant 0 : i32
    return %c0_i32, %c0_i32_0, %c0_i32_1 : i32, i32, i32
  }
  func.func @transform_23(%arg0: i32) -> (i32, i32, i32) {
    %c0_i32 = arith.constant 0 : i32
    %c0_i32_0 = arith.constant 0 : i32
    %c0_i32_1 = arith.constant 0 : i32
    %c0_i32_2 = arith.constant 0 : i32
    return %c0_i32, %c0_i32_0, %c0_i32_1 : i32, i32, i32
  }
  func.func @transform_24(%arg0: i32) -> (i32, i32) {
    %c0_i32 = arith.constant 0 : i32
    %c0_i32_0 = arith.constant 0 : i32
    %c0_i32_1 = arith.constant 0 : i32
    return %c0_i32, %c0_i32_0 : i32, i32
  }
  func.func @transform_25(%arg0: i32) -> (i32, i32, i32) {
    %c0_i32 = arith.constant 0 : i32
    %c0_i32_0 = arith.constant 0 : i32
    %c0_i32_1 = arith.constant 0 : i32
    %c0_i32_2 = arith.constant 0 : i32
    return %c0_i32, %c0_i32_0, %c0_i32_1 : i32, i32, i32
  }
  func.func @transform_26(%arg0: i32) -> (i32, i32, i32) {
    %c0_i32 = arith.constant 0 : i32
    %c0_i32_0 = arith.constant 0 : i32
    %c0_i32_1 = arith.constant 0 : i32
    %c0_i32_2 = arith.constant 0 : i32
    return %c0_i32, %c0_i32_0, %c0_i32_1 : i32, i32, i32
  }
  func.func @transform_27(%arg0: i32) -> (i32, i32) {
    %c0_i32 = arith.constant 0 : i32
    %c0_i32_0 = arith.constant 0 : i32
    %c0_i32_1 = arith.constant 0 : i32
    return %c0_i32, %c0_i32_0 : i32, i32
  }
  func.func @transform_28(%arg0: i32) -> (i32, i32) {
    %c0_i32 = arith.constant 0 : i32
    %c0_i32_0 = arith.constant 0 : i32
    %c0_i32_1 = arith.constant 0 : i32
    return %c0_i32, %c0_i32_0 : i32, i32
  }
  func.func @transform_29(%arg0: i32) -> (i32, i32) {
    %c0_i32 = arith.constant 0 : i32
    %c0_i32_0 = arith.constant 0 : i32
    %c0_i32_1 = arith.constant 0 : i32
    return %c0_i32, %c0_i32_0 : i32, i32
  }
  func.func @transform_30(%arg0: i32) -> (i32, i32) {
    %c0_i32 = arith.constant 0 : i32
    %c0_i32_0 = arith.constant 0 : i32
    %c0_i32_1 = arith.constant 0 : i32
    return %c0_i32, %c0_i32_0 : i32, i32
  }
  func.func @transform_31(%arg0: i32) -> (i32, i32) {
    %c0_i32 = arith.constant 0 : i32
    %c0_i32_0 = arith.constant 0 : i32
    %c0_i32_1 = arith.constant 0 : i32
    return %c0_i32, %c0_i32_0 : i32, i32
  }
}

</mosaic_0001>

<bundles_post_ra>
// kernel: _lambda_.1
= control target key start
LH: loop header
LB: loop body
LE: loop exit
PB: predicated region body
PF: predicated region fallthrough
CT: control target
= control target key end

     0   :  { %s9487_s6 = smov 1   ;;  %s9488_s10 = smov 2   ;;  %s10194_s0 = inlined_call_operand.smem [shape: u32[32], index: -1, kind: input, shape index: {}] }
   0x1   :  { %s9547_s5 = sld [smem:[%s10194_s0]]   ;;  %s9489_s14 = smov 3  }
   0x2   :  { %s9552_s9 = sld [smem:[%s10194_s0 + %s9487_s6]]   ;;  %s9490_s18 = smov 4  }
   0x3   :  { %s9557_s13 = sld [smem:[%s10194_s0 + %s9488_s10]]   ;;  %s9491_s22 = smov 5  }
   0x4   :  { %s9562_s17 = sld [smem:[%s10194_s0 + %s9489_s14]]   ;;  %s9492_s26 = smov 6  }
   0x5   :  { %s9567_s21 = sld [smem:[%s10194_s0 + %s9490_s18]]   ;;  %s9493_s30 = smov 7  }
   0x6   :  { %s9572_s25 = sld [smem:[%s10194_s0 + %s9491_s22]]   ;;  %s9494_s4 = smov 8  }
   0x7   :  { %s9577_s29 = sld [smem:[%s10194_s0 + %s9492_s26]]   ;;  %s9495_s10 = smov 9  }
   0x8   :  { %10200 = sst [smem:[#allocation35_spill]] %s9552_s9  ;;  %s9496_s15 = smov 10  }
   0x9   :  { %10201 = sst [smem:[#allocation36_spill]] %s9557_s13  ;;  %s9497_s20 = smov 11  }
   0xa   :  { %10202 = sst [smem:[#allocation37_spill]] %s9562_s17  ;;  %s9498_s26 = smov 12  }
   0xb   :  { %10203 = sst [smem:[#allocation38_spill]] %s9567_s21  ;;  %s9499_s1 = smov 13  }
   0xc   :  { %s9582_s3 = sld [smem:[%s10194_s0 + %s9493_s30]]   ;;  %s9500_s7 = smov 14  }
   0xd   :  { %10204 = sst [smem:[#allocation39_spill]] %s9577_s29  ;;  %s9502_s22 = smov 16  }
   0xe   :  { %s9587_s8 = sld [smem:[%s10194_s0 + %s9494_s4]]   ;;  %s9503_s28 = smov 17  }
   0xf   :  { %s9592_s14 = sld [smem:[%s10194_s0 + %s9495_s10]]  }
  0x10   :  { %s9597_s19 = sld [smem:[%s10194_s0 + %s9496_s15]]   ;;  %s9501_s15 = smov 15  }
  0x11   :  { %s9602_s24 = sld [smem:[%s10194_s0 + %s9497_s20]]  }
  0x12   :  { %10205 = sst [smem:[#allocation40_spill]] %s9582_s3 }
  0x13   :  { %s9607_s30 = sld [smem:[%s10194_s0 + %s9498_s26]]  }
  0x14   :  { %s9612_s6 = sld [smem:[%s10194_s0 + %s9499_s1]]  }
  0x15   :  { %10206 = sst [smem:[#allocation41_spill]] %s9592_s14 }
  0x16   :  { %s9617_s12 = sld [smem:[%s10194_s0 + %s9500_s7]]   ;;  %s9504_s7 = smov 18  }
  0x17   :  { %s9622_s20 = sld [smem:[%s10194_s0 + %s9501_s15]]   ;;  %s9505_s15 = smov 19  }
  0x18   :  { %s9627_s27 = sld [smem:[%s10194_s0 + %s9502_s22]]   ;;  %s9506_s22 = smov 20  }
  0x19   :  { %10207 = sst [smem:[#allocation42_spill]] %s9607_s30 }
  0x1a   :  { %s9632_s4 = sld [smem:[%s10194_s0 + %s9503_s28]]   ;;  %s9507_s28 = smov 21  }
  0x1b   :  { %s9637_s30 = sld [smem:[%s10194_s0 + %s9504_s7]]   ;;  %s9508_s7 = smov 22  }
  0x1c   :  { %10208 = sst [smem:[#allocation43_spill]] %s9617_s12 }
  0x1d   :  { %10209 = sst [smem:[#allocation44_spill]] %s9622_s20 }
  0x1e   :  { %s9642_s20 = sld [smem:[%s10194_s0 + %s9505_s15]]   ;;  %s9509_s15 = smov 23  }
  0x1f   :  { %s9647_s12 = sld [smem:[%s10194_s0 + %s9506_s22]]   ;;  %s9510_s22 = smov 24  }
  0x20   :  { %s9652_s14 = sld [smem:[%s10194_s0 + %s9507_s28]]   ;;  %s9511_s28 = smov 25  }
  0x21   :  { %10210 = sst [smem:[#allocation45_spill]] %s9637_s30 }
  0x22   :  { %s9657_s30 = sld [smem:[%s10194_s0 + %s9508_s7]]   ;;  %s9512_s7 = smov 26  }
  0x23   :  { %s9662_s3 = sld [smem:[%s10194_s0 + %s9509_s15]]   ;;  %s9513_s15 = smov 27  }
  0x24   :  { %s9667_s29 = sld [smem:[%s10194_s0 + %s9510_s22]]   ;;  %s9514_s22 = smov 28  }
  0x25   :  { %s9677_s21 = sld [smem:[%s10194_s0 + %s9512_s7]]   ;;  %s9516_s7 = smov 30  }
  0x26   :  { %10211 = sst [smem:[#allocation46_spill]] %s9652_s14 }
  0x27   :  { %s9672_s14 = sld [smem:[%s10194_s0 + %s9511_s28]]   ;;  %s9515_s28 = smov 29  }
  0x28   :  { %s9682_s17 = sld [smem:[%s10194_s0 + %s9513_s15]]   ;;  %s9517_s15 = smov 31  }
  0x29   :  { %s9692_s13 = sld [smem:[%s10194_s0 + %s9515_s28]]  }
  0x2a   :  { %10212 = sst [smem:[#allocation47_spill]] %s9667_s29 }
  0x2b   :  { %s9687_s29 = sld [smem:[%s10194_s0 + %s9514_s22]]  }
  0x2c   :  { %s9697_s9 = sld [smem:[%s10194_s0 + %s9516_s7]]  }
  0x2e   :  { %10213 = sst [smem:[#allocation48_spill]] %s9682_s17 }
  0x2f   :  { %s9702_s17 = sld [smem:[%s10194_s0 + %s9517_s15]]  }
  0x30   :  { %68 = vsyncpa [#allocation3], 0 }
  0x31   :  { %69 = vsyncpa [#allocation6], 0 }
  0x32   :  { %70 = vsyncpa [#allocation9], 0 }
  0x33   :  { %71 = vsyncpa [#allocation12], 0 }
  0x34   :  { %72 = vsyncpa [#allocation15], 0 }
  0x35   :  { %73 = vsyncpa [#allocation18], 0 }
  0x36   :  { %74 = vsyncpa [#allocation21], 0 }
  0x37   :  { %75 = vsyncpa [#allocation24], 0 }
  0x38   :  { %76 = vsyncpa [#allocation4], 0  ;;  %s9518_s22 = smov [#allocation5]   ;;  %s9519_s26 = smov [#allocation8]  }
  0x39   :  { %s108_s23 = sshll.u32 %s9518_s22, 4  ;;  %s134_s28 = sshll.u32 %s9519_s26, 4  ;;  %s109_s23 = int_to_ptr.vmem [resolvable:$true] %s108_s23  ;;  %s135_s28 = int_to_ptr.vmem [resolvable:$true] %s134_s28 }
  0x3a   :  { %s9177_s1 = scalar_lea.vmem %s109_s23, 12288  ;;  %p9182_p1 = scmp.lt.s32.totalorder %s109_s23, %s109_s23 }
  0x3b   :  { %p9178_p0 = scmp.ne.s32.totalorder %s109_s23, %s9177_s1  ;;  %p9183_p2 = scmp.lt.s32.totalorder %s9177_s1, %s9177_s1 }
  0x3d   :  { %p9184_p3 = por %p9183_p2, %p9182_p1 }
  0x3f   :  { %p9185_p4 = pnand %p9184_p3, %p9178_p0 }
  0x41   :  { %9188 = shalt.err (!%p9185_p4)
}
  0x42   :  { %s9520_s0 = smov 128   ;;  %s9521_s2 = smov 8  }
  0x43   :  { %114 = dma.hbm_to_vmem [thread:$0]  %s9587_s8, 12288, %s109_s23, [#allocation6], %s9520_s0, %s9520_s0, %s9521_s2  }
  0x44   :  { %s9197_s7 = scalar_lea.vmem %s135_s28, 12288  ;;  %p9202_p6 = scmp.lt.s32.totalorder %s135_s28, %s135_s28 }
  0x45   :  { %p9198_p5 = scmp.ne.s32.totalorder %s135_s28, %s9197_s7  ;;  %p9203_p7 = scmp.lt.s32.totalorder %s9197_s7, %s9197_s7 }
  0x47   :  { %p9204_p8 = por %p9203_p7, %p9202_p6 }
  0x49   :  { %p9205_p9 = pnand %p9204_p8, %p9198_p5 }
  0x4b   :  { %9208 = shalt.err (!%p9205_p9)
}
  0x4c   :  { %140 = dma.hbm_to_vmem [thread:$0]  %s9602_s24, 12288, %s135_s28, [#allocation9], %s9520_s0, %s9520_s0, %s9521_s2  }
  0x4d   :  { %s9522_s10 = smov [#allocation11]   ;;  %s9523_s15 = smov [#allocation14]  }
  0x4e   :  { %s164_s11 = sshll.u32 %s9522_s10, 4  ;;  %s190_s16 = sshll.u32 %s9523_s15, 4  ;;  %s165_s11 = int_to_ptr.vmem [resolvable:$true] %s164_s11  ;;  %s191_s16 = int_to_ptr.vmem [resolvable:$true] %s190_s16 }
  0x4f   :  { %s9217_s18 = scalar_lea.vmem %s165_s11, 384  ;;  %p9222_p11 = scmp.lt.s32.totalorder %s165_s11, %s165_s11 }
  0x50   :  { %p9218_p10 = scmp.ne.s32.totalorder %s165_s11, %s9217_s18  ;;  %p9223_p12 = scmp.lt.s32.totalorder %s9217_s18, %s9217_s18 }
  0x52   :  { %p9224_p13 = por %p9223_p12, %p9222_p11 }
  0x54   :  { %p9225_p0 = pnand %p9224_p13, %p9218_p10 }
  0x56   :  { %9228 = shalt.err (!%p9225_p0)
}
  0x57   :  { %s9524_s8 = smov 64   ;;  %s9525_s22 = smov 4  }
  0x58   :  { %170 = dma.hbm_to_vmem [thread:$0]  %s9627_s27, 384, %s165_s11, [#allocation12], %s9524_s8, %s9524_s8, %s9525_s22  }
  0x59   :  { %s9237_s24 = scalar_lea.vmem %s191_s16, 192  ;;  %p9242_p2 = scmp.lt.s32.totalorder %s191_s16, %s191_s16 }
  0x5a   :  { %p9238_p1 = scmp.ne.s32.totalorder %s191_s16, %s9237_s24  ;;  %p9243_p3 = scmp.lt.s32.totalorder %s9237_s24, %s9237_s24 }
  0x5c   :  { %p9244_p4 = por %p9243_p3, %p9242_p2 }
  0x5e   :  { %p9245_p5 = pnand %p9244_p4, %p9238_p1 }
  0x60   :  { %9248 = shalt.err (!%p9245_p5)
}
  0x61   :  { %196 = dma.hbm_to_vmem [thread:$0]  %s9642_s20, 192, %s191_s16, [#allocation15], %s9524_s8, %s9524_s8, %s9525_s22  }
  0x62   :  { %s9526_s23 = smov [#allocation17]   ;;  %s9527_s28 = smov [#allocation20]  }
  0x63   :  { %s217_s26 = sshll.u32 %s9526_s23, 4  ;;  %s240_s1 = sshll.u32 %s9527_s28, 4  ;;  %s218_s26 = int_to_ptr.vmem [resolvable:$true] %s217_s26  ;;  %s241_s1 = int_to_ptr.vmem [resolvable:$true] %s240_s1 }
  0x64   :  { %s9257_s7 = scalar_lea.vmem %s218_s26, 64  ;;  %p9262_p7 = scmp.lt.s32.totalorder %s218_s26, %s218_s26 }
  0x65   :  { %p9258_p6 = scmp.ne.s32.totalorder %s218_s26, %s9257_s7  ;;  %p9263_p8 = scmp.lt.s32.totalorder %s9257_s7, %s9257_s7 }
  0x67   :  { %p9264_p9 = por %p9263_p8, %p9262_p7 }
  0x69   :  { %p9265_p10 = pnand %p9264_p9, %p9258_p6 }
  0x6b   :  { %9268 = shalt.err (!%p9265_p10)
}
  0x6c   :  { %220 = dma.hbm_to_vmem [thread:$0]  %s9657_s30, 64, %s218_s26, [#allocation18]  }
  0x6d   :  { %s9277_s27 = scalar_lea.vmem %s241_s1, 192  ;;  %p9282_p12 = scmp.lt.s32.totalorder %s241_s1, %s241_s1 }
  0x6e   :  { %p9278_p11 = scmp.ne.s32.totalorder %s241_s1, %s9277_s27  ;;  %p9283_p13 = scmp.lt.s32.totalorder %s9277_s27, %s9277_s27 }
  0x70   :  { %p9284_p0 = por %p9283_p13, %p9282_p12 }
  0x72   :  { %p9285_p1 = pnand %p9284_p0, %p9278_p11 }
  0x74   :  { %9288 = shalt.err (!%p9285_p1)
}
  0x75   :  { %246 = dma.hbm_to_vmem [thread:$0]  %s9672_s14, 192, %s241_s1, [#allocation21], %s9524_s8, %s9524_s8, %s9525_s22  }
  0x76   :  { %s9528_s20 = smov [#allocation2]   ;;  %s9529_s11 = smov [#allocation7]  }
  0x77   :  { %s92_s10 = sshll.u32 %s9528_s20, 4  ;;  %s122_s15 = sshll.u32 %s9529_s11, 4  ;;  %s93_s10 = int_to_ptr.vmem [resolvable:$true] %s92_s10  ;;  %s123_s15 = int_to_ptr.vmem [resolvable:$true] %s122_s15 }
  0x78   :  { %s9297_s16 = scalar_lea.vmem %s93_s10, 12288  ;;  %p9302_p3 = scmp.lt.s32.totalorder %s93_s10, %s93_s10 }
  0x79   :  { %p9298_p2 = scmp.ne.s32.totalorder %s93_s10, %s9297_s16  ;;  %p9303_p4 = scmp.lt.s32.totalorder %s9297_s16, %s9297_s16 }
  0x7b   :  { %p9304_p5 = por %p9303_p4, %p9302_p3 }
  0x7d   :  { %p9305_p6 = pnand %p9304_p5, %p9298_p2 }
  0x7f   :  { %9308 = shalt.err (!%p9305_p6)
}
  0x80   :  { %98 = dma.hbm_to_vmem [thread:$0]  %s9572_s25, 12288, %s93_s10, [#allocation3], %s9520_s0, %s9520_s0, %s9521_s2  }
  0x81   :  { %s9317_s30 = scalar_lea.vmem %s123_s15, 384  ;;  %p9322_p8 = scmp.lt.s32.totalorder %s123_s15, %s123_s15 }
  0x82   :  { %p9318_p7 = scmp.ne.s32.totalorder %s123_s15, %s9317_s30  ;;  %p9323_p9 = scmp.lt.s32.totalorder %s9317_s30, %s9317_s30 }
  0x84   :  { %p9324_p10 = por %p9323_p9, %p9322_p8 }
  0x86   :  { %p9325_p11 = pnand %p9324_p10, %p9318_p7 }
  0x88   :  { %9328 = shalt.err (!%p9325_p11)
}
  0x89   :  { %128 = dma.hbm_to_vmem [thread:$0]  %s9597_s19, 384, %s123_s15, [#allocation6], %s9524_s8, %s9524_s8, %s9525_s22  }
  0x8a   :  { %s9530_s14 = smov [#allocation10]   ;;  %s9531_s24 = smov [#allocation13]  }
  0x8b   :  { %s148_s18 = sshll.u32 %s9530_s14, 4  ;;  %s176_s23 = sshll.u32 %s9531_s24, 4  ;;  %s149_s18 = int_to_ptr.vmem [resolvable:$true] %s148_s18  ;;  %s177_s23 = int_to_ptr.vmem [resolvable:$true] %s176_s23 }
  0x8c   :  { %s9337_s26 = scalar_lea.vmem %s149_s18, 128  ;;  %p9342_p13 = scmp.lt.s32.totalorder %s149_s18, %s149_s18 }
  0x8d   :  { %p9338_p12 = scmp.ne.s32.totalorder %s149_s18, %s9337_s26  ;;  %p9343_p0 = scmp.lt.s32.totalorder %s9337_s26, %s9337_s26 }
  0x8f   :  { %p9344_p1 = por %p9343_p0, %p9342_p13 }
  0x91   :  { %p9345_p2 = pnand %p9344_p1, %p9338_p12 }
  0x93   :  { %9348 = shalt.err (!%p9345_p2)
}
  0x94   :  { %154 = dma.hbm_to_vmem [thread:$0]  %s9612_s6, 128, %s149_s18, [#allocation9], %s9524_s8, %s9524_s8, %s9525_s22  }
  0x95   :  { %s9357_s25 = scalar_lea.vmem %s177_s23, 12288  ;;  %p9362_p4 = scmp.lt.s32.totalorder %s177_s23, %s177_s23 }
  0x96   :  { %p9358_p3 = scmp.ne.s32.totalorder %s177_s23, %s9357_s25  ;;  %p9363_p5 = scmp.lt.s32.totalorder %s9357_s25, %s9357_s25 }
  0x98   :  { %p9364_p6 = por %p9363_p5, %p9362_p4 }
  0x9a   :  { %p9365_p7 = pnand %p9364_p6, %p9358_p3 }
  0x9c   :  { %9368 = shalt.err (!%p9365_p7)
}
  0x9d   :  { %182 = dma.hbm_to_vmem [thread:$0]  %s9632_s4, 12288, %s177_s23, [#allocation12], %s9520_s0, %s9520_s0, %s9521_s2  }
  0x9e   :  { %s9532_s19 = smov [#allocation16]   ;;  %s9533_s1 = smov [#allocation19]  }
  0x9f   :  { %s202_s28 = sshll.u32 %s9532_s19, 4  ;;  %s226_s7 = sshll.u32 %s9533_s1, 4  ;;  %s203_s28 = int_to_ptr.vmem [resolvable:$true] %s202_s28  ;;  %s227_s7 = int_to_ptr.vmem [resolvable:$true] %s226_s7 }
  0xa0   :  { %s9377_s27 = scalar_lea.vmem %s203_s28, 12288  ;;  %p9382_p9 = scmp.lt.s32.totalorder %s203_s28, %s203_s28 }
  0xa1   :  { %p9378_p8 = scmp.ne.s32.totalorder %s203_s28, %s9377_s27  ;;  %p9383_p10 = scmp.lt.s32.totalorder %s9377_s27, %s9377_s27 }
  0xa3   :  { %p9384_p11 = por %p9383_p10, %p9382_p9 }
  0xa5   :  { %p9385_p12 = pnand %p9384_p11, %p9378_p8 }
  0xa7   :  { %9388 = shalt.err (!%p9385_p12)
}
  0xa8   :  { %208 = dma.hbm_to_vmem [thread:$0]  %s9647_s12, 12288, %s203_s28, [#allocation15], %s9520_s0, %s9520_s0, %s9521_s2  }
  0xa9   :  { %s9397_s6 = scalar_lea.vmem %s227_s7, 4096  ;;  %p9402_p0 = scmp.lt.s32.totalorder %s227_s7, %s227_s7 }
  0xaa   :  { %p9398_p13 = scmp.ne.s32.totalorder %s227_s7, %s9397_s6  ;;  %p9403_p1 = scmp.lt.s32.totalorder %s9397_s6, %s9397_s6 }
  0xac   :  { %p9404_p2 = por %p9403_p1, %p9402_p0 }
  0xae   :  { %p9405_p3 = pnand %p9404_p2, %p9398_p13 }
  0xb0   :  { %9408 = shalt.err (!%p9405_p3)
}
  0xb1   :  { %232 = dma.hbm_to_vmem [thread:$0]  %s9662_s3, 4096, %s227_s7, [#allocation18], %s9520_s0, %s9520_s0, %s9521_s2  }
  0xb2   :  { %s9534_s4 = smov [#allocation22]   ;;  %s9535_s22 = smov [#allocation23]  }
  0xb3   :  { %s252_s8 = sshll.u32 %s9534_s4, 4  ;;  %s268_s20 = sshll.u32 %s9535_s22, 4  ;;  %s253_s8 = int_to_ptr.vmem [resolvable:$true] %s252_s8  ;;  %s269_s20 = int_to_ptr.vmem [resolvable:$true] %s268_s20 }
  0xb4   :  { %s9417_s10 = scalar_lea.vmem %s253_s8, 12288  ;;  %p9422_p5 = scmp.lt.s32.totalorder %s253_s8, %s253_s8 }
  0xb5   :  { %p9418_p4 = scmp.ne.s32.totalorder %s253_s8, %s9417_s10  ;;  %p9423_p6 = scmp.lt.s32.totalorder %s9417_s10, %s9417_s10 }
  0xb7   :  { %p9424_p7 = por %p9423_p6, %p9422_p5 }
  0xb9   :  { %p9425_p8 = pnand %p9424_p7, %p9418_p4 }
  0xbb   :  { %9428 = shalt.err (!%p9425_p8)
}
  0xbc   :  { %258 = dma.hbm_to_vmem [thread:$0]  %s9677_s21, 12288, %s253_s8, [#allocation21], %s9520_s0, %s9520_s0, %s9521_s2  }
  0xbd   :  { %s9437_s12 = scalar_lea.vmem %s269_s20, 4096  ;;  %p9442_p10 = scmp.lt.s32.totalorder %s269_s20, %s269_s20 }
  0xbe   :  { %p9438_p9 = scmp.ne.s32.totalorder %s269_s20, %s9437_s12  ;;  %p9443_p11 = scmp.lt.s32.totalorder %s9437_s12, %s9437_s12 }
  0xc0   :  { %p9444_p12 = por %p9443_p11, %p9442_p10 }
  0xc2   :  { %p9445_p13 = pnand %p9444_p12, %p9438_p9 }
  0xc4   :  { %9448 = shalt.err (!%p9445_p13)
}
  0xc5   :  { %274 = dma.hbm_to_vmem [thread:$0]  %s9692_s13, 4096, %s269_s20, [#allocation24], %s9520_s0, %s9520_s0, %s9521_s2  }
  0xc6   :  { %9469 = dma.done.wait [#allocation3], 12288  }
  0xc7   :  { %9470 = vsyncadd [#allocation3], 4294955008 }
  0xc8   :  { %9471 = dma.done.wait [#allocation6], 12672  }
  0xc9   :  { %9472 = vsyncadd [#allocation6], 4294954624 }
  0xca   :  { %9473 = dma.done.wait [#allocation9], 12416  }
  0xcb   :  { %9474 = vsyncadd [#allocation9], 4294954880 }
  0xcc   :  { %9475 = dma.done.wait [#allocation12], 12672  }
  0xcd   :  { %9476 = vsyncadd [#allocation12], 4294954624 }
  0xce   :  { %9477 = dma.done.wait [#allocation15], 12480  }
  0xcf   :  { %9478 = vsyncadd [#allocation15], 4294954816 }
  0xd0   :  { %9479 = dma.done.wait [#allocation18], 4160  }
  0xd1   :  { %9480 = vsyncadd [#allocation18], 4294963136 }
  0xd2   :  { %9481 = dma.done.wait [#allocation21], 12480  }
  0xd3   :  { %9482 = vsyncadd [#allocation21], 4294954816 }
  0xd4   :  { %9483 = dma.done.wait [#allocation24], 4096  }
  0xd5   :  { %9484 = vsyncadd [#allocation24], 4294963200  ;;  %s10214_s13 = sld [smem:[#allocation35_spill]]  ;;  %v322_v0 = vld [vmem:[%s9547_s5 + $0x10] sm:$0xff]  ;;  %v323_v1 = vld [vmem:[%s9547_s5 + $0x18] sm:$0xff]  ;;  %vm340_vm0 = vcmask 261120  }
  0xd6   :  { %s10215_s21 = sld [smem:[#allocation36_spill]]  ;;  %v320_v2 = vld [vmem:[%s9547_s5] sm:$0xff]  ;;  %v9760_v3 = vpack.c.bf16 %v323_v1, %v322_v0  ;;  %v321_v4 = vld [vmem:[%s9547_s5 + $0x8] sm:$0xff]  ;;  %v9536_v19 = vmov 0   ;;  %vm513_vm1 = vcmask 392192   ;;  %vm4107_vm2 = vcmask 130048  }
  0xd7   :  { %v9763_v5 = vpack.c.bf16 %v321_v4, %v320_v2  ;;  %552 = vmatprep.mubr.bf16.mxu0 %v9536_v19  ;;  %s10216_s5 = sld [smem:[#allocation37_spill]]  ;;  %v840_v2 = vlaneseq  ;;  %vm6166_vm3 = vcmask 1043456   ;;  %vm6162_vm4 = vcmask 64512  }
  0xd8   :  { %8081 = vmatprep.subr.bf16.mxu1 %v9760_v3  ;;  %s10217_s3 = sld [smem:[#allocation38_spill]]  ;;  %vm7217_vm5 = vcmask 74752  }
  0xd9   :  { %8082 = vmatpush3.bf16.msra.mxu1 %v9760_v3  ;;  %s10218_s0 = sld [smem:[#allocation39_spill]] }
  0xda   :  { %8083 = vmatprep.subr.bf16.mxu1 %v9763_v5  ;;  %s10219_s2 = sld [smem:[#allocation40_spill]] }
  0xdb   :  { %v8157_v6 = vld [vmem:[%s10214_s13] sm:$0xff]   ;;  %v8158_v7 = vld [vmem:[%s10214_s13 + $0x8] sm:$0xff]   ;;  %v8159_v8 = vld [vmem:[%s10214_s13 + $0x10] sm:$0xff]   ;;  %s10220_s11 = sld [smem:[#allocation41_spill]] }
  0xdc   :  { %8085 = vmatprep.mubr.msk.bf16.mxu1 %vm340_vm0, %v8157_v6  ;;  %v8163_v9 = vld [vmem:[%s10215_s21 + $0x24] ss:$8 sps:$4 sm:$0xff]   ;;  %v8160_v10 = vld [vmem:[%s10214_s13 + $0x18] sm:$0xff]   ;;  %v8161_v11 = vld [vmem:[%s10215_s21 + $0x20] ss:$8 sps:$4 sm:$0xff]   ;;  %s10221_s15 = sld [smem:[#allocation43_spill]] }
  0xdd   :  { %8084 = vmatpush3.bf16.msra.mxu1 %v9763_v5  ;;  %v8166_v12 = vld [vmem:[%s10215_s21 + $0x14] ss:$8 sps:$4 sm:$0xff]   ;;  %v8164_v13 = vld [vmem:[%s10215_s21 + $0x10] ss:$8 sps:$4 sm:$0xff]   ;;  %v8171_v15 = vld [vmem:[%s10215_s21 + $0x4] ss:$8 sps:$4 sm:$0xff]  }
  0xde   :  { %8089 = vmatprep.subr.bf16.mxu1 %v9760_v3  ;;  %v8167_v14 = vld [vmem:[%s10215_s21 + $0x54] ss:$8 sps:$4 sm:$0xff]   ;;  %v8169_v16 = vld [vmem:[%s10215_s21] ss:$8 sps:$4 sm:$0xff]   ;;  %v8172_v17 = vld [vmem:[%s10215_s21 + $0x50] ss:$8 sps:$4 sm:$0xff]  }
  0xdf   :  { %530 = vmatprep.subr.bf16.mxu0 %v8167_v14  ;;  %v8173_v18 = vld [vmem:[%s10215_s21 + $0x44] ss:$8 sps:$4 sm:$0xff]   ;;  %v8175_v20 = vld [vmem:[%s10215_s21 + $0x40] ss:$8 sps:$4 sm:$0xff]   ;;  %v8176_v21 = vld [vmem:[%s10215_s21 + $0x34] ss:$8 sps:$4 sm:$0xff]  }
  0xe0   :  { %8086 = vmatmul.mubr.msk.bf16.vlgmr.msra.gmra.mxu1 %vm340_vm0, %v8158_v7  ;;  %531 = vmatpush1.bf16.msra.mxu0 %v8172_v17  ;;  %v8178_v22 = vld [vmem:[%s10215_s21 + $0x30] ss:$8 sps:$4 sm:$0xff]   ;;  %v8179_v34 = vld [vmem:[%s10214_s13 + $0x20] sm:$0xff]   ;;  %v8180_v36 = vld [vmem:[%s10214_s13 + $0x28] sm:$0xff]   ;;  %s10222_s16 = sld [smem:[#allocation42_spill]] }
  0xe1   :  { %8090 = vmatpush3.bf16.msra.mxu1 %v9760_v3  ;;  %8093 = vmatprep.mubr.msk.bf16.mxu1 %vm340_vm0, %v8159_v8  ;;  %v8183_v37 = vld [vmem:[%s10215_s21 + $0x84] ss:$8 sps:$4 sm:$0xff]   ;;  %v8181_v38 = vld [vmem:[%s10215_s21 + $0x80] ss:$8 sps:$4 sm:$0xff]   ;;  %v8186_v39 = vld [vmem:[%s10215_s21 + $0x74] ss:$8 sps:$4 sm:$0xff]  }
  0xe2   :  { %8091 = vmatprep.subr.bf16.mxu1 %v9763_v5  ;;  %532 = vmatprep.subr.bf16.mxu0 %v8173_v18  ;;  %v8184_v40 = vld [vmem:[%s10215_s21 + $0x70] ss:$8 sps:$4 sm:$0xff]   ;;  %v8189_v41 = vld [vmem:[%s10215_s21 + $0x64] ss:$8 sps:$4 sm:$0xff]   ;;  %v8187_v42 = vld [vmem:[%s10215_s21 + $0x60] ss:$8 sps:$4 sm:$0xff]  }
  0xe3   :  { %s10223_s30 = sld [smem:[#allocation45_spill]] }
  0xe4   :  { %533 = vmatpush1.bf16.msra.mxu0 %v8175_v20  ;;  %s10224_s14 = sld [smem:[#allocation44_spill]] }
  0xe5   :  { %8092 = vmatpush3.bf16.msra.mxu1 %v9763_v5  ;;  %534 = vmatprep.subr.bf16.mxu0 %v8176_v21  ;;  %s10225_s18 = sld [smem:[#allocation46_spill]] }
  0xe6   :  { %619 = vmatprep.subr.bf16.mxu1 %v8163_v9  ;;  %s10226_s24 = sld [smem:[#allocation47_spill]] }
  0xe7   :  { %s10227_s23 = sld [smem:[#allocation48_spill]] }
  0xe8   :  { %8094 = vmatmul.mubr.msk.bf16.vlgmr.msra.gmra.mxu1 %vm340_vm0, %v8160_v10  ;;  %535 = vmatpush1.bf16.msra.mxu0 %v8178_v22 }
  0xe9   :  { %620 = vmatpush1.bf16.msra.mxu1 %v8161_v11  ;;  %641 = vmatprep.mubr.bf16.mxu1 %v9536_v19 }
  0xea   :  { %621 = vmatprep.subr.bf16.mxu1 %v8166_v12  ;;  %8097 = vmatprep.subr.bf16.mxu0 %v9760_v3 }
  0xed   :  { %622 = vmatpush1.bf16.msra.mxu1 %v8164_v13  ;;  %v838_v13 = vld [vmem:[%s10216_s5] sm:$0x3] }
  0xee   :  { %623 = vmatprep.subr.bf16.mxu1 %v8171_v15 }
  0xf1   :  { %624 = vmatpush1.bf16.msra.mxu1 %v8169_v16 }
  0xf2   :  { %787 = vmatprep.subr.bf16.mxu1 %v8183_v37 }
 0x1a0   :  { %v8087_v23 = vpop.f32.mrf.mxu1 }
 0x1a2   :  { %v381_v24 = vpop.f32.mrf.mxu1 }
 0x1a4   :  { %v8088_v25 = vpop.f32.mrf.mxu1 }
 0x1a5   :  { %v397_v32 = vpack.c.bf16 %v8088_v25, %v8087_v23 }
 0x1a6   :  { %v384_v26 = vpop.f32.mrf.mxu1 }
 0x1a7   :  { %v396_v27 = vpack.c.bf16 %v384_v26, %v381_v24 }
 0x1a8   :  { %v8095_v28 = vpop.f32.mrf.mxu1 }
 0x1a9   :  { %7304 = vmatmul.mubr.msk.bf16.vlgmr.msra.gmra.mxu1 %vm513_vm1, %v396_v27 }
 0x1aa   :  { %v459_v29 = vpop.f32.mrf.mxu1  ;;  %651 = vmatprep.mubr.bf16.mxu1 %v9536_v19  ;;  %788 = vmatpush1.bf16.msra.mxu1 %v8181_v38 }
 0x1ab   :  { %789 = vmatprep.subr.bf16.mxu1 %v8186_v39 }
 0x1ac   :  { %v8096_v30 = vpop.f32.mrf.mxu1 }
 0x1ad   :  { %v475_v35 = vpack.c.bf16 %v8096_v30, %v8095_v28 }
 0x1ae   :  { %v462_v31 = vpop.f32.mrf.mxu1  ;;  %790 = vmatpush1.bf16.msra.mxu1 %v8184_v40 }
 0x1af   :  { %v474_v33 = vpack.c.bf16 %v462_v31, %v459_v29  ;;  %791 = vmatprep.subr.bf16.mxu1 %v8189_v41 }
 0x1b1   :  { %7296 = vmatmul.mubr.msk.bf16.vlgmr.msra.gmra.mxu0 %vm513_vm1, %v474_v33  ;;  %7305 = vmatmul.mubr.msk.bf16.gmra.mxu1 %vm513_vm1, %v397_v32 }
 0x1b2   :  { %562 = vmatprep.mubr.bf16.mxu0 %v9536_v19  ;;  %8098 = vmatpush3.bf16.msra.mxu0 %v9760_v3 }
 0x1b3   :  { %8099 = vmatprep.subr.bf16.mxu0 %v9763_v5  ;;  %809 = vmatprep.mubr.bf16.mxu1 %v9536_v19 }
 0x1b4   :  { %792 = vmatpush1.bf16.msra.mxu1 %v8187_v42 }
 0x1b6   :  { %8100 = vmatpush3.bf16.msra.mxu0 %v9763_v5  ;;  %v841_v5 = vshrl.u32 %v840_v2, 7  ;;  %v8200_v2 = vld [vmem:[#allocation2 + $0x150] ss:$8 sps:$4 sm:$0xff]  }
 0x1b8   :  { %v9821_v10 = vsub.s32 0, %v841_v5  ;;  %v9823_v11 = vsub.s32 1, %v841_v5  ;;  %v8248_v5 = vld [vmem:[#allocation2 + $0x50] ss:$8 sps:$4 sm:$0xff]  }
 0x1b9   :  { %7297 = vmatmul.mubr.msk.bf16.gmra.mxu0 %vm513_vm1, %v475_v35 }
 0x1ba   :  { %8101 = vmatprep.mubr.msk.bf16.mxu0 %vm340_vm0, %v8179_v34  ;;  %v843_v24 = vrot.slane %v838_v13, %v9821_v10  ;;  %v847_v26 = vrot.slane %v838_v13, %v9823_v11  ;;  %v8206_v13 = vld [vmem:[#allocation2 + $0x130] ss:$8 sps:$4 sm:$0xff]  }
 0x1c1   :  { %8102 = vmatmul.mubr.msk.bf16.vlgmr.msra.gmra.mxu0 %vm340_vm0, %v8180_v36 }
 0x1c2   :  { %922 = vmatprep.mubr.bf16.mxu0 %v9536_v19 }
 0x269   :  { %v643_v57 = vpop.f32.mrf.mxu1 }
 0x26b   :  { %v645_v58 = vpop.f32.mrf.mxu1 }
 0x26d   :  { %v647_v59 = vpop.f32.mrf.mxu1 }
 0x26f   :  { %v649_v60 = vpop.f32.mrf.mxu1 }
 0x271   :  { %v554_v43 = vpop.f32.mrf.mxu0  ;;  %v653_v61 = vpop.f32.mrf.mxu1 }
 0x272   :  { %v644_v28 = vadd.f32 %v643_v57, %v554_v43  ;;  %v8192_v57 = vld [vmem:[#allocation2 + $0x170] ss:$8 sps:$4 sm:$0xff]  }
 0x273   :  { %v556_v44 = vpop.f32.mrf.mxu0  ;;  %v655_v62 = vpop.f32.mrf.mxu1 }
 0x274   :  { %v646_v15 = vadd.f32 %v645_v58, %v556_v44  ;;  %v8197_v58 = vld [vmem:[#allocation2 + $0x164] ss:$8 sps:$4 sm:$0xff]  }
 0x275   :  { %v558_v45 = vpop.f32.mrf.mxu0  ;;  %v657_v63 = vpop.f32.mrf.mxu1 }
 0x276   :  { %v648_v20 = vadd.f32 %v647_v59, %v558_v45  ;;  %v8242_v59 = vld [vmem:[#allocation2 + $0x70] ss:$8 sps:$4 sm:$0xff]  }
 0x277   :  { %v560_v46 = vpop.f32.mrf.mxu0  ;;  %v659_v0 = vpop.f32.mrf.mxu1 }
 0x278   :  { %v650_v8 = vadd.f32 %v649_v60, %v560_v46  ;;  %v8247_v60 = vld [vmem:[#allocation2 + $0x64] ss:$8 sps:$4 sm:$0xff]  }
 0x279   :  { %v564_v47 = vpop.f32.mrf.mxu0 }
 0x27a   :  { %v654_v12 = vadd.f32 %v653_v61, %v564_v47  ;;  %v8195_v61 = vld [vmem:[#allocation2 + $0x160] ss:$8 sps:$4 sm:$0xff]  }
 0x27b   :  { %v566_v48 = vpop.f32.mrf.mxu0 }
 0x27c   :  { %v656_v9 = vadd.f32 %v655_v62, %v566_v48  ;;  %v8202_v62 = vld [vmem:[#allocation2 + $0x154] ss:$8 sps:$4 sm:$0xff]  }
 0x27d   :  { %v568_v49 = vpop.f32.mrf.mxu0 }
 0x27e   :  { %v658_v16 = vadd.f32 %v657_v63, %v568_v49  ;;  %v8245_v63 = vld [vmem:[#allocation2 + $0x60] ss:$8 sps:$4 sm:$0xff]  }
 0x27f   :  { %v570_v50 = vpop.f32.mrf.mxu0 }
 0x280   :  { %v660_v21 = vadd.f32 %v659_v0, %v570_v50  ;;  %v8198_v0 = vld [vmem:[%s10217_s3 + $0x8] sm:$0xff]  }
 0x281   :  { %v8103_v51 = vpop.f32.mrf.mxu0 }
 0x283   :  { %v717_v52 = vpop.f32.mrf.mxu0 }
 0x285   :  { %v8104_v53 = vpop.f32.mrf.mxu0 }
 0x286   :  { %v733_v56 = vpack.c.bf16 %v8104_v53, %v8103_v51  ;;  %v8244_v53 = vld [vmem:[#allocation2 + $0x74] ss:$8 sps:$4 sm:$0xff]  }
 0x287   :  { %v720_v54 = vpop.f32.mrf.mxu0 }
 0x288   :  { %v732_v55 = vpack.c.bf16 %v720_v54, %v717_v52  ;;  %v8194_v52 = vld [vmem:[#allocation2 + $0x174] ss:$8 sps:$4 sm:$0xff]  }
 0x28a   :  { %7326 = vmatmul.mubr.msk.bf16.vlgmr.msra.gmra.mxu1 %vm513_vm1, %v732_v55  ;;  %v8190_v55 = vld [vmem:[%s10217_s3] sm:$0xff]  }
 0x28b   :  { %819 = vmatprep.mubr.bf16.mxu1 %v9536_v19 }
 0x292   :  { %7327 = vmatmul.mubr.msk.bf16.gmra.mxu1 %vm513_vm1, %v733_v56  ;;  %v8191_v56 = vld [vmem:[%s10217_s3 + $0x10] sm:$0xff]  }
 0x293   :  { %1032 = vmatprep.mubr.bf16.mxu1 %v9536_v19 }
 0x34a   :  { %v811_v1 = vpop.f32.mrf.mxu1 }
 0x34b   :  { %v830_v35 = vadd.f32 %v811_v1, %v644_v28  ;;  %v8199_v1 = vld [vmem:[%s10217_s3 + $0x18] sm:$0xff]   ;;  %v8263_v28 = vld [vmem:[#allocation2] ss:$8 sps:$4 sm:$0xff]  }
 0x34c   :  { %v813_v3 = vpop.f32.mrf.mxu1 }
 0x34d   :  { %v831_v25 = vadd.f32 %v813_v3, %v646_v15  ;;  %v9846_v44 = vadd.f32 %v843_v24, %v830_v35  ;;  %v8250_v3 = vld [vmem:[#allocation2 + $0x54] ss:$8 sps:$4 sm:$0xff]   ;;  %v8254_v15 = vld [vmem:[#allocation2 + $0x30] ss:$8 sps:$4 sm:$0xff]  }
 0x34e   :  { %v815_v4 = vpop.f32.mrf.mxu1  ;;  %v8266_v35 = vld [vmem:[#allocation2 + $0xf0] ss:$8 sps:$4 sm:$0xff]  }
 0x34f   :  { %v832_v29 = vadd.f32 %v815_v4, %v648_v20  ;;  %v9836_v37 = vadd.f32 %v847_v26, %v831_v25  ;;  %v858_v51 = vmax.f32 %v9846_v44, 0.0  ;;  %v8205_v4 = vld [vmem:[#allocation2 + $0x144] ss:$8 sps:$4 sm:$0xff]   ;;  %v8257_v20 = vld [vmem:[#allocation2 + $0x20] ss:$8 sps:$4 sm:$0xff]  }
 0x350   :  { %v817_v6 = vpop.f32.mrf.mxu1  ;;  %v8265_v25 = vld [vmem:[#allocation2 + $0x4] ss:$8 sps:$4 sm:$0xff]  }
 0x351   :  { %v833_v17 = vadd.f32 %v817_v6, %v650_v8  ;;  %v9840_v39 = vadd.f32 %v843_v24, %v832_v29  ;;  %v859_v46 = vmax.f32 %v9836_v37, 0.0  ;;  %v8253_v6 = vld [vmem:[#allocation2 + $0x44] ss:$8 sps:$4 sm:$0xff]   ;;  %v8208_v8 = vld [vmem:[#allocation2 + $0x134] ss:$8 sps:$4 sm:$0xff]  }
 0x352   :  { %v821_v7 = vpop.f32.mrf.mxu1  ;;  %v8268_v29 = vld [vmem:[#allocation2 + $0xf4] ss:$8 sps:$4 sm:$0xff]  }
 0x353   :  { %v834_v22 = vadd.f32 %v821_v7, %v654_v12  ;;  %v9828_v31 = vadd.f32 %v847_v26, %v833_v17  ;;  %v860_v48 = vmax.f32 %v9840_v39, 0.0  ;;  %v8203_v7 = vld [vmem:[#allocation2 + $0x140] ss:$8 sps:$4 sm:$0xff]   ;;  %v8256_v12 = vld [vmem:[#allocation2 + $0x34] ss:$8 sps:$4 sm:$0xff]  }
 0x354   :  { %v823_v14 = vpop.f32.mrf.mxu1  ;;  %v8209_v17 = vld [vmem:[#allocation2 + $0x120] ss:$8 sps:$4 sm:$0xff]  }
 0x355   :  { %v835_v18 = vadd.f32 %v823_v14, %v656_v9  ;;  %v9834_v36 = vadd.f32 %v843_v24, %v834_v22  ;;  %v861_v41 = vmax.f32 %v9828_v31, 0.0  ;;  %v9880_v54 = vpack.c.bf16 %v860_v48, %v858_v51  ;;  %v8251_v9 = vld [vmem:[#allocation2 + $0x40] ss:$8 sps:$4 sm:$0xff]   ;;  %v8211_v14 = vld [vmem:[#allocation2 + $0x124] ss:$8 sps:$4 sm:$0xff]  }
 0x356   :  { %v825_v23 = vpop.f32.mrf.mxu1  ;;  %v8212_v22 = vld [vmem:[#allocation2 + $0x110] ss:$8 sps:$4 sm:$0xff]  }
 0x357   :  { %v836_v27 = vadd.f32 %v825_v23, %v658_v16  ;;  %v9830_v32 = vadd.f32 %v847_v26, %v835_v18  ;;  %v862_v45 = vmax.f32 %v9834_v36, 0.0  ;;  %v9869_v50 = vpack.c.bf16 %v861_v41, %v859_v46  ;;  %v8259_v16 = vld [vmem:[#allocation2 + $0x24] ss:$8 sps:$4 sm:$0xff]   ;;  %v8214_v18 = vld [vmem:[#allocation2 + $0x114] ss:$8 sps:$4 sm:$0xff]  }
 0x358   :  { %v827_v30 = vpop.f32.mrf.mxu1  ;;  %v8217_v23 = vld [vmem:[#allocation2 + $0x104] ss:$8 sps:$4 sm:$0xff]  }
 0x359   :  { %v9832_v33 = vadd.f32 %v843_v24, %v836_v27  ;;  %v837_v34 = vadd.f32 %v827_v30, %v660_v21  ;;  %v863_v42 = vmax.f32 %v9830_v32, 0.0  ;;  %v8262_v21 = vld [vmem:[#allocation2 + $0x14] ss:$8 sps:$4 sm:$0xff]   ;;  %v8260_v24 = vld [vmem:[#allocation2 + $0x10] ss:$8 sps:$4 sm:$0xff]   ;;  %v8538_v32 = vld [vmem:[#allocation7] sm:$0xff]  }
 0x35a   :  { %v8220_v27 = vld [vmem:[#allocation2 + $0x1f4] ss:$8 sps:$4 sm:$0xff]   ;;  %v8218_v30 = vld [vmem:[#allocation2 + $0x1f0] ss:$8 sps:$4 sm:$0xff]   ;;  %v8539_v36 = vld [vmem:[#allocation7 + $0x8] sm:$0xff]  }
 0x35b   :  { %v9838_v38 = vadd.f32 %v847_v26, %v837_v34  ;;  %v864_v40 = vmax.f32 %v9832_v33, 0.0  ;;  %v8215_v26 = vld [vmem:[#allocation2 + $0x100] ss:$8 sps:$4 sm:$0xff]   ;;  %v8223_v34 = vld [vmem:[#allocation2 + $0x1e4] ss:$8 sps:$4 sm:$0xff]  }
 0x35c   :  { %v8542_v33 = vld [vmem:[#allocation8 + $0x174] ss:$8 sps:$4 sm:$0xff]  }
 0x35d   :  { %v865_v43 = vmax.f32 %v9838_v38, 0.0  ;;  %v9861_v49 = vpack.c.bf16 %v864_v40, %v862_v45  ;;  %v8540_v38 = vld [vmem:[#allocation8 + $0x170] ss:$8 sps:$4 sm:$0xff]  }
 0x35f   :  { %v9854_v47 = vpack.c.bf16 %v865_v43, %v863_v42 }
 0x361   :  { %902 = vmatprep.subr.bf16.mxu0 %v9854_v47  ;;  %1012 = vmatprep.subr.bf16.mxu1 %v9854_v47 }
 0x362   :  { %903 = vmatpush1.bf16.msra.mxu0 %v9861_v49  ;;  %1013 = vmatpush1.bf16.msra.mxu1 %v9861_v49 }
 0x363   :  { %904 = vmatprep.subr.bf16.mxu0 %v9869_v50  ;;  %1014 = vmatprep.subr.bf16.mxu1 %v9869_v50 }
 0x366   :  { %905 = vmatpush1.bf16.msra.mxu0 %v9880_v54  ;;  %1015 = vmatpush1.bf16.msra.mxu1 %v9880_v54 }
 0x367   :  { %1250 = vmatprep.subr.bf16.mxu0 %v8194_v52  ;;  %1463 = vmatprep.subr.bf16.mxu1 %v8244_v53  ;;  %v8271_v52 = vld [vmem:[#allocation2 + $0xe4] ss:$8 sps:$4 sm:$0xff]   ;;  %v8221_v53 = vld [vmem:[#allocation2 + $0x1e0] ss:$8 sps:$4 sm:$0xff]  }
 0x369   :  { %7330 = vmatmul.mubr.msk.bf16.vlgmr.msra.gmra.mxu0 %vm340_vm0, %v8190_v55  ;;  %7338 = vmatmul.mubr.msk.bf16.vlgmr.msra.gmra.mxu1 %vm340_vm0, %v8191_v56  ;;  %v8226_v55 = vld [vmem:[#allocation2 + $0x1d4] ss:$8 sps:$4 sm:$0xff]   ;;  %v8269_v56 = vld [vmem:[#allocation2 + $0xe0] ss:$8 sps:$4 sm:$0xff]  }
 0x36a   :  { %1251 = vmatpush1.bf16.msra.mxu0 %v8192_v57  ;;  %932 = vmatprep.mubr.bf16.mxu0 %v9536_v19  ;;  %v8274_v57 = vld [vmem:[#allocation2 + $0xd4] ss:$8 sps:$4 sm:$0xff]  }
 0x36b   :  { %1252 = vmatprep.subr.bf16.mxu0 %v8197_v58  ;;  %1042 = vmatprep.mubr.bf16.mxu1 %v9536_v19  ;;  %v8224_v58 = vld [vmem:[#allocation2 + $0x1d0] ss:$8 sps:$4 sm:$0xff]  }
 0x36c   :  { %1464 = vmatpush1.bf16.msra.mxu1 %v8242_v59  ;;  %v8229_v59 = vld [vmem:[#allocation2 + $0x1c4] ss:$8 sps:$4 sm:$0xff]  }
 0x36d   :  { %1465 = vmatprep.subr.bf16.mxu1 %v8247_v60  ;;  %v8272_v60 = vld [vmem:[#allocation2 + $0xd0] ss:$8 sps:$4 sm:$0xff]  }
 0x36e   :  { %1253 = vmatpush1.bf16.msra.mxu0 %v8195_v61  ;;  %v8277_v61 = vld [vmem:[#allocation2 + $0xc4] ss:$8 sps:$4 sm:$0xff]  }
 0x36f   :  { %1254 = vmatprep.subr.bf16.mxu0 %v8202_v62  ;;  %v8227_v62 = vld [vmem:[#allocation2 + $0x1c0] ss:$8 sps:$4 sm:$0xff]  }
 0x370   :  { %1466 = vmatpush1.bf16.msra.mxu1 %v8245_v63  ;;  %v8232_v63 = vld [vmem:[#allocation2 + $0x1b4] ss:$8 sps:$4 sm:$0xff]  }
 0x371   :  { %7331 = vmatmul.mubr.msk.bf16.gmra.mxu0 %vm340_vm0, %v8198_v0  ;;  %7339 = vmatmul.mubr.msk.bf16.gmra.mxu1 %vm340_vm0, %v8199_v1  ;;  %v8275_v0 = vld [vmem:[#allocation2 + $0xc0] ss:$8 sps:$4 sm:$0xff]   ;;  %v8280_v1 = vld [vmem:[#allocation2 + $0xb4] ss:$8 sps:$4 sm:$0xff]  }
 0x372   :  { %1255 = vmatpush1.bf16.msra.mxu0 %v8200_v2  ;;  %1467 = vmatprep.subr.bf16.mxu1 %v8250_v3  ;;  %v8230_v2 = vld [vmem:[#allocation2 + $0x1b0] ss:$8 sps:$4 sm:$0xff]   ;;  %v8235_v3 = vld [vmem:[#allocation2 + $0x1a4] ss:$8 sps:$4 sm:$0xff]  }
 0x373   :  { %1256 = vmatprep.subr.bf16.mxu0 %v8205_v4  ;;  %v8278_v4 = vld [vmem:[#allocation2 + $0xb0] ss:$8 sps:$4 sm:$0xff]  }
 0x374   :  { %1468 = vmatpush1.bf16.msra.mxu1 %v8248_v5  ;;  %v8283_v5 = vld [vmem:[#allocation2 + $0xa4] ss:$8 sps:$4 sm:$0xff]  }
 0x375   :  { %1469 = vmatprep.subr.bf16.mxu1 %v8253_v6  ;;  %v8233_v6 = vld [vmem:[#allocation2 + $0x1a0] ss:$8 sps:$4 sm:$0xff]  }
 0x376   :  { %1257 = vmatpush1.bf16.msra.mxu0 %v8203_v7  ;;  %v8238_v7 = vld [vmem:[#allocation2 + $0x194] ss:$8 sps:$4 sm:$0xff]  }
 0x377   :  { %1258 = vmatprep.subr.bf16.mxu0 %v8208_v8  ;;  %v8281_v8 = vld [vmem:[#allocation2 + $0xa0] ss:$8 sps:$4 sm:$0xff]  }
 0x378   :  { %1470 = vmatpush1.bf16.msra.mxu1 %v8251_v9  ;;  %v8236_v9 = vld [vmem:[#allocation2 + $0x190] ss:$8 sps:$4 sm:$0xff]  }
 0x379   :  { %1471 = vmatprep.subr.bf16.mxu1 %v8256_v12  ;;  %v8241_v12 = vld [vmem:[#allocation2 + $0x184] ss:$8 sps:$4 sm:$0xff]  }
 0x37a   :  { %1259 = vmatpush1.bf16.msra.mxu0 %v8206_v13  ;;  %v8239_v13 = vld [vmem:[#allocation2 + $0x180] ss:$8 sps:$4 sm:$0xff]  }
 0x37b   :  { %1260 = vmatprep.subr.bf16.mxu0 %v8211_v14  ;;  %v8286_v14 = vld [vmem:[#allocation2 + $0x94] ss:$8 sps:$4 sm:$0xff]  }
 0x37c   :  { %1472 = vmatpush1.bf16.msra.mxu1 %v8254_v15  ;;  %v8284_v15 = vld [vmem:[#allocation2 + $0x90] ss:$8 sps:$4 sm:$0xff]  }
 0x37d   :  { %1473 = vmatprep.subr.bf16.mxu1 %v8259_v16  ;;  %v8289_v16 = vld [vmem:[#allocation2 + $0x84] ss:$8 sps:$4 sm:$0xff]  }
 0x37e   :  { %1261 = vmatpush1.bf16.msra.mxu0 %v8209_v17  ;;  %v8287_v17 = vld [vmem:[#allocation2 + $0x80] ss:$8 sps:$4 sm:$0xff]  }
 0x37f   :  { %1262 = vmatprep.subr.bf16.mxu0 %v8214_v18  ;;  %v8294_v18 = vld [vmem:[#allocation2 + $0x274] ss:$8 sps:$4 sm:$0xff]  }
 0x380   :  { %1474 = vmatpush1.bf16.msra.mxu1 %v8257_v20 }
 0x381   :  { %1475 = vmatprep.subr.bf16.mxu1 %v8262_v21 }
 0x382   :  { %1263 = vmatpush1.bf16.msra.mxu0 %v8212_v22 }
 0x383   :  { %1264 = vmatprep.subr.bf16.mxu0 %v8217_v23 }
 0x384   :  { %1476 = vmatpush1.bf16.msra.mxu1 %v8260_v24 }
 0x385   :  { %1477 = vmatprep.subr.bf16.mxu1 %v8265_v25 }
 0x386   :  { %1265 = vmatpush1.bf16.msra.mxu0 %v8215_v26 }
 0x387   :  { %1266 = vmatprep.subr.bf16.mxu0 %v8220_v27 }
 0x388   :  { %1478 = vmatpush1.bf16.msra.mxu1 %v8263_v28 }
 0x389   :  { %1479 = vmatprep.subr.bf16.mxu1 %v8268_v29 }
 0x38a   :  { %1267 = vmatpush2.bf16.msra.mxu0 %v8218_v30  ;;  %v8292_v30 = vld [vmem:[#allocation2 + $0x270] ss:$8 sps:$4 sm:$0xff]  }
 0x38b   :  { %1268 = vmatprep.subr.bf16.mxu0 %v8223_v34 }
 0x38c   :  { %1480 = vmatpush2.bf16.msra.mxu1 %v8266_v35 }
 0x38d   :  { %1481 = vmatprep.subr.bf16.mxu1 %v8271_v52 }
 0x38e   :  { %1269 = vmatpush2.bf16.msra.mxu0 %v8221_v53  ;;  %v8297_v53 = vld [vmem:[#allocation2 + $0x264] ss:$8 sps:$4 sm:$0xff]  }
 0x38f   :  { %1270 = vmatprep.subr.bf16.mxu0 %v8226_v55 }
 0x390   :  { %1482 = vmatpush2.bf16.msra.mxu1 %v8269_v56 }
 0x391   :  { %1483 = vmatprep.subr.bf16.mxu1 %v8274_v57  ;;  %v8295_v57 = vld [vmem:[#allocation2 + $0x260] ss:$8 sps:$4 sm:$0xff]  }
 0x392   :  { %1271 = vmatpush2.bf16.msra.mxu0 %v8224_v58 }
 0x393   :  { %1272 = vmatprep.subr.bf16.mxu0 %v8229_v59 }
 0x394   :  { %1484 = vmatpush2.bf16.msra.mxu1 %v8272_v60  ;;  %v8300_v60 = vld [vmem:[#allocation2 + $0x254] ss:$8 sps:$4 sm:$0xff]  }
 0x395   :  { %1485 = vmatprep.subr.bf16.mxu1 %v8277_v61 }
 0x396   :  { %1273 = vmatpush2.bf16.msra.mxu0 %v8227_v62 }
 0x397   :  { %1274 = vmatprep.subr.bf16.mxu0 %v8232_v63 }
 0x398   :  { %1486 = vmatpush2.bf16.msra.mxu1 %v8275_v0 }
 0x399   :  { %1487 = vmatprep.subr.bf16.mxu1 %v8280_v1 }
 0x39a   :  { %1275 = vmatpush2.bf16.msra.mxu0 %v8230_v2  ;;  %v8298_v2 = vld [vmem:[#allocation2 + $0x250] ss:$8 sps:$4 sm:$0xff]  }
 0x39b   :  { %1276 = vmatprep.subr.bf16.mxu0 %v8235_v3 }
 0x39c   :  { %1488 = vmatpush2.bf16.msra.mxu1 %v8278_v4  ;;  %v8306_v4 = vld [vmem:[#allocation2 + $0x234] ss:$8 sps:$4 sm:$0xff]  }
 0x39d   :  { %1489 = vmatprep.subr.bf16.mxu1 %v8283_v5  ;;  %v8290_v5 = vld [vmem:[%s10217_s3 + $0x20] sm:$0xff]  }
 0x39e   :  { %1277 = vmatpush2.bf16.msra.mxu0 %v8233_v6  ;;  %v8304_v6 = vld [vmem:[#allocation2 + $0x230] ss:$8 sps:$4 sm:$0xff]  }
 0x39f   :  { %1278 = vmatprep.subr.bf16.mxu0 %v8238_v7  ;;  %v8307_v7 = vld [vmem:[#allocation2 + $0x220] ss:$8 sps:$4 sm:$0xff]  }
 0x3a0   :  { %1490 = vmatpush2.bf16.msra.mxu1 %v8281_v8  ;;  %v8312_v8 = vld [vmem:[#allocation2 + $0x214] ss:$8 sps:$4 sm:$0xff]  }
 0x3a1   :  { %1491 = vmatprep.subr.bf16.mxu1 %v8286_v14  ;;  %v8313_v14 = vld [vmem:[#allocation2 + $0x200] ss:$8 sps:$4 sm:$0xff]  }
 0x3a2   :  { %1279 = vmatpush2.bf16.msra.mxu0 %v8236_v9  ;;  %v8291_v9 = vld [vmem:[%s10217_s3 + $0x28] sm:$0xff]  }
 0x3a3   :  { %1280 = vmatprep.subr.bf16.mxu0 %v8241_v12  ;;  %v8310_v12 = vld [vmem:[#allocation2 + $0x210] ss:$8 sps:$4 sm:$0xff]  }
 0x3a4   :  { %1492 = vmatpush2.bf16.msra.mxu1 %v8284_v15  ;;  %v8318_v15 = vld [vmem:[#allocation2 + $0x2f4] ss:$8 sps:$4 sm:$0xff]  }
 0x3a5   :  { %1493 = vmatprep.subr.bf16.mxu1 %v8289_v16  ;;  %v8316_v16 = vld [vmem:[#allocation2 + $0x2f0] ss:$8 sps:$4 sm:$0xff]  }
 0x3a6   :  { %1281 = vmatpush2.bf16.msra.mxu0 %v8239_v13  ;;  %v8315_v13 = vld [vmem:[#allocation2 + $0x204] ss:$8 sps:$4 sm:$0xff]  }
 0x3a7   :  { %1549 = vmatprep.subr.bf16.mxu0 %v9854_v47 }
 0x3a8   :  { %1494 = vmatpush2.bf16.msra.mxu1 %v8287_v17  ;;  %v8321_v17 = vld [vmem:[#allocation2 + $0x2e4] ss:$8 sps:$4 sm:$0xff]  }
 0x3a9   :  { %1787 = vmatprep.subr.bf16.mxu1 %v8294_v18  ;;  %v8319_v18 = vld [vmem:[#allocation2 + $0x2e0] ss:$8 sps:$4 sm:$0xff]  }
 0x429   :  { %v924_v20 = vpop.f32.mrf.mxu0  ;;  %v1034_v21 = vpop.f32.mrf.mxu1 }
 0x42b   :  { %v926_v22 = vpop.f32.mrf.mxu0  ;;  %v1036_v23 = vpop.f32.mrf.mxu1 }
 0x42d   :  { %v928_v24 = vpop.f32.mrf.mxu0  ;;  %v1038_v25 = vpop.f32.mrf.mxu1 }
 0x42e   :  { %v943_v26 = vpack.c.bf16 %v928_v24, %v924_v20  ;;  %v1053_v34 = vpack.c.bf16 %v1038_v25, %v1034_v21  ;;  %v8324_v20 = vld [vmem:[#allocation2 + $0x2d4] ss:$8 sps:$4 sm:$0xff]   ;;  %v8322_v21 = vld [vmem:[#allocation2 + $0x2d0] ss:$8 sps:$4 sm:$0xff]  }
 0x42f   :  { %v930_v27 = vpop.f32.mrf.mxu0  ;;  %v1040_v28 = vpop.f32.mrf.mxu1  ;;  %v8330_v24 = vld [vmem:[#allocation2 + $0x2b4] ss:$8 sps:$4 sm:$0xff]   ;;  %v8328_v25 = vld [vmem:[#allocation2 + $0x2b0] ss:$8 sps:$4 sm:$0xff]  }
 0x430   :  { %v944_v47 = vpack.c.bf16 %v930_v27, %v926_v22  ;;  %v1054_v29 = vpack.c.bf16 %v1040_v28, %v1036_v23  ;;  %v8327_v22 = vld [vmem:[#allocation2 + $0x2c4] ss:$8 sps:$4 sm:$0xff]   ;;  %v8325_v23 = vld [vmem:[#allocation2 + $0x2c0] ss:$8 sps:$4 sm:$0xff]   ;;  %v8336_v28 = vld [vmem:[#allocation2 + $0x294] ss:$8 sps:$4 sm:$0xff]  }
 0x431   :  { %v934_v35 = vpop.f32.mrf.mxu0  ;;  %v1044_v52 = vpop.f32.mrf.mxu1  ;;  %v8331_v27 = vld [vmem:[#allocation2 + $0x2a0] ss:$8 sps:$4 sm:$0xff]  }
 0x432   :  { %1282 = vmatprep.mubr.bf16.mxu0 %v1054_v29  ;;  %1495 = vmatprep.mubr.bf16.mxu1 %v944_v47  ;;  %v8334_v47 = vld [vmem:[#allocation2 + $0x290] ss:$8 sps:$4 sm:$0xff]   ;;  %v8339_v29 = vld [vmem:[#allocation2 + $0x284] ss:$8 sps:$4 sm:$0xff]  }
 0x433   :  { %v936_v55 = vpop.f32.mrf.mxu0  ;;  %v1046_v56 = vpop.f32.mrf.mxu1  ;;  %1283 = vmatmul.mubr.bf16.vlgmr.msra.gmra.mxu0 %v1053_v34  ;;  %1496 = vmatmul.mubr.bf16.vlgmr.msra.gmra.mxu1 %v943_v26  ;;  %v8333_v26 = vld [vmem:[#allocation2 + $0x2a4] ss:$8 sps:$4 sm:$0xff]  }
 0x434   :  { %1550 = vmatpush1.bf16.msra.mxu0 %v9861_v49  ;;  %1788 = vmatpush1.bf16.msra.mxu1 %v8292_v30  ;;  %v8303_v49 = vld [vmem:[#allocation2 + $0x244] ss:$8 sps:$4 sm:$0xff]   ;;  %v8337_v30 = vld [vmem:[#allocation2 + $0x280] ss:$8 sps:$4 sm:$0xff]  }
 0x435   :  { %1551 = vmatprep.subr.bf16.mxu0 %v9869_v50  ;;  %v938_v58 = vpop.f32.mrf.mxu0  ;;  %v1048_v59 = vpop.f32.mrf.mxu1  ;;  %1789 = vmatprep.subr.bf16.mxu1 %v8297_v53  ;;  %v8301_v50 = vld [vmem:[#allocation2 + $0x240] ss:$8 sps:$4 sm:$0xff]  }
 0x436   :  { %v945_v61 = vpack.c.bf16 %v938_v58, %v934_v35  ;;  %v1055_v3 = vpack.c.bf16 %v1048_v59, %v1044_v52 }
 0x437   :  { %v940_v62 = vpop.f32.mrf.mxu0  ;;  %v1050_v63 = vpop.f32.mrf.mxu1 }
 0x438   :  { %v946_v0 = vpack.c.bf16 %v940_v62, %v936_v55  ;;  %v1056_v1 = vpack.c.bf16 %v1050_v63, %v1046_v56  ;;  %1552 = vmatpush1.bf16.msra.mxu0 %v9880_v54  ;;  %1790 = vmatpush1.bf16.msra.mxu1 %v8295_v57  ;;  %v8309_v54 = vld [vmem:[#allocation2 + $0x224] ss:$8 sps:$4 sm:$0xff]  }
 0x439   :  { %1791 = vmatprep.subr.bf16.mxu1 %v8300_v60 }
 0x43a   :  { %1292 = vmatprep.mubr.bf16.mxu0 %v1056_v1  ;;  %1505 = vmatprep.mubr.bf16.mxu1 %v946_v0 }
 0x43b   :  { %1293 = vmatmul.mubr.bf16.gmra.mxu0 %v1055_v3  ;;  %1506 = vmatmul.mubr.bf16.gmra.mxu1 %v945_v61 }
 0x43c   :  { %1569 = vmatprep.mubr.bf16.mxu0 %v9536_v19  ;;  %1792 = vmatpush1.bf16.msra.mxu1 %v8298_v2 }
 0x43d   :  { %1793 = vmatprep.subr.bf16.mxu1 %v8303_v49 }
 0x440   :  { %1794 = vmatpush1.bf16.msra.mxu1 %v8301_v50 }
 0x441   :  { %1795 = vmatprep.subr.bf16.mxu1 %v8306_v4 }
 0x443   :  { %7410 = vmatmul.mubr.msk.bf16.vlgmr.msra.gmra.mxu0 %vm340_vm0, %v8290_v5 }
 0x444   :  { %1579 = vmatprep.mubr.bf16.mxu0 %v9536_v19  ;;  %1796 = vmatpush1.bf16.msra.mxu1 %v8304_v6 }
 0x445   :  { %1797 = vmatprep.subr.bf16.mxu1 %v8309_v54 }
 0x448   :  { %1798 = vmatpush1.bf16.msra.mxu1 %v8307_v7  ;;  %v8392_v7 = vld [vmem:[#allocation5 + $0x70] ss:$8 sps:$4 sm:$0xff]  }
 0x449   :  { %1799 = vmatprep.subr.bf16.mxu1 %v8312_v8  ;;  %v8394_v8 = vld [vmem:[#allocation5 + $0x74] ss:$8 sps:$4 sm:$0xff]  }
 0x44b   :  { %7411 = vmatmul.mubr.msk.bf16.gmra.mxu0 %vm340_vm0, %v8291_v9 }
 0x44c   :  { %1800 = vmatpush1.bf16.msra.mxu1 %v8310_v12  ;;  %1932 = vmatprep.mubr.bf16.mxu0 %v9536_v19  ;;  %v8397_v12 = vld [vmem:[#allocation5 + $0x64] ss:$8 sps:$4 sm:$0xff]  }
 0x44d   :  { %1801 = vmatprep.subr.bf16.mxu1 %v8315_v13  ;;  %v8395_v13 = vld [vmem:[#allocation5 + $0x60] ss:$8 sps:$4 sm:$0xff]  }
 0x450   :  { %1802 = vmatpush1.bf16.msra.mxu1 %v8313_v14  ;;  %v8400_v14 = vld [vmem:[#allocation5 + $0x54] ss:$8 sps:$4 sm:$0xff]  }
 0x451   :  { %1803 = vmatprep.subr.bf16.mxu1 %v8318_v15 }
 0x454   :  { %1804 = vmatpush2.bf16.msra.mxu1 %v8316_v16  ;;  %v8398_v16 = vld [vmem:[#allocation5 + $0x50] ss:$8 sps:$4 sm:$0xff]  }
 0x455   :  { %1805 = vmatprep.subr.bf16.mxu1 %v8321_v17  ;;  %v8403_v17 = vld [vmem:[#allocation5 + $0x44] ss:$8 sps:$4 sm:$0xff]  }
 0x458   :  { %1806 = vmatpush2.bf16.msra.mxu1 %v8319_v18 }
 0x459   :  { %1807 = vmatprep.subr.bf16.mxu1 %v8324_v20  ;;  %v8401_v20 = vld [vmem:[#allocation5 + $0x40] ss:$8 sps:$4 sm:$0xff]  }
 0x45c   :  { %1808 = vmatpush2.bf16.msra.mxu1 %v8322_v21  ;;  %v8406_v21 = vld [vmem:[#allocation5 + $0x34] ss:$8 sps:$4 sm:$0xff]  }
 0x45d   :  { %1809 = vmatprep.subr.bf16.mxu1 %v8327_v22 }
 0x460   :  { %1810 = vmatpush2.bf16.msra.mxu1 %v8325_v23  ;;  %v8404_v23 = vld [vmem:[#allocation5 + $0x30] ss:$8 sps:$4 sm:$0xff]  }
 0x461   :  { %1811 = vmatprep.subr.bf16.mxu1 %v8330_v24  ;;  %v8409_v24 = vld [vmem:[#allocation5 + $0x24] ss:$8 sps:$4 sm:$0xff]  }
 0x464   :  { %1812 = vmatpush2.bf16.msra.mxu1 %v8328_v25 }
 0x465   :  { %1813 = vmatprep.subr.bf16.mxu1 %v8333_v26  ;;  %v1848_v26 = vld [vmem:[%s10218_s0] sm:$0x3] }
 0x468   :  { %1814 = vmatpush2.bf16.msra.mxu1 %v8331_v27 }
 0x469   :  { %1815 = vmatprep.subr.bf16.mxu1 %v8336_v28 }
 0x46c   :  { %1816 = vmatpush2.bf16.msra.mxu1 %v8334_v47  ;;  %v8407_v47 = vld [vmem:[#allocation5 + $0x20] ss:$8 sps:$4 sm:$0xff]  }
 0x46d   :  { %1817 = vmatprep.subr.bf16.mxu1 %v8339_v29 }
 0x470   :  { %1818 = vmatpush2.bf16.msra.mxu1 %v8337_v30 }
 0x471   :  { %2473 = vmatprep.subr.bf16.mxu1 %v8394_v8  ;;  %v8413_v8 = vld [vmem:[#allocation5] ss:$8 sps:$4 sm:$0xff]  }
 0x4f3   :  { %v1284_v34 = vpop.f32.mrf.mxu0  ;;  %v1497_v5 = vpop.f32.mrf.mxu1 }
 0x4f4   :  { %v1498_v27 = vadd.f32 %v1497_v5, %v1284_v34 }
 0x4f5   :  { %v1286_v35 = vpop.f32.mrf.mxu0  ;;  %v1499_v6 = vpop.f32.mrf.mxu1 }
 0x4f6   :  { %v1500_v29 = vadd.f32 %v1499_v6, %v1286_v35 }
 0x4f7   :  { %v1288_v52 = vpop.f32.mrf.mxu0  ;;  %v1501_v54 = vpop.f32.mrf.mxu1 }
 0x4f9   :  { %v9905_v53 = vpop.f32.mrf.mxu0  ;;  %v1503_v9 = vpop.f32.mrf.mxu1 }
 0x4fb   :  { %v9907_v55 = vpop.f32.mrf.mxu0  ;;  %v1507_v15 = vpop.f32.mrf.mxu1 }
 0x4fd   :  { %v9909_v56 = vpop.f32.mrf.mxu0  ;;  %v1509_v18 = vpop.f32.mrf.mxu1 }
 0x4ff   :  { %v9911_v57 = vpop.f32.mrf.mxu0  ;;  %v1511_v22 = vpop.f32.mrf.mxu1 }
 0x501   :  { %v9913_v58 = vpop.f32.mrf.mxu0  ;;  %v1513_v25 = vpop.f32.mrf.mxu1 }
 0x503   :  { %v1571_v59 = vpop.f32.mrf.mxu0 }
 0x505   :  { %v1573_v60 = vpop.f32.mrf.mxu0 }
 0x507   :  { %v1575_v61 = vpop.f32.mrf.mxu0 }
 0x508   :  { %v1590_v0 = vpack.c.bf16 %v1575_v61, %v1571_v59  ;;  %v1853_v59 = vrot.slane %v1848_v26, %v9821_v10 }
 0x509   :  { %v1577_v62 = vpop.f32.mrf.mxu0 }
 0x50a   :  { %v1591_v63 = vpack.c.bf16 %v1577_v62, %v1573_v60  ;;  %v8412_v60 = vld [vmem:[#allocation5 + $0x14] ss:$8 sps:$4 sm:$0xff]   ;;  %v1502_v62 = vadd.f32 %v1501_v54, %v1288_v52  ;;  %v1510_v52 = vadd.f32 %v1509_v18, %v9909_v56  ;;  %v8416_v56 = vld [vmem:[#allocation5 + $0xf0] ss:$8 sps:$4 sm:$0xff]   ;;  %v1514_v18 = vadd.f32 %v1513_v25, %v9913_v58 }
 0x50b   :  { %v1581_v1 = vpop.f32.mrf.mxu0 }
 0x50c   :  { %1819 = vmatprep.mubr.bf16.mxu1 %v1591_v63 }
 0x50d   :  { %v1583_v2 = vpop.f32.mrf.mxu0  ;;  %1820 = vmatmul.mubr.bf16.vlgmr.msra.gmra.mxu1 %v1590_v0  ;;  %v1857_v0 = vrot.slane %v1848_v26, %v9823_v11 }
 0x50e   :  { %2474 = vmatpush1.bf16.msra.mxu1 %v8392_v7 }
 0x50f   :  { %v1585_v3 = vpop.f32.mrf.mxu0  ;;  %2475 = vmatprep.subr.bf16.mxu1 %v8397_v12 }
 0x510   :  { %v1592_v4 = vpack.c.bf16 %v1585_v3, %v1581_v1  ;;  %v1504_v3 = vadd.f32 %v1503_v9, %v9905_v53  ;;  %v8418_v53 = vld [vmem:[#allocation5 + $0xf4] ss:$8 sps:$4 sm:$0xff]   ;;  %v1512_v9 = vadd.f32 %v1511_v22, %v9911_v57 }
 0x511   :  { %v1587_v49 = vpop.f32.mrf.mxu0 }
 0x512   :  { %v1593_v50 = vpack.c.bf16 %v1587_v49, %v1583_v2  ;;  %2476 = vmatpush1.bf16.msra.mxu1 %v8395_v13  ;;  %v8410_v2 = vld [vmem:[#allocation5 + $0x10] ss:$8 sps:$4 sm:$0xff]  }
 0x513   :  { %2477 = vmatprep.subr.bf16.mxu1 %v8400_v14 }
 0x514   :  { %1829 = vmatprep.mubr.bf16.mxu1 %v1593_v50  ;;  %v8415_v50 = vld [vmem:[#allocation5 + $0x4] ss:$8 sps:$4 sm:$0xff]  }
 0x515   :  { %1830 = vmatmul.mubr.bf16.gmra.mxu1 %v1592_v4  ;;  %v1508_v4 = vadd.f32 %v1507_v15, %v9907_v55 }
 0x516   :  { %2478 = vmatpush1.bf16.msra.mxu1 %v8398_v16 }
 0x517   :  { %2479 = vmatprep.subr.bf16.mxu1 %v8403_v17 }
 0x51a   :  { %2480 = vmatpush1.bf16.msra.mxu1 %v8401_v20 }
 0x51b   :  { %2481 = vmatprep.subr.bf16.mxu1 %v8406_v21 }
 0x51e   :  { %2482 = vmatpush1.bf16.msra.mxu1 %v8404_v23 }
 0x51f   :  { %2483 = vmatprep.subr.bf16.mxu1 %v8409_v24 }
 0x522   :  { %2484 = vmatpush1.bf16.msra.mxu1 %v8407_v47 }
 0x523   :  { %2485 = vmatprep.subr.bf16.mxu1 %v8412_v60 }
 0x526   :  { %2486 = vmatpush1.bf16.msra.mxu1 %v8410_v2  ;;  %v8422_v2 = vld [vmem:[#allocation5 + $0xd0] ss:$8 sps:$4 sm:$0xff]  }
 0x527   :  { %2487 = vmatprep.subr.bf16.mxu1 %v8415_v50  ;;  %v8428_v50 = vld [vmem:[#allocation5 + $0xb0] ss:$8 sps:$4 sm:$0xff]  }
 0x52a   :  { %2488 = vmatpush1.bf16.msra.mxu1 %v8413_v8  ;;  %v8346_v8 = vld [vmem:[#allocation5 + $0x160] ss:$8 sps:$4 sm:$0xff]  }
 0x52b   :  { %2489 = vmatprep.subr.bf16.mxu1 %v8418_v53  ;;  %v8353_v53 = vld [vmem:[#allocation5 + $0x140] ss:$8 sps:$4 sm:$0xff]  }
 0x52e   :  { %2490 = vmatpush2.bf16.msra.mxu1 %v8416_v56  ;;  %v8367_v56 = vld [vmem:[#allocation5 + $0x104] ss:$8 sps:$4 sm:$0xff]  }
 0x5cd   :  { %v1821_v28 = vpop.f32.mrf.mxu1 }
 0x5ce   :  { %v1840_v30 = vadd.f32 %v1821_v28, %v1498_v27  ;;  %v8421_v28 = vld [vmem:[#allocation5 + $0xe4] ss:$8 sps:$4 sm:$0xff]  }
 0x5cf   :  { %v1823_v61 = vpop.f32.mrf.mxu1  ;;  %2491 = vmatprep.subr.bf16.mxu1 %v8421_v28  ;;  %v8373_v28 = vld [vmem:[#allocation5 + $0x1e4] ss:$8 sps:$4 sm:$0xff]  }
 0x5d0   :  { %v1841_v63 = vadd.f32 %v1823_v61, %v1500_v29  ;;  %v1860_v34 = vadd.f32 %v1853_v59, %v1840_v30  ;;  %v8419_v30 = vld [vmem:[#allocation5 + $0xe0] ss:$8 sps:$4 sm:$0xff]  }
 0x5d1   :  { %v1825_v1 = vpop.f32.mrf.mxu1  ;;  %2492 = vmatpush2.bf16.msra.mxu1 %v8419_v30  ;;  %v8377_v30 = vld [vmem:[#allocation5 + $0x1c0] ss:$8 sps:$4 sm:$0xff]  }
 0x5d2   :  { %v1842_v49 = vadd.f32 %v1825_v1, %v1502_v62  ;;  %v1861_v5 = vadd.f32 %v1857_v0, %v1841_v63  ;;  %v1868_v12 = vmax.f32 %v1860_v34, 0.0  ;;  %v8424_v63 = vld [vmem:[#allocation5 + $0xd4] ss:$8 sps:$4 sm:$0xff]   ;;  %v8427_v34 = vld [vmem:[#allocation5 + $0xc4] ss:$8 sps:$4 sm:$0xff]  }
 0x5d3   :  { %v1827_v35 = vpop.f32.mrf.mxu1  ;;  %2493 = vmatprep.subr.bf16.mxu1 %v8424_v63  ;;  %v8383_v63 = vld [vmem:[#allocation5 + $0x1a0] ss:$8 sps:$4 sm:$0xff]  }
 0x5d4   :  { %v1862_v6 = vadd.f32 %v1853_v59, %v1842_v49  ;;  %v1843_v7 = vadd.f32 %v1827_v35, %v1504_v3  ;;  %v1869_v20 = vmax.f32 %v1861_v5, 0.0  ;;  %v8340_v49 = vld [vmem:[%s10219_s2] sm:$0xff]  }
 0x5d5   :  { %v1831_v54 = vpop.f32.mrf.mxu1  ;;  %2494 = vmatpush2.bf16.msra.mxu1 %v8422_v2  ;;  %v8433_v35 = vld [vmem:[#allocation5 + $0xa4] ss:$8 sps:$4 sm:$0xff]   ;;  %v8431_v5 = vld [vmem:[#allocation5 + $0xa0] ss:$8 sps:$4 sm:$0xff]   ;;  %v8434_v2 = vld [vmem:[#allocation5 + $0x90] ss:$8 sps:$4 sm:$0xff]  }
 0x5d6   :  { %v1870_v13 = vmax.f32 %v1862_v6, 0.0  ;;  %v1863_v14 = vadd.f32 %v1857_v0, %v1843_v7  ;;  %v1844_v16 = vadd.f32 %v1831_v54, %v1508_v4  ;;  %2495 = vmatprep.subr.bf16.mxu1 %v8427_v34  ;;  %v8344_v4 = vld [vmem:[#allocation5 + $0x174] ss:$8 sps:$4 sm:$0xff]   ;;  %v8341_v6 = vld [vmem:[%s10219_s2 + $0x8] sm:$0xff]   ;;  %v8386_v34 = vld [vmem:[#allocation5 + $0x190] ss:$8 sps:$4 sm:$0xff]  }
 0x5d7   :  { %v1833_v17 = vpop.f32.mrf.mxu1  ;;  %v8345_v7 = vld [vmem:[%s10219_s2 + $0x10] sm:$0xff]   ;;  %v8348_v54 = vld [vmem:[#allocation5 + $0x164] ss:$8 sps:$4 sm:$0xff]  }
 0x5d8   :  { %v9922_v21 = vpack.c.bf16 %v1870_v13, %v1868_v12  ;;  %v1871_v55 = vmax.f32 %v1863_v14, 0.0  ;;  %v1845_v15 = vadd.f32 %v1833_v17, %v1510_v52  ;;  %v1864_v24 = vadd.f32 %v1853_v59, %v1844_v16  ;;  %v8342_v52 = vld [vmem:[#allocation5 + $0x170] ss:$8 sps:$4 sm:$0xff]   ;;  %v8351_v12 = vld [vmem:[#allocation5 + $0x154] ss:$8 sps:$4 sm:$0xff]  }
 0x5d9   :  { %v1835_v23 = vpop.f32.mrf.mxu1  ;;  %v8352_v13 = vld [vmem:[%s10219_s2 + $0x18] sm:$0xff]   ;;  %v8355_v16 = vld [vmem:[#allocation5 + $0x144] ss:$8 sps:$4 sm:$0xff]  }
 0x5da   :  { %v1846_v26 = vadd.f32 %v1835_v23, %v1512_v9  ;;  %v9925_v27 = vpack.c.bf16 %v1871_v55, %v1869_v20  ;;  %v1865_v29 = vadd.f32 %v1857_v0, %v1845_v15  ;;  %v1872_v60 = vmax.f32 %v1864_v24, 0.0  ;;  %v8349_v14 = vld [vmem:[#allocation5 + $0x150] ss:$8 sps:$4 sm:$0xff]   ;;  %v8358_v9 = vld [vmem:[#allocation5 + $0x134] ss:$8 sps:$4 sm:$0xff]  }
 0x5db   :  { %v1837_v47 = vpop.f32.mrf.mxu1  ;;  %v8356_v17 = vld [vmem:[#allocation5 + $0x130] ss:$8 sps:$4 sm:$0xff]   ;;  %v8361_v20 = vld [vmem:[#allocation5 + $0x124] ss:$8 sps:$4 sm:$0xff]   ;;  %v8359_v55 = vld [vmem:[#allocation5 + $0x120] ss:$8 sps:$4 sm:$0xff]  }
 0x5dc   :  { %v1866_v57 = vadd.f32 %v1853_v59, %v1846_v26  ;;  %v1847_v22 = vadd.f32 %v1837_v47, %v1514_v18  ;;  %v1873_v1 = vmax.f32 %v1865_v29, 0.0  ;;  %v8425_v59 = vld [vmem:[#allocation5 + $0xc0] ss:$8 sps:$4 sm:$0xff]   ;;  %v8364_v15 = vld [vmem:[#allocation5 + $0x114] ss:$8 sps:$4 sm:$0xff]  }
 0x5dd   :  { %2496 = vmatpush2.bf16.msra.mxu1 %v8425_v59  ;;  %v8362_v23 = vld [vmem:[#allocation5 + $0x110] ss:$8 sps:$4 sm:$0xff]   ;;  %v8365_v18 = vld [vmem:[#allocation5 + $0x100] ss:$8 sps:$4 sm:$0xff]   ;;  %v8370_v24 = vld [vmem:[#allocation5 + $0x1f4] ss:$8 sps:$4 sm:$0xff]  }
 0x5de   :  { %v1874_v61 = vmax.f32 %v1866_v57, 0.0  ;;  %v1867_v62 = vadd.f32 %v1857_v0, %v1847_v22  ;;  %v8430_v0 = vld [vmem:[#allocation5 + $0xb4] ss:$8 sps:$4 sm:$0xff]   ;;  %v8368_v26 = vld [vmem:[#allocation5 + $0x1f0] ss:$8 sps:$4 sm:$0xff]  }
 0x5df   :  { %2497 = vmatprep.subr.bf16.mxu1 %v8430_v0  ;;  %v8371_v47 = vld [vmem:[#allocation5 + $0x1e0] ss:$8 sps:$4 sm:$0xff]   ;;  %v8376_v29 = vld [vmem:[#allocation5 + $0x1d4] ss:$8 sps:$4 sm:$0xff]   ;;  %v8374_v57 = vld [vmem:[#allocation5 + $0x1d0] ss:$8 sps:$4 sm:$0xff]  }
 0x5e0   :  { %v9927_v58 = vpack.c.bf16 %v1874_v61, %v1872_v60  ;;  %v1875_v25 = vmax.f32 %v1867_v62, 0.0  ;;  %v8379_v22 = vld [vmem:[#allocation5 + $0x1c4] ss:$8 sps:$4 sm:$0xff]   ;;  %v8382_v60 = vld [vmem:[#allocation5 + $0x1b4] ss:$8 sps:$4 sm:$0xff]  }
 0x5e1   :  { %2498 = vmatpush2.bf16.msra.mxu1 %v8428_v50  ;;  %v8380_v61 = vld [vmem:[#allocation5 + $0x1b0] ss:$8 sps:$4 sm:$0xff]   ;;  %v8385_v62 = vld [vmem:[#allocation5 + $0x1a4] ss:$8 sps:$4 sm:$0xff]   ;;  %v8389_v50 = vld [vmem:[#allocation5 + $0x180] ss:$8 sps:$4 sm:$0xff]  }
 0x5e2   :  { %v9929_v3 = vpack.c.bf16 %v1875_v25, %v1873_v1  ;;  %2499 = vmatprep.subr.bf16.mxu1 %v8433_v35  ;;  %v8436_v1 = vld [vmem:[#allocation5 + $0x94] ss:$8 sps:$4 sm:$0xff]   ;;  %v8439_v59 = vld [vmem:[#allocation5 + $0x84] ss:$8 sps:$4 sm:$0xff]  }
 0x5e3   :  { %v8388_v25 = vld [vmem:[#allocation5 + $0x194] ss:$8 sps:$4 sm:$0xff]   ;;  %v8391_v0 = vld [vmem:[#allocation5 + $0x184] ss:$8 sps:$4 sm:$0xff]  }
 0x5e4   :  { %1912 = vmatprep.subr.bf16.mxu0 %v9929_v3 }
 0x5e5   :  { %1913 = vmatpush1.bf16.msra.mxu0 %v9927_v58  ;;  %2500 = vmatpush2.bf16.msra.mxu1 %v8431_v5 }
 0x5e6   :  { %1914 = vmatprep.subr.bf16.mxu0 %v9925_v27  ;;  %2501 = vmatprep.subr.bf16.mxu1 %v8436_v1  ;;  %v8457_v1 = vld [vmem:[#allocation5 + $0x220] ss:$8 sps:$4 sm:$0xff]  }
 0x5e9   :  { %1915 = vmatpush1.bf16.msra.mxu0 %v9922_v21  ;;  %2502 = vmatpush2.bf16.msra.mxu1 %v8434_v2  ;;  %v8460_v2 = vld [vmem:[#allocation5 + $0x210] ss:$8 sps:$4 sm:$0xff]  }
 0x5ea   :  { %2022 = vmatprep.subr.bf16.mxu0 %v9929_v3  ;;  %2503 = vmatprep.subr.bf16.mxu1 %v8439_v59  ;;  %v8463_v59 = vld [vmem:[#allocation5 + $0x200] ss:$8 sps:$4 sm:$0xff]  }
 0x5ec   :  { %7446 = vmatmul.mubr.msk.bf16.vlgmr.msra.gmra.mxu0 %vm340_vm0, %v8340_v49  ;;  %v8437_v49 = vld [vmem:[#allocation5 + $0x80] ss:$8 sps:$4 sm:$0xff]  }
 0x5ed   :  { %2023 = vmatpush1.bf16.msra.mxu0 %v9927_v58  ;;  %1942 = vmatprep.mubr.bf16.mxu0 %v9536_v19 }
 0x5ee   :  { %2024 = vmatprep.subr.bf16.mxu0 %v9925_v27  ;;  %2504 = vmatpush2.bf16.msra.mxu1 %v8437_v49  ;;  %v8466_v49 = vld [vmem:[#allocation5 + $0x2f0] ss:$8 sps:$4 sm:$0xff]  }
 0x5f1   :  { %2025 = vmatpush1.bf16.msra.mxu0 %v9922_v21 }
 0x5f2   :  { %2260 = vmatprep.subr.bf16.mxu0 %v8344_v4 }
 0x5f4   :  { %7447 = vmatmul.mubr.msk.bf16.gmra.mxu0 %vm340_vm0, %v8341_v6 }
 0x5f5   :  { %2042 = vmatprep.mubr.bf16.mxu0 %v9536_v19 }
 0x5fc   :  { %7454 = vmatmul.mubr.msk.bf16.vlgmr.msra.gmra.mxu0 %vm340_vm0, %v8345_v7 }
 0x5fd   :  { %2261 = vmatpush1.bf16.msra.mxu0 %v8342_v52  ;;  %2052 = vmatprep.mubr.bf16.mxu0 %v9536_v19 }
 0x5fe   :  { %2262 = vmatprep.subr.bf16.mxu0 %v8348_v54 }
 0x601   :  { %2263 = vmatpush1.bf16.msra.mxu0 %v8346_v8 }
 0x602   :  { %2264 = vmatprep.subr.bf16.mxu0 %v8351_v12 }
 0x604   :  { %7455 = vmatmul.mubr.msk.bf16.gmra.mxu0 %vm340_vm0, %v8352_v13 }
 0x605   :  { %2265 = vmatpush1.bf16.msra.mxu0 %v8349_v14 }
 0x606   :  { %2266 = vmatprep.subr.bf16.mxu0 %v8355_v16 }
 0x609   :  { %2267 = vmatpush1.bf16.msra.mxu0 %v8353_v53 }
 0x60a   :  { %2268 = vmatprep.subr.bf16.mxu0 %v8358_v9 }
 0x60d   :  { %2269 = vmatpush1.bf16.msra.mxu0 %v8356_v17 }
 0x60e   :  { %2270 = vmatprep.subr.bf16.mxu0 %v8361_v20 }
 0x611   :  { %2271 = vmatpush1.bf16.msra.mxu0 %v8359_v55 }
 0x612   :  { %2272 = vmatprep.subr.bf16.mxu0 %v8364_v15 }
 0x615   :  { %2273 = vmatpush1.bf16.msra.mxu0 %v8362_v23 }
 0x616   :  { %2274 = vmatprep.subr.bf16.mxu0 %v8367_v56 }
 0x619   :  { %2275 = vmatpush1.bf16.msra.mxu0 %v8365_v18  ;;  %v8444_v18 = vld [vmem:[#allocation5 + $0x274] ss:$8 sps:$4 sm:$0xff]  }
 0x61a   :  { %2276 = vmatprep.subr.bf16.mxu0 %v8370_v24 }
 0x61d   :  { %2277 = vmatpush2.bf16.msra.mxu0 %v8368_v26 }
 0x61e   :  { %2278 = vmatprep.subr.bf16.mxu0 %v8373_v28 }
 0x621   :  { %2279 = vmatpush2.bf16.msra.mxu0 %v8371_v47  ;;  %v8440_v47 = vld [vmem:[%s10219_s2 + $0x20] sm:$0xff]  }
 0x622   :  { %2280 = vmatprep.subr.bf16.mxu0 %v8376_v29  ;;  %v8442_v29 = vld [vmem:[#allocation5 + $0x270] ss:$8 sps:$4 sm:$0xff]  }
 0x625   :  { %2281 = vmatpush2.bf16.msra.mxu0 %v8374_v57  ;;  %v8447_v57 = vld [vmem:[#allocation5 + $0x264] ss:$8 sps:$4 sm:$0xff]  }
 0x626   :  { %2282 = vmatprep.subr.bf16.mxu0 %v8379_v22  ;;  %v8441_v22 = vld [vmem:[%s10219_s2 + $0x28] sm:$0xff]  }
 0x629   :  { %2283 = vmatpush2.bf16.msra.mxu0 %v8377_v30  ;;  %v8453_v30 = vld [vmem:[#allocation5 + $0x244] ss:$8 sps:$4 sm:$0xff]  }
 0x62a   :  { %2284 = vmatprep.subr.bf16.mxu0 %v8382_v60  ;;  %v8451_v60 = vld [vmem:[#allocation5 + $0x240] ss:$8 sps:$4 sm:$0xff]  }
 0x62d   :  { %2285 = vmatpush2.bf16.msra.mxu0 %v8380_v61  ;;  %v8456_v61 = vld [vmem:[#allocation5 + $0x234] ss:$8 sps:$4 sm:$0xff]  }
 0x62e   :  { %2286 = vmatprep.subr.bf16.mxu0 %v8385_v62  ;;  %v8454_v62 = vld [vmem:[#allocation5 + $0x230] ss:$8 sps:$4 sm:$0xff]  }
 0x631   :  { %2287 = vmatpush2.bf16.msra.mxu0 %v8383_v63  ;;  %v8459_v63 = vld [vmem:[#allocation5 + $0x224] ss:$8 sps:$4 sm:$0xff]  }
 0x632   :  { %2288 = vmatprep.subr.bf16.mxu0 %v8388_v25  ;;  %v8462_v25 = vld [vmem:[#allocation5 + $0x214] ss:$8 sps:$4 sm:$0xff]  }
 0x635   :  { %2289 = vmatpush2.bf16.msra.mxu0 %v8386_v34  ;;  %v8465_v34 = vld [vmem:[#allocation5 + $0x204] ss:$8 sps:$4 sm:$0xff]  }
 0x636   :  { %2290 = vmatprep.subr.bf16.mxu0 %v8391_v0  ;;  %v8468_v0 = vld [vmem:[#allocation5 + $0x2f4] ss:$8 sps:$4 sm:$0xff]  }
 0x639   :  { %2291 = vmatpush2.bf16.msra.mxu0 %v8389_v50  ;;  %v8471_v50 = vld [vmem:[#allocation5 + $0x2e4] ss:$8 sps:$4 sm:$0xff]  }
 0x63a   :  { %2559 = vmatprep.subr.bf16.mxu0 %v9929_v3 }
 0x6ac   :  { %v1934_v35 = vpop.f32.mrf.mxu0 }
 0x6ae   :  { %v1936_v4 = vpop.f32.mrf.mxu0 }
 0x6b0   :  { %v1938_v5 = vpop.f32.mrf.mxu0 }
 0x6b1   :  { %v1953_v52 = vpack.c.bf16 %v1938_v5, %v1934_v35  ;;  %v8469_v35 = vld [vmem:[#allocation5 + $0x2e0] ss:$8 sps:$4 sm:$0xff]   ;;  %v8472_v5 = vld [vmem:[#allocation5 + $0x2d0] ss:$8 sps:$4 sm:$0xff]  }
 0x6b2   :  { %v1940_v6 = vpop.f32.mrf.mxu0 }
 0x6b3   :  { %v1954_v7 = vpack.c.bf16 %v1940_v6, %v1936_v4  ;;  %v8474_v4 = vld [vmem:[#allocation5 + $0x2d4] ss:$8 sps:$4 sm:$0xff]   ;;  %v8477_v6 = vld [vmem:[#allocation5 + $0x2c4] ss:$8 sps:$4 sm:$0xff]  }
 0x6b4   :  { %v1944_v54 = vpop.f32.mrf.mxu0 }
 0x6b5   :  { %2505 = vmatprep.mubr.bf16.mxu1 %v1954_v7  ;;  %v8475_v7 = vld [vmem:[#allocation5 + $0x2c0] ss:$8 sps:$4 sm:$0xff]  }
 0x6b6   :  { %v1946_v8 = vpop.f32.mrf.mxu0  ;;  %2506 = vmatmul.mubr.bf16.vlgmr.msra.gmra.mxu1 %v1953_v52  ;;  %v8480_v52 = vld [vmem:[#allocation5 + $0x2b4] ss:$8 sps:$4 sm:$0xff]  }
 0x6b8   :  { %v1948_v12 = vpop.f32.mrf.mxu0 }
 0x6b9   :  { %v1955_v16 = vpack.c.bf16 %v1948_v12, %v1944_v54  ;;  %v8478_v54 = vld [vmem:[#allocation5 + $0x2b0] ss:$8 sps:$4 sm:$0xff]   ;;  %v8481_v12 = vld [vmem:[#allocation5 + $0x2a0] ss:$8 sps:$4 sm:$0xff]  }
 0x6ba   :  { %v1950_v13 = vpop.f32.mrf.mxu0 }
 0x6bb   :  { %v1956_v14 = vpack.c.bf16 %v1950_v13, %v1946_v8  ;;  %v8483_v8 = vld [vmem:[#allocation5 + $0x2a4] ss:$8 sps:$4 sm:$0xff]   ;;  %v8486_v13 = vld [vmem:[#allocation5 + $0x294] ss:$8 sps:$4 sm:$0xff]  }
 0x6bc   :  { %v2044_v53 = vpop.f32.mrf.mxu0 }
 0x6bd   :  { %2515 = vmatprep.mubr.bf16.mxu1 %v1956_v14  ;;  %v8484_v14 = vld [vmem:[#allocation5 + $0x290] ss:$8 sps:$4 sm:$0xff]  }
 0x6be   :  { %v2046_v9 = vpop.f32.mrf.mxu0  ;;  %2516 = vmatmul.mubr.bf16.gmra.mxu1 %v1955_v16  ;;  %v8489_v16 = vld [vmem:[#allocation5 + $0x284] ss:$8 sps:$4 sm:$0xff]  }
 0x6bf   :  { %2940 = vmatprep.mubr.bf16.mxu1 %v9536_v19 }
 0x6c0   :  { %v2048_v3 = vpop.f32.mrf.mxu0 }
 0x6c1   :  { %v2063_v55 = vpack.c.bf16 %v2048_v3, %v2044_v53  ;;  %v8487_v53 = vld [vmem:[#allocation5 + $0x280] ss:$8 sps:$4 sm:$0xff]  }
 0x6c2   :  { %v2050_v17 = vpop.f32.mrf.mxu0 }
 0x6c3   :  { %v2064_v20 = vpack.c.bf16 %v2050_v17, %v2046_v9  ;;  %v8492_v9 = vld [vmem:[#allocation8 + $0x74] ss:$8 sps:$4 sm:$0xff]  }
 0x6c4   :  { %v2054_v15 = vpop.f32.mrf.mxu0 }
 0x6c5   :  { %2292 = vmatprep.mubr.bf16.mxu0 %v2064_v20 }
 0x6c6   :  { %v2056_v23 = vpop.f32.mrf.mxu0  ;;  %2293 = vmatmul.mubr.bf16.vlgmr.msra.gmra.mxu0 %v2063_v55 }
 0x6c7   :  { %2560 = vmatpush1.bf16.msra.mxu0 %v9927_v58  ;;  %v8450_v58 = vld [vmem:[#allocation5 + $0x254] ss:$8 sps:$4 sm:$0xff]  }
 0x6c8   :  { %2561 = vmatprep.subr.bf16.mxu0 %v9925_v27  ;;  %v2058_v56 = vpop.f32.mrf.mxu0  ;;  %v8445_v27 = vld [vmem:[#allocation5 + $0x260] ss:$8 sps:$4 sm:$0xff]  }
 0x6c9   :  { %v2065_v28 = vpack.c.bf16 %v2058_v56, %v2054_v15 }
 0x6ca   :  { %v2060_v24 = vpop.f32.mrf.mxu0 }
 0x6cb   :  { %v2066_v26 = vpack.c.bf16 %v2060_v24, %v2056_v23  ;;  %2562 = vmatpush1.bf16.msra.mxu0 %v9922_v21  ;;  %v8448_v21 = vld [vmem:[#allocation5 + $0x250] ss:$8 sps:$4 sm:$0xff]  }
 0x6cc   :  { %2797 = vmatprep.subr.bf16.mxu0 %v8444_v18 }
 0x6cd   :  { %2302 = vmatprep.mubr.bf16.mxu0 %v2066_v26 }
 0x6ce   :  { %2303 = vmatmul.mubr.bf16.gmra.mxu0 %v2065_v28 }
 0x6cf   :  { %2579 = vmatprep.mubr.bf16.mxu0 %v9536_v19 }
 0x6d6   :  { %7526 = vmatmul.mubr.msk.bf16.vlgmr.msra.gmra.mxu0 %vm340_vm0, %v8440_v47 }
 0x6d7   :  { %2589 = vmatprep.mubr.bf16.mxu0 %v9536_v19  ;;  %2798 = vmatpush1.bf16.msra.mxu0 %v8442_v29 }
 0x6d8   :  { %2799 = vmatprep.subr.bf16.mxu0 %v8447_v57  ;;  %v8490_v57 = vld [vmem:[#allocation8 + $0x70] ss:$8 sps:$4 sm:$0xff]  }
 0x6db   :  { %2800 = vmatpush1.bf16.msra.mxu0 %v8445_v27 }
 0x6dc   :  { %2801 = vmatprep.subr.bf16.mxu0 %v8450_v58 }
 0x6de   :  { %7527 = vmatmul.mubr.msk.bf16.gmra.mxu0 %vm340_vm0, %v8441_v22  ;;  %v8495_v22 = vld [vmem:[#allocation8 + $0x64] ss:$8 sps:$4 sm:$0xff]  }
 0x6df   :  { %2802 = vmatpush1.bf16.msra.mxu0 %v8448_v21 }
 0x6e0   :  { %2803 = vmatprep.subr.bf16.mxu0 %v8453_v30  ;;  %v8493_v30 = vld [vmem:[#allocation8 + $0x60] ss:$8 sps:$4 sm:$0xff]  }
 0x6e3   :  { %2804 = vmatpush1.bf16.msra.mxu0 %v8451_v60 }
 0x6e4   :  { %2805 = vmatprep.subr.bf16.mxu0 %v8456_v61  ;;  %v8498_v61 = vld [vmem:[#allocation8 + $0x54] ss:$8 sps:$4 sm:$0xff]  }
 0x6e7   :  { %2806 = vmatpush1.bf16.msra.mxu0 %v8454_v62 }
 0x6e8   :  { %2807 = vmatprep.subr.bf16.mxu0 %v8459_v63 }
 0x6eb   :  { %2808 = vmatpush1.bf16.msra.mxu0 %v8457_v1  ;;  %v8496_v1 = vld [vmem:[#allocation8 + $0x50] ss:$8 sps:$4 sm:$0xff]  }
 0x6ec   :  { %2809 = vmatprep.subr.bf16.mxu0 %v8462_v25 }
 0x6ef   :  { %2810 = vmatpush1.bf16.msra.mxu0 %v8460_v2  ;;  %v8501_v2 = vld [vmem:[#allocation8 + $0x44] ss:$8 sps:$4 sm:$0xff]  }
 0x6f0   :  { %2811 = vmatprep.subr.bf16.mxu0 %v8465_v34  ;;  %v8499_v34 = vld [vmem:[#allocation8 + $0x40] ss:$8 sps:$4 sm:$0xff]  }
 0x6f3   :  { %2812 = vmatpush1.bf16.msra.mxu0 %v8463_v59  ;;  %v8504_v59 = vld [vmem:[#allocation8 + $0x34] ss:$8 sps:$4 sm:$0xff]  }
 0x6f4   :  { %2813 = vmatprep.subr.bf16.mxu0 %v8468_v0  ;;  %v8502_v0 = vld [vmem:[#allocation8 + $0x30] ss:$8 sps:$4 sm:$0xff]  }
 0x6f7   :  { %2814 = vmatpush2.bf16.msra.mxu0 %v8466_v49  ;;  %v8507_v49 = vld [vmem:[#allocation8 + $0x24] ss:$8 sps:$4 sm:$0xff]  }
 0x6f8   :  { %2815 = vmatprep.subr.bf16.mxu0 %v8471_v50  ;;  %v8505_v50 = vld [vmem:[#allocation8 + $0x20] ss:$8 sps:$4 sm:$0xff]  }
 0x6fb   :  { %2816 = vmatpush2.bf16.msra.mxu0 %v8469_v35  ;;  %v8510_v35 = vld [vmem:[#allocation8 + $0x14] ss:$8 sps:$4 sm:$0xff]  }
 0x6fc   :  { %2817 = vmatprep.subr.bf16.mxu0 %v8474_v4  ;;  %v8508_v4 = vld [vmem:[#allocation8 + $0x10] ss:$8 sps:$4 sm:$0xff]  }
 0x6ff   :  { %2818 = vmatpush2.bf16.msra.mxu0 %v8472_v5  ;;  %v8513_v5 = vld [vmem:[#allocation8 + $0x4] ss:$8 sps:$4 sm:$0xff]  }
 0x700   :  { %2819 = vmatprep.subr.bf16.mxu0 %v8477_v6  ;;  %v8511_v6 = vld [vmem:[#allocation8] ss:$8 sps:$4 sm:$0xff]  }
 0x703   :  { %2820 = vmatpush2.bf16.msra.mxu0 %v8475_v7  ;;  %v8516_v7 = vld [vmem:[#allocation8 + $0xf4] ss:$8 sps:$4 sm:$0xff]  }
 0x704   :  { %2821 = vmatprep.subr.bf16.mxu0 %v8480_v52  ;;  %v8514_v52 = vld [vmem:[#allocation8 + $0xf0] ss:$8 sps:$4 sm:$0xff]  }
 0x707   :  { %2822 = vmatpush2.bf16.msra.mxu0 %v8478_v54  ;;  %v8519_v54 = vld [vmem:[#allocation8 + $0xe4] ss:$8 sps:$4 sm:$0xff]  }
 0x708   :  { %2823 = vmatprep.subr.bf16.mxu0 %v8483_v8  ;;  %v8517_v8 = vld [vmem:[#allocation8 + $0xe0] ss:$8 sps:$4 sm:$0xff]  }
 0x70b   :  { %2824 = vmatpush2.bf16.msra.mxu0 %v8481_v12  ;;  %v8522_v12 = vld [vmem:[#allocation8 + $0xd4] ss:$8 sps:$4 sm:$0xff]  }
 0x70c   :  { %2825 = vmatprep.subr.bf16.mxu0 %v8486_v13  ;;  %v8520_v13 = vld [vmem:[#allocation8 + $0xd0] ss:$8 sps:$4 sm:$0xff]  }
 0x70f   :  { %2826 = vmatpush2.bf16.msra.mxu0 %v8484_v14  ;;  %v8525_v14 = vld [vmem:[#allocation8 + $0xc4] ss:$8 sps:$4 sm:$0xff]  }
 0x710   :  { %2827 = vmatprep.subr.bf16.mxu0 %v8489_v16  ;;  %v8523_v16 = vld [vmem:[#allocation8 + $0xc0] ss:$8 sps:$4 sm:$0xff]  }
 0x713   :  { %2828 = vmatpush2.bf16.msra.mxu0 %v8487_v53  ;;  %v8528_v53 = vld [vmem:[#allocation8 + $0xb4] ss:$8 sps:$4 sm:$0xff]  }
 0x714   :  { %3437 = vmatprep.subr.bf16.mxu0 %v8492_v9  ;;  %v8526_v9 = vld [vmem:[#allocation8 + $0xb0] ss:$8 sps:$4 sm:$0xff]  }
 0x786   :  { %v9961_v3 = vpop.f32.mrf.mxu0 }
 0x788   :  { %v9963_v17 = vpop.f32.mrf.mxu0 }
 0x78a   :  { %v9965_v20 = vpop.f32.mrf.mxu0 }
 0x78c   :  { %v9967_v55 = vpop.f32.mrf.mxu0 }
 0x78e   :  { %v9969_v15 = vpop.f32.mrf.mxu0 }
 0x790   :  { %v9971_v23 = vpop.f32.mrf.mxu0 }
 0x792   :  { %v9973_v56 = vpop.f32.mrf.mxu0 }
 0x794   :  { %v9975_v18 = vpop.f32.mrf.mxu0 }
 0x796   :  { %v2581_v24 = vpop.f32.mrf.mxu0 }
 0x798   :  { %v2583_v26 = vpop.f32.mrf.mxu0 }
 0x79a   :  { %v2585_v28 = vpop.f32.mrf.mxu0 }
 0x79b   :  { %v2600_v27 = vpack.c.bf16 %v2585_v28, %v2581_v24  ;;  %v8531_v24 = vld [vmem:[#allocation8 + $0xa4] ss:$8 sps:$4 sm:$0xff]   ;;  %v8534_v28 = vld [vmem:[#allocation8 + $0x94] ss:$8 sps:$4 sm:$0xff]  }
 0x79c   :  { %v2587_v47 = vpop.f32.mrf.mxu0 }
 0x79d   :  { %v2601_v29 = vpack.c.bf16 %v2587_v47, %v2583_v26  ;;  %v8529_v26 = vld [vmem:[#allocation8 + $0xa0] ss:$8 sps:$4 sm:$0xff]   ;;  %v8532_v47 = vld [vmem:[#allocation8 + $0x90] ss:$8 sps:$4 sm:$0xff]  }
 0x79e   :  { %v2591_v58 = vpop.f32.mrf.mxu0 }
 0x79f   :  { %2829 = vmatprep.mubr.bf16.mxu0 %v2601_v29  ;;  %v8537_v29 = vld [vmem:[#allocation8 + $0x84] ss:$8 sps:$4 sm:$0xff]  }
 0x7a0   :  { %v2593_v21 = vpop.f32.mrf.mxu0  ;;  %2830 = vmatmul.mubr.bf16.vlgmr.msra.gmra.mxu0 %v2600_v27  ;;  %v2507_v27 = vpop.f32.mrf.mxu1 }
 0x7a1   :  { %3438 = vmatpush1.bf16.msra.mxu0 %v8490_v57  ;;  %v8535_v57 = vld [vmem:[#allocation8 + $0x80] ss:$8 sps:$4 sm:$0xff]  }
 0x7a2   :  { %v2595_v60 = vpop.f32.mrf.mxu0  ;;  %3439 = vmatprep.subr.bf16.mxu0 %v8495_v22 }
 0x7a3   :  { %v2602_v25 = vpack.c.bf16 %v2595_v60, %v2591_v58  ;;  %v2509_v58 = vpop.f32.mrf.mxu1 }
 0x7a4   :  { %v2597_v62 = vpop.f32.mrf.mxu0 }
 0x7a5   :  { %v2603_v63 = vpack.c.bf16 %v2597_v62, %v2593_v21  ;;  %3440 = vmatpush1.bf16.msra.mxu0 %v8493_v30  ;;  %v2511_v22 = vpop.f32.mrf.mxu1  ;;  %v2858_v30 = vld [vmem:[%s10220_s11] sm:$0x3] }
 0x7a6   :  { %3441 = vmatprep.subr.bf16.mxu0 %v8498_v61  ;;  %v2508_v61 = vadd.f32 %v2507_v27, %v9961_v3  ;;  %v2863_v62 = vrot.slane %v2858_v30, %v9821_v10 }
 0x7a7   :  { %2839 = vmatprep.mubr.bf16.mxu0 %v2603_v63  ;;  %v2513_v21 = vpop.f32.mrf.mxu1 }
 0x7a8   :  { %2840 = vmatmul.mubr.bf16.gmra.mxu0 %v2602_v25 }
 0x7a9   :  { %3442 = vmatpush1.bf16.msra.mxu0 %v8496_v1  ;;  %v2517_v60 = vpop.f32.mrf.mxu1  ;;  %v2510_v1 = vadd.f32 %v2509_v58, %v9963_v17 }
 0x7aa   :  { %3443 = vmatprep.subr.bf16.mxu0 %v8501_v2  ;;  %v2867_v2 = vrot.slane %v2858_v30, %v9823_v11 }
 0x7ad   :  { %3444 = vmatpush1.bf16.msra.mxu0 %v8499_v34 }
 0x7ae   :  { %3445 = vmatprep.subr.bf16.mxu0 %v8504_v59  ;;  %v2519_v59 = vpop.f32.mrf.mxu1 }
 0x7b1   :  { %3446 = vmatpush1.bf16.msra.mxu0 %v8502_v0  ;;  %v2512_v0 = vadd.f32 %v2511_v22, %v9965_v20 }
 0x7b2   :  { %3447 = vmatprep.subr.bf16.mxu0 %v8507_v49 }
 0x7b5   :  { %3448 = vmatpush1.bf16.msra.mxu0 %v8505_v50 }
 0x7b6   :  { %3449 = vmatprep.subr.bf16.mxu0 %v8510_v35 }
 0x7b9   :  { %3450 = vmatpush1.bf16.msra.mxu0 %v8508_v4  ;;  %v2514_v4 = vadd.f32 %v2513_v21, %v9967_v55 }
 0x7ba   :  { %3451 = vmatprep.subr.bf16.mxu0 %v8513_v5 }
 0x7bd   :  { %3452 = vmatpush1.bf16.msra.mxu0 %v8511_v6 }
 0x7be   :  { %3453 = vmatprep.subr.bf16.mxu0 %v8516_v7  ;;  %v2521_v7 = vpop.f32.mrf.mxu1 }
 0x7c1   :  { %3454 = vmatpush2.bf16.msra.mxu0 %v8514_v52  ;;  %v2518_v52 = vadd.f32 %v2517_v60, %v9969_v15 }
 0x7c2   :  { %3455 = vmatprep.subr.bf16.mxu0 %v8519_v54 }
 0x7c5   :  { %3456 = vmatpush2.bf16.msra.mxu0 %v8517_v8 }
 0x7c6   :  { %3457 = vmatprep.subr.bf16.mxu0 %v8522_v12  ;;  %v2520_v12 = vadd.f32 %v2519_v59, %v9971_v23  ;;  %v8552_v59 = vld [vmem:[#allocation8 + $0x130] ss:$8 sps:$4 sm:$0xff]  }
 0x7c9   :  { %3458 = vmatpush2.bf16.msra.mxu0 %v8520_v13 }
 0x7ca   :  { %3459 = vmatprep.subr.bf16.mxu0 %v8525_v14 }
 0x7cd   :  { %3460 = vmatpush2.bf16.msra.mxu0 %v8523_v16 }
 0x7ce   :  { %3461 = vmatprep.subr.bf16.mxu0 %v8528_v53 }
 0x7d1   :  { %3462 = vmatpush2.bf16.msra.mxu0 %v8526_v9  ;;  %v2523_v9 = vpop.f32.mrf.mxu1 }
 0x7d2   :  { %3463 = vmatprep.subr.bf16.mxu0 %v8531_v24  ;;  %v2524_v23 = vadd.f32 %v2523_v9, %v9975_v18  ;;  %v8587_v9 = vld [vmem:[#allocation8 + $0x184] ss:$8 sps:$4 sm:$0xff]  }
 0x7d5   :  { %3464 = vmatpush2.bf16.msra.mxu0 %v8529_v26  ;;  %v2522_v26 = vadd.f32 %v2521_v7, %v9973_v56  ;;  %v8569_v7 = vld [vmem:[#allocation8 + $0x1e4] ss:$8 sps:$4 sm:$0xff]  }
 0x7d6   :  { %3465 = vmatprep.subr.bf16.mxu0 %v8534_v28 }
 0x7d9   :  { %3466 = vmatpush2.bf16.msra.mxu0 %v8532_v47 }
 0x7da   :  { %3467 = vmatprep.subr.bf16.mxu0 %v8537_v29 }
 0x7dd   :  { %3468 = vmatpush2.bf16.msra.mxu0 %v8535_v57 }
 0x860   :  { %v2831_v63 = vpop.f32.mrf.mxu0 }
 0x861   :  { %v2850_v25 = vadd.f32 %v2831_v63, %v2508_v61 }
 0x862   :  { %v2833_v34 = vpop.f32.mrf.mxu0 }
 0x863   :  { %v2870_v49 = vadd.f32 %v2863_v62, %v2850_v25  ;;  %v2851_v50 = vadd.f32 %v2833_v34, %v2510_v1  ;;  %v8554_v34 = vld [vmem:[#allocation8 + $0x134] ss:$8 sps:$4 sm:$0xff]  }
 0x864   :  { %v2835_v35 = vpop.f32.mrf.mxu0 }
 0x865   :  { %v2871_v5 = vadd.f32 %v2867_v2, %v2851_v50  ;;  %v2852_v6 = vadd.f32 %v2835_v35, %v2512_v0  ;;  %v2878_v17 = vadd.f32 %v2870_v49, %v858_v51  ;;  %v8557_v0 = vld [vmem:[#allocation8 + $0x124] ss:$8 sps:$4 sm:$0xff]   ;;  %v8555_v49 = vld [vmem:[#allocation8 + $0x120] ss:$8 sps:$4 sm:$0xff]   ;;  %v8560_v50 = vld [vmem:[#allocation8 + $0x114] ss:$8 sps:$4 sm:$0xff]  }
 0x866   :  { %v2837_v3 = vpop.f32.mrf.mxu0  ;;  %v8558_v35 = vld [vmem:[#allocation8 + $0x110] ss:$8 sps:$4 sm:$0xff]  }
 0x867   :  { %v2872_v54 = vadd.f32 %v2863_v62, %v2852_v6  ;;  %v2853_v8 = vadd.f32 %v2837_v3, %v2514_v4  ;;  %v2879_v20 = vadd.f32 %v2871_v5, %v859_v46  ;;  %v2886_v24 = vmax.f32 %v2878_v17, 0.0  ;;  %v8563_v4 = vld [vmem:[#allocation8 + $0x104] ss:$8 sps:$4 sm:$0xff]   ;;  %v8561_v5 = vld [vmem:[#allocation8 + $0x100] ss:$8 sps:$4 sm:$0xff]  }
 0x868   :  { %v2841_v13 = vpop.f32.mrf.mxu0  ;;  %v8566_v6 = vld [vmem:[#allocation8 + $0x1f4] ss:$8 sps:$4 sm:$0xff]   ;;  %v8564_v3 = vld [vmem:[#allocation8 + $0x1f0] ss:$8 sps:$4 sm:$0xff]  }
 0x869   :  { %v2880_v55 = vadd.f32 %v2872_v54, %v860_v48  ;;  %v2873_v14 = vadd.f32 %v2867_v2, %v2853_v8  ;;  %v2854_v16 = vadd.f32 %v2841_v13, %v2518_v52  ;;  %v2887_v46 = vmax.f32 %v2879_v20, 0.0  ;;  %v8567_v52 = vld [vmem:[#allocation8 + $0x1e0] ss:$8 sps:$4 sm:$0xff]   ;;  %v8572_v17 = vld [vmem:[#allocation8 + $0x1d4] ss:$8 sps:$4 sm:$0xff]  }
 0x86a   :  { %v2843_v53 = vpop.f32.mrf.mxu0  ;;  %v8570_v54 = vld [vmem:[#allocation8 + $0x1d0] ss:$8 sps:$4 sm:$0xff]   ;;  %v8575_v8 = vld [vmem:[#allocation8 + $0x1c4] ss:$8 sps:$4 sm:$0xff]   ;;  %v8578_v13 = vld [vmem:[#allocation8 + $0x1b4] ss:$8 sps:$4 sm:$0xff]  }
 0x86b   :  { %v2888_v15 = vmax.f32 %v2880_v55, 0.0  ;;  %v2881_v44 = vadd.f32 %v2873_v14, %v861_v41  ;;  %v2855_v51 = vadd.f32 %v2843_v53, %v2520_v12  ;;  %v2874_v28 = vadd.f32 %v2863_v62, %v2854_v16  ;;  %v8573_v12 = vld [vmem:[#allocation8 + $0x1c0] ss:$8 sps:$4 sm:$0xff]   ;;  %v8576_v20 = vld [vmem:[#allocation8 + $0x1b0] ss:$8 sps:$4 sm:$0xff]  }
 0x86c   :  { %v2845_v37 = vpop.f32.mrf.mxu0  ;;  %v8581_v55 = vld [vmem:[#allocation8 + $0x1a4] ss:$8 sps:$4 sm:$0xff]   ;;  %v8579_v14 = vld [vmem:[#allocation8 + $0x1a0] ss:$8 sps:$4 sm:$0xff]   ;;  %v8584_v16 = vld [vmem:[#allocation8 + $0x194] ss:$8 sps:$4 sm:$0xff]  }
 0x86d   :  { %v9996_v47 = vpack.c.bf16 %v2888_v15, %v2886_v24  ;;  %v2889_v39 = vmax.f32 %v2881_v44, 0.0  ;;  %v2875_v48 = vadd.f32 %v2867_v2, %v2855_v51  ;;  %v2856_v29 = vadd.f32 %v2845_v37, %v2522_v26  ;;  %v8582_v53 = vld [vmem:[#allocation8 + $0x190] ss:$8 sps:$4 sm:$0xff]   ;;  %v8585_v24 = vld [vmem:[#allocation8 + $0x180] ss:$8 sps:$4 sm:$0xff]  }
 0x86e   :  { %v2847_v57 = vpop.f32.mrf.mxu0  ;;  %v2882_v31 = vadd.f32 %v2874_v28, %v862_v45  ;;  %v8546_v45 = vld [vmem:[#allocation8 + $0x150] ss:$8 sps:$4 sm:$0xff]  }
 0x86f   :  { %v9998_v27 = vpack.c.bf16 %v2889_v39, %v2887_v46  ;;  %v2857_v58 = vadd.f32 %v2847_v57, %v2524_v23  ;;  %v2876_v41 = vadd.f32 %v2863_v62, %v2856_v29  ;;  %v2883_v56 = vadd.f32 %v2875_v48, %v863_v42  ;;  %v8543_v42 = vld [vmem:[#allocation8 + $0x160] ss:$8 sps:$4 sm:$0xff]   ;;  %v8551_v62 = vld [vmem:[#allocation8 + $0x144] ss:$8 sps:$4 sm:$0xff]  }
 0x870   :  { %v2890_v30 = vmax.f32 %v2882_v31, 0.0  ;;  %v8588_v31 = vld [vmem:[#allocation7 + $0x10] sm:$0xff]  }
 0x871   :  { %v2877_v18 = vadd.f32 %v2867_v2, %v2857_v58  ;;  %v2884_v22 = vadd.f32 %v2876_v41, %v864_v40  ;;  %v2891_v61 = vmax.f32 %v2883_v56, 0.0  ;;  %v8545_v40 = vld [vmem:[#allocation8 + $0x164] ss:$8 sps:$4 sm:$0xff]   ;;  %v8549_v2 = vld [vmem:[#allocation8 + $0x140] ss:$8 sps:$4 sm:$0xff]  }
 0x872   :  { %v8591_v58 = vld [vmem:[#allocation8 + $0x274] ss:$8 sps:$4 sm:$0xff]   ;;  %v8589_v41 = vld [vmem:[#allocation8 + $0x270] ss:$8 sps:$4 sm:$0xff]   ;;  %v8594_v56 = vld [vmem:[#allocation8 + $0x264] ss:$8 sps:$4 sm:$0xff]  }
 0x873   :  { %v2885_v21 = vadd.f32 %v2877_v18, %v865_v43  ;;  %v2892_v60 = vmax.f32 %v2884_v22, 0.0  ;;  %v8548_v43 = vld [vmem:[#allocation8 + $0x154] ss:$8 sps:$4 sm:$0xff]   ;;  %v8592_v18 = vld [vmem:[#allocation8 + $0x260] ss:$8 sps:$4 sm:$0xff]  }
 0x874   :  { %v8597_v22 = vld [vmem:[#allocation8 + $0x254] ss:$8 sps:$4 sm:$0xff]  }
 0x875   :  { %v2893_v63 = vmax.f32 %v2885_v21, 0.0  ;;  %v10008_v1 = vpack.c.bf16 %v2892_v60, %v2890_v30  ;;  %v8595_v21 = vld [vmem:[#allocation8 + $0x250] ss:$8 sps:$4 sm:$0xff]   ;;  %v8600_v30 = vld [vmem:[#allocation8 + $0x244] ss:$8 sps:$4 sm:$0xff]  }
 0x876   :  { %v8598_v60 = vld [vmem:[#allocation8 + $0x240] ss:$8 sps:$4 sm:$0xff]  }
 0x877   :  { %v10010_v25 = vpack.c.bf16 %v2893_v63, %v2891_v61  ;;  %v8601_v61 = vld [vmem:[#allocation8 + $0x230] ss:$8 sps:$4 sm:$0xff]   ;;  %v8604_v63 = vld [vmem:[#allocation8 + $0x220] ss:$8 sps:$4 sm:$0xff]  }
 0x879   :  { %2920 = vmatprep.subr.bf16.mxu1 %v10010_v25  ;;  %3818 = vmatprep.subr.bf16.mxu0 %v10010_v25 }
 0x87a   :  { %2921 = vmatpush1.bf16.msra.mxu1 %v10008_v1 }
 0x87b   :  { %2922 = vmatprep.subr.bf16.mxu1 %v9998_v27 }
 0x87e   :  { %2923 = vmatpush1.bf16.msra.mxu1 %v9996_v47 }
 0x87f   :  { %3008 = vmatprep.subr.bf16.mxu1 %v10010_v25 }
 0x881   :  { %7561 = vmatmul.mubr.msk.bf16.vlgmr.msra.gmra.mxu1 %vm340_vm0, %v8538_v32  ;;  %v8612_v32 = vld [vmem:[#allocation8 + $0x204] ss:$8 sps:$4 sm:$0xff]  }
 0x882   :  { %3009 = vmatpush1.bf16.msra.mxu1 %v10008_v1  ;;  %3028 = vmatprep.mubr.bf16.mxu1 %v9536_v19 }
 0x883   :  { %3010 = vmatprep.subr.bf16.mxu1 %v9998_v27 }
 0x886   :  { %3011 = vmatpush1.bf16.msra.mxu1 %v9996_v47 }
 0x887   :  { %3234 = vmatprep.subr.bf16.mxu1 %v8542_v33  ;;  %v8610_v33 = vld [vmem:[#allocation8 + $0x200] ss:$8 sps:$4 sm:$0xff]  }
 0x889   :  { %7563 = vmatmul.mubr.msk.bf16.vlgmr.msra.gmra.mxu1 %vm340_vm0, %v8539_v36  ;;  %v8615_v36 = vld [vmem:[#allocation8 + $0x2f4] ss:$8 sps:$4 sm:$0xff]  }
 0x88a   :  { %3235 = vmatpush1.bf16.msra.mxu1 %v8540_v38  ;;  %v8613_v38 = vld [vmem:[#allocation8 + $0x2f0] ss:$8 sps:$4 sm:$0xff]  }
 0x88b   :  { %3236 = vmatprep.subr.bf16.mxu1 %v8545_v40  ;;  %v8618_v40 = vld [vmem:[#allocation8 + $0x2e4] ss:$8 sps:$4 sm:$0xff]  }
 0x88e   :  { %3237 = vmatpush1.bf16.msra.mxu1 %v8543_v42  ;;  %v8616_v42 = vld [vmem:[#allocation8 + $0x2e0] ss:$8 sps:$4 sm:$0xff]  }
 0x88f   :  { %3238 = vmatprep.subr.bf16.mxu1 %v8548_v43  ;;  %v8621_v43 = vld [vmem:[#allocation8 + $0x2d4] ss:$8 sps:$4 sm:$0xff]  }
 0x892   :  { %3239 = vmatpush1.bf16.msra.mxu1 %v8546_v45  ;;  %v8619_v45 = vld [vmem:[#allocation8 + $0x2d0] ss:$8 sps:$4 sm:$0xff]  }
 0x893   :  { %3240 = vmatprep.subr.bf16.mxu1 %v8551_v62  ;;  %v8624_v62 = vld [vmem:[#allocation8 + $0x2c4] ss:$8 sps:$4 sm:$0xff]  }
 0x896   :  { %3241 = vmatpush1.bf16.msra.mxu1 %v8549_v2  ;;  %v8622_v2 = vld [vmem:[#allocation8 + $0x2c0] ss:$8 sps:$4 sm:$0xff]  }
 0x897   :  { %3242 = vmatprep.subr.bf16.mxu1 %v8554_v34  ;;  %v8627_v34 = vld [vmem:[#allocation8 + $0x2b4] ss:$8 sps:$4 sm:$0xff]  }
 0x89a   :  { %3243 = vmatpush1.bf16.msra.mxu1 %v8552_v59  ;;  %v8625_v59 = vld [vmem:[#allocation8 + $0x2b0] ss:$8 sps:$4 sm:$0xff]  }
 0x89b   :  { %3244 = vmatprep.subr.bf16.mxu1 %v8557_v0  ;;  %v8630_v0 = vld [vmem:[#allocation8 + $0x2a4] ss:$8 sps:$4 sm:$0xff]  }
 0x89e   :  { %3245 = vmatpush1.bf16.msra.mxu1 %v8555_v49  ;;  %v8628_v49 = vld [vmem:[#allocation8 + $0x2a0] ss:$8 sps:$4 sm:$0xff]  }
 0x89f   :  { %3246 = vmatprep.subr.bf16.mxu1 %v8560_v50  ;;  %v8633_v50 = vld [vmem:[#allocation8 + $0x294] ss:$8 sps:$4 sm:$0xff]  }
 0x8a2   :  { %3247 = vmatpush1.bf16.msra.mxu1 %v8558_v35  ;;  %v8631_v35 = vld [vmem:[#allocation8 + $0x290] ss:$8 sps:$4 sm:$0xff]  }
 0x8a3   :  { %3248 = vmatprep.subr.bf16.mxu1 %v8563_v4  ;;  %v8636_v4 = vld [vmem:[#allocation8 + $0x284] ss:$8 sps:$4 sm:$0xff]  }
 0x8a6   :  { %3249 = vmatpush1.bf16.msra.mxu1 %v8561_v5  ;;  %v8634_v5 = vld [vmem:[#allocation8 + $0x280] ss:$8 sps:$4 sm:$0xff]  }
 0x8a7   :  { %3250 = vmatprep.subr.bf16.mxu1 %v8566_v6  ;;  %v8637_v6 = vld [vmem:[#allocation10] sm:$0xff]  }
 0x8aa   :  { %3251 = vmatpush2.bf16.msra.mxu1 %v8564_v3 }
 0x8ab   :  { %3252 = vmatprep.subr.bf16.mxu1 %v8569_v7 }
 0x8ae   :  { %3253 = vmatpush2.bf16.msra.mxu1 %v8567_v52 }
 0x8af   :  { %3254 = vmatprep.subr.bf16.mxu1 %v8572_v17 }
 0x8b2   :  { %3255 = vmatpush2.bf16.msra.mxu1 %v8570_v54 }
 0x8b3   :  { %3256 = vmatprep.subr.bf16.mxu1 %v8575_v8 }
 0x8b6   :  { %3257 = vmatpush2.bf16.msra.mxu1 %v8573_v12 }
 0x8b7   :  { %3258 = vmatprep.subr.bf16.mxu1 %v8578_v13 }
 0x8ba   :  { %3259 = vmatpush2.bf16.msra.mxu1 %v8576_v20 }
 0x8bb   :  { %3260 = vmatprep.subr.bf16.mxu1 %v8581_v55 }
 0x8be   :  { %3261 = vmatpush2.bf16.msra.mxu1 %v8579_v14 }
 0x8bf   :  { %3262 = vmatprep.subr.bf16.mxu1 %v8584_v16 }
 0x8c2   :  { %3263 = vmatpush2.bf16.msra.mxu1 %v8582_v53 }
 0x8c3   :  { %3264 = vmatprep.subr.bf16.mxu1 %v8587_v9 }
 0x8c6   :  { %3265 = vmatpush2.bf16.msra.mxu1 %v8585_v24  ;;  %v8688_v24 = vld [vmem:[%s10221_s15 + $0x70] ss:$8 sps:$4 sm:$0xff]  }
 0x8c7   :  { %3503 = vmatprep.subr.bf16.mxu1 %v10010_v25  ;;  %v8607_v25 = vld [vmem:[#allocation8 + $0x210] ss:$8 sps:$4 sm:$0xff]  }
 0x941   :  { %v2942_v15 = vpop.f32.mrf.mxu1 }
 0x943   :  { %v2944_v44 = vpop.f32.mrf.mxu1 }
 0x945   :  { %v2946_v51 = vpop.f32.mrf.mxu1 }
 0x946   :  { %v2951_v28 = vpack.c.bf16 %v2946_v51, %v2942_v15  ;;  %v8690_v15 = vld [vmem:[%s10221_s15 + $0x74] ss:$8 sps:$4 sm:$0xff]   ;;  %v8693_v51 = vld [vmem:[%s10221_s15 + $0x64] ss:$8 sps:$4 sm:$0xff]  }
 0x947   :  { %v2948_v26 = vpop.f32.mrf.mxu1 }
 0x948   :  { %v2952_v23 = vpack.c.bf16 %v2948_v26, %v2944_v44 }
 0x949   :  { %v3030_v37 = vpop.f32.mrf.mxu1 }
 0x94a   :  { %3469 = vmatprep.mubr.bf16.mxu0 %v2952_v23  ;;  %v8691_v23 = vld [vmem:[%s10221_s15 + $0x60] ss:$8 sps:$4 sm:$0xff]  }
 0x94b   :  { %v3032_v46 = vpop.f32.mrf.mxu1  ;;  %3470 = vmatmul.mubr.bf16.vlgmr.msra.gmra.mxu0 %v2951_v28  ;;  %v8696_v28 = vld [vmem:[%s10221_s15 + $0x54] ss:$8 sps:$4 sm:$0xff]  }
 0x94c   :  { %3819 = vmatpush1.bf16.msra.mxu0 %v10008_v1  ;;  %3838 = vmatprep.mubr.bf16.mxu0 %v9536_v19 }
 0x94d   :  { %3820 = vmatprep.subr.bf16.mxu0 %v9998_v27  ;;  %v3034_v39 = vpop.f32.mrf.mxu1 }
 0x94e   :  { %v3039_v57 = vpack.c.bf16 %v3034_v39, %v3030_v37  ;;  %v8694_v39 = vld [vmem:[%s10221_s15 + $0x50] ss:$8 sps:$4 sm:$0xff]  }
 0x94f   :  { %v3036_v48 = vpop.f32.mrf.mxu1 }
 0x950   :  { %v3040_v29 = vpack.c.bf16 %v3036_v48, %v3032_v46  ;;  %3821 = vmatpush1.bf16.msra.mxu0 %v9996_v47 }
 0x951   :  { %4055 = vmatprep.subr.bf16.mxu0 %v8690_v15  ;;  %v8735_v15 = vld [vmem:[%s10221_s15 + $0x84] ss:$8 sps:$4 sm:$0xff]  }
 0x952   :  { %3266 = vmatprep.mubr.bf16.mxu1 %v3040_v29  ;;  %v8699_v29 = vld [vmem:[%s10221_s15 + $0x44] ss:$8 sps:$4 sm:$0xff]  }
 0x953   :  { %3267 = vmatmul.mubr.bf16.vlgmr.msra.gmra.mxu1 %v3039_v57  ;;  %7663 = vmatmul.mubr.msk.bf16.vlgmr.msra.gmra.mxu0 %vm340_vm0, %v8637_v6  ;;  %v8697_v57 = vld [vmem:[%s10221_s15 + $0x40] ss:$8 sps:$4 sm:$0xff]  }
 0x954   :  { %3504 = vmatpush1.bf16.msra.mxu1 %v10008_v1  ;;  %3523 = vmatprep.mubr.bf16.mxu1 %v9536_v19  ;;  %v8609_v1 = vld [vmem:[#allocation8 + $0x214] ss:$8 sps:$4 sm:$0xff]  }
 0x955   :  { %3505 = vmatprep.subr.bf16.mxu1 %v9998_v27  ;;  %v8603_v27 = vld [vmem:[#allocation8 + $0x234] ss:$8 sps:$4 sm:$0xff]   ;;  %4056 = vmatpush1.bf16.msra.mxu0 %v8688_v24  ;;  %v8730_v24 = vld [vmem:[%s10221_s15 + $0x90] ss:$8 sps:$4 sm:$0xff]  }
 0x956   :  { %4057 = vmatprep.subr.bf16.mxu0 %v8693_v51  ;;  %v8733_v51 = vld [vmem:[%s10221_s15 + $0x80] ss:$8 sps:$4 sm:$0xff]  }
 0x958   :  { %3506 = vmatpush1.bf16.msra.mxu1 %v9996_v47  ;;  %v8606_v47 = vld [vmem:[#allocation8 + $0x224] ss:$8 sps:$4 sm:$0xff]  }
 0x959   :  { %3729 = vmatprep.subr.bf16.mxu1 %v8591_v58  ;;  %4058 = vmatpush1.bf16.msra.mxu0 %v8691_v23  ;;  %v8702_v58 = vld [vmem:[%s10221_s15 + $0x34] ss:$8 sps:$4 sm:$0xff]   ;;  %v8642_v23 = vld [vmem:[#allocation11 + $0x8] sm:$0xff]  }
 0x95a   :  { %4059 = vmatprep.subr.bf16.mxu0 %v8696_v28  ;;  %v8639_v28 = vld [vmem:[#allocation13 + $0x170] ss:$8 sps:$4 sm:$0xff]  }
 0x95b   :  { %7629 = vmatmul.mubr.msk.bf16.vlgmr.msra.gmra.mxu1 %vm340_vm0, %v8588_v31  ;;  %v8700_v31 = vld [vmem:[%s10221_s15 + $0x30] ss:$8 sps:$4 sm:$0xff]  }
 0x95c   :  { %3730 = vmatpush1.bf16.msra.mxu1 %v8589_v41  ;;  %v8705_v41 = vld [vmem:[%s10221_s15 + $0x24] ss:$8 sps:$4 sm:$0xff]  }
 0x95d   :  { %3731 = vmatprep.subr.bf16.mxu1 %v8594_v56  ;;  %4060 = vmatpush1.bf16.msra.mxu0 %v8694_v39  ;;  %v8703_v56 = vld [vmem:[%s10221_s15 + $0x20] ss:$8 sps:$4 sm:$0xff]   ;;  %v8645_v39 = vld [vmem:[#allocation13 + $0x164] ss:$8 sps:$4 sm:$0xff]  }
 0x95e   :  { %4061 = vmatprep.subr.bf16.mxu0 %v8699_v29  ;;  %v8741_v29 = vld [vmem:[#allocation13 + $0x64] ss:$8 sps:$4 sm:$0xff]  }
 0x960   :  { %3732 = vmatpush1.bf16.msra.mxu1 %v8592_v18  ;;  %v8708_v18 = vld [vmem:[%s10221_s15 + $0x14] ss:$8 sps:$4 sm:$0xff]  }
 0x961   :  { %3733 = vmatprep.subr.bf16.mxu1 %v8597_v22  ;;  %4062 = vmatpush1.bf16.msra.mxu0 %v8697_v57  ;;  %v8706_v22 = vld [vmem:[%s10221_s15 + $0x10] ss:$8 sps:$4 sm:$0xff]  }
 0x962   :  { %4063 = vmatprep.subr.bf16.mxu0 %v8702_v58  ;;  %v8643_v57 = vld [vmem:[#allocation13 + $0x160] ss:$8 sps:$4 sm:$0xff]   ;;  %v8648_v58 = vld [vmem:[#allocation13 + $0x154] ss:$8 sps:$4 sm:$0xff]  }
 0x964   :  { %3734 = vmatpush1.bf16.msra.mxu1 %v8595_v21  ;;  %v8711_v21 = vld [vmem:[%s10221_s15 + $0x4] ss:$8 sps:$4 sm:$0xff]  }
 0x965   :  { %3735 = vmatprep.subr.bf16.mxu1 %v8600_v30  ;;  %4064 = vmatpush1.bf16.msra.mxu0 %v8700_v31  ;;  %v8709_v30 = vld [vmem:[%s10221_s15] ss:$8 sps:$4 sm:$0xff]  }
 0x966   :  { %4065 = vmatprep.subr.bf16.mxu0 %v8705_v41  ;;  %v8739_v31 = vld [vmem:[#allocation13 + $0x60] ss:$8 sps:$4 sm:$0xff]   ;;  %v8744_v41 = vld [vmem:[#allocation13 + $0x54] ss:$8 sps:$4 sm:$0xff]  }
 0x968   :  { %3736 = vmatpush1.bf16.msra.mxu1 %v8598_v60  ;;  %v8714_v60 = vld [vmem:[%s10221_s15 + $0xf4] ss:$8 sps:$4 sm:$0xff]  }
 0x969   :  { %3737 = vmatprep.subr.bf16.mxu1 %v8603_v27  ;;  %4066 = vmatpush1.bf16.msra.mxu0 %v8703_v56  ;;  %v8712_v27 = vld [vmem:[%s10221_s15 + $0xf0] ss:$8 sps:$4 sm:$0xff]  }
 0x96a   :  { %4067 = vmatprep.subr.bf16.mxu0 %v8708_v18  ;;  %v8646_v56 = vld [vmem:[#allocation13 + $0x150] ss:$8 sps:$4 sm:$0xff]   ;;  %v8747_v18 = vld [vmem:[#allocation13 + $0x44] ss:$8 sps:$4 sm:$0xff]  }
 0x96c   :  { %3738 = vmatpush1.bf16.msra.mxu1 %v8601_v61  ;;  %v8717_v61 = vld [vmem:[%s10221_s15 + $0xe4] ss:$8 sps:$4 sm:$0xff]  }
 0x96d   :  { %3739 = vmatprep.subr.bf16.mxu1 %v8606_v47  ;;  %4068 = vmatpush1.bf16.msra.mxu0 %v8706_v22  ;;  %v8715_v47 = vld [vmem:[%s10221_s15 + $0xe0] ss:$8 sps:$4 sm:$0xff]  }
 0x96e   :  { %4069 = vmatprep.subr.bf16.mxu0 %v8711_v21  ;;  %v8649_v22 = vld [vmem:[#allocation13 + $0x140] ss:$8 sps:$4 sm:$0xff]   ;;  %v8654_v21 = vld [vmem:[#allocation13 + $0x134] ss:$8 sps:$4 sm:$0xff]  }
 0x970   :  { %3740 = vmatpush1.bf16.msra.mxu1 %v8604_v63  ;;  %v8720_v63 = vld [vmem:[%s10221_s15 + $0xd4] ss:$8 sps:$4 sm:$0xff]  }
 0x971   :  { %3741 = vmatprep.subr.bf16.mxu1 %v8609_v1  ;;  %4070 = vmatpush1.bf16.msra.mxu0 %v8709_v30  ;;  %v3776_v1 = vld [vmem:[%s10222_s16] sm:$0x3] }
 0x972   :  { %4071 = vmatprep.subr.bf16.mxu0 %v8714_v60  ;;  %v8745_v30 = vld [vmem:[#allocation13 + $0x40] ss:$8 sps:$4 sm:$0xff]   ;;  %v8750_v60 = vld [vmem:[#allocation13 + $0x34] ss:$8 sps:$4 sm:$0xff]  }
 0x974   :  { %3742 = vmatpush1.bf16.msra.mxu1 %v8607_v25 }
 0x975   :  { %3743 = vmatprep.subr.bf16.mxu1 %v8612_v32  ;;  %4072 = vmatpush2.bf16.msra.mxu0 %v8712_v27  ;;  %v8652_v27 = vld [vmem:[#allocation13 + $0x130] ss:$8 sps:$4 sm:$0xff]  }
 0x976   :  { %4073 = vmatprep.subr.bf16.mxu0 %v8717_v61  ;;  %v8657_v61 = vld [vmem:[#allocation13 + $0x124] ss:$8 sps:$4 sm:$0xff]  }
 0x978   :  { %3744 = vmatpush1.bf16.msra.mxu1 %v8610_v33  ;;  %v8718_v33 = vld [vmem:[%s10221_s15 + $0xd0] ss:$8 sps:$4 sm:$0xff]  }
 0x979   :  { %3745 = vmatprep.subr.bf16.mxu1 %v8615_v36  ;;  %4074 = vmatpush2.bf16.msra.mxu0 %v8715_v47  ;;  %v8748_v47 = vld [vmem:[#allocation13 + $0x30] ss:$8 sps:$4 sm:$0xff]  }
 0x97a   :  { %4075 = vmatprep.subr.bf16.mxu0 %v8720_v63  ;;  %v8753_v63 = vld [vmem:[#allocation13 + $0x24] ss:$8 sps:$4 sm:$0xff]  }
 0x97c   :  { %3746 = vmatpush2.bf16.msra.mxu1 %v8613_v38 }
 0x97d   :  { %3747 = vmatprep.subr.bf16.mxu1 %v8618_v40  ;;  %v3781_v40 = vrot.slane %v3776_v1, %v9821_v10  ;;  %4076 = vmatpush2.bf16.msra.mxu0 %v8718_v33  ;;  %v8756_v33 = vld [vmem:[#allocation13 + $0x14] ss:$8 sps:$4 sm:$0xff]  }
 0x980   :  { %3748 = vmatpush2.bf16.msra.mxu1 %v8616_v42  ;;  %v8723_v42 = vld [vmem:[%s10221_s15 + $0xc4] ss:$8 sps:$4 sm:$0xff]  }
 0x981   :  { %3749 = vmatprep.subr.bf16.mxu1 %v8621_v43  ;;  %4077 = vmatprep.subr.bf16.mxu0 %v8723_v42  ;;  %v8759_v42 = vld [vmem:[#allocation13 + $0x4] ss:$8 sps:$4 sm:$0xff]  }
 0x984   :  { %3750 = vmatpush2.bf16.msra.mxu1 %v8619_v45 }
 0x985   :  { %3751 = vmatprep.subr.bf16.mxu1 %v8624_v62 }
 0x988   :  { %3752 = vmatpush2.bf16.msra.mxu1 %v8622_v2  ;;  %v3785_v2 = vrot.slane %v3776_v1, %v9823_v11  ;;  %v8655_v1 = vld [vmem:[#allocation13 + $0x120] ss:$8 sps:$4 sm:$0xff]  }
 0x989   :  { %3753 = vmatprep.subr.bf16.mxu1 %v8627_v34 }
 0x98c   :  { %3754 = vmatpush2.bf16.msra.mxu1 %v8625_v59  ;;  %v8721_v59 = vld [vmem:[%s10221_s15 + $0xc0] ss:$8 sps:$4 sm:$0xff]  }
 0x98d   :  { %3755 = vmatprep.subr.bf16.mxu1 %v8630_v0  ;;  %4078 = vmatpush2.bf16.msra.mxu0 %v8721_v59  ;;  %v8669_v59 = vld [vmem:[#allocation13 + $0x1e4] ss:$8 sps:$4 sm:$0xff]  }
 0x990   :  { %3756 = vmatpush2.bf16.msra.mxu1 %v8628_v49 }
 0x991   :  { %3757 = vmatprep.subr.bf16.mxu1 %v8633_v50 }
 0x994   :  { %3758 = vmatpush2.bf16.msra.mxu1 %v8631_v35  ;;  %v8726_v35 = vld [vmem:[%s10221_s15 + $0xb4] ss:$8 sps:$4 sm:$0xff]  }
 0x995   :  { %3759 = vmatprep.subr.bf16.mxu1 %v8636_v4  ;;  %4079 = vmatprep.subr.bf16.mxu0 %v8726_v35  ;;  %v8672_v35 = vld [vmem:[#allocation13 + $0x1d4] ss:$8 sps:$4 sm:$0xff]  }
 0x998   :  { %3760 = vmatpush2.bf16.msra.mxu1 %v8634_v5 }
 0xa0b   :  { %v3471_v14 = vpop.f32.mrf.mxu0 }
 0xa0d   :  { %v3473_v16 = vpop.f32.mrf.mxu0 }
 0xa0f   :  { %v3475_v53 = vpop.f32.mrf.mxu0 }
 0xa11   :  { %v10044_v9 = vpop.f32.mrf.mxu0 }
 0xa13   :  { %v10035_v3 = vpop.f32.mrf.mxu1  ;;  %v10048_v44 = vpop.f32.mrf.mxu0 }
 0xa14   :  { %v3472_v25 = vadd.f32 %v3471_v14, %v10035_v3 }
 0xa15   :  { %v10037_v7 = vpop.f32.mrf.mxu1  ;;  %v3842_v26 = vpop.f32.mrf.mxu0 }
 0xa16   :  { %v3474_v36 = vadd.f32 %v3473_v16, %v10037_v7  ;;  %v8724_v7 = vld [vmem:[%s10221_s15 + $0xb0] ss:$8 sps:$4 sm:$0xff]   ;;  %v8732_v16 = vld [vmem:[%s10221_s15 + $0x94] ss:$8 sps:$4 sm:$0xff]  }
 0xa17   :  { %v10039_v52 = vpop.f32.mrf.mxu1  ;;  %v10053_v37 = vpop.f32.mrf.mxu0  ;;  %4080 = vmatpush2.bf16.msra.mxu0 %v8724_v7  ;;  %v8766_v7 = vld [vmem:[#allocation13 + $0xd0] ss:$8 sps:$4 sm:$0xff]  }
 0xa18   :  { %v3476_v45 = vadd.f32 %v3475_v53, %v10039_v52  ;;  %v8638_v53 = vld [vmem:[#allocation11] sm:$0xff]  }
 0xa19   :  { %v10041_v17 = vpop.f32.mrf.mxu1  ;;  %v3846_v46 = vpop.f32.mrf.mxu0 }
 0xa1a   :  { %v3850_v48 = vpack.c.bf16 %v3846_v46, %v3842_v26  ;;  %v3478_v0 = vadd.f32 %v10044_v9, %v10041_v17  ;;  %v8641_v9 = vld [vmem:[#allocation13 + $0x174] ss:$8 sps:$4 sm:$0xff]   ;;  %v3849_v46 = vpack.c.bf16 %v10053_v37, %v10048_v44  ;;  %v8651_v44 = vld [vmem:[#allocation13 + $0x144] ss:$8 sps:$4 sm:$0xff]   ;;  %v8742_v37 = vld [vmem:[#allocation13 + $0x50] ss:$8 sps:$4 sm:$0xff]  }
 0xa1b   :  { %v3525_v54 = vpop.f32.mrf.mxu1  ;;  %v8738_v26 = vld [vmem:[#allocation13 + $0x74] ss:$8 sps:$4 sm:$0xff]  }
 0xa1c   :  { %4087 = vmatprep.mubr.bf16.mxu0 %v3850_v48  ;;  %v8736_v48 = vld [vmem:[#allocation13 + $0x70] ss:$8 sps:$4 sm:$0xff]  }
 0xa1d   :  { %v3527_v8 = vpop.f32.mrf.mxu1 }
 0xa1f   :  { %v3529_v12 = vpop.f32.mrf.mxu1 }
 0xa20   :  { %v3534_v55 = vpack.c.bf16 %v3529_v12, %v3525_v54  ;;  %v8729_v12 = vld [vmem:[%s10221_s15 + $0xa4] ss:$8 sps:$4 sm:$0xff]  }
 0xa21   :  { %v3531_v13 = vpop.f32.mrf.mxu1  ;;  %4081 = vmatprep.subr.bf16.mxu0 %v8729_v12  ;;  %v8769_v12 = vld [vmem:[#allocation13 + $0xc0] ss:$8 sps:$4 sm:$0xff]  }
 0xa22   :  { %v3535_v20 = vpack.c.bf16 %v3531_v13, %v3527_v8 }
 0xa24   :  { %3761 = vmatprep.mubr.bf16.mxu1 %v3535_v20 }
 0xa25   :  { %3762 = vmatmul.mubr.bf16.vlgmr.msra.gmra.mxu1 %v3534_v55  ;;  %v8727_v55 = vld [vmem:[%s10221_s15 + $0xa0] ss:$8 sps:$4 sm:$0xff]  }
 0xa26   :  { %4143 = vmatprep.mubr.bf16.mxu1 %v9536_v19  ;;  %4082 = vmatpush2.bf16.msra.mxu0 %v8727_v55  ;;  %v8681_v55 = vld [vmem:[#allocation13 + $0x1a4] ss:$8 sps:$4 sm:$0xff]  }
 0xa27   :  { %4083 = vmatprep.subr.bf16.mxu0 %v8732_v16  ;;  %v8772_v16 = vld [vmem:[#allocation13 + $0xb0] ss:$8 sps:$4 sm:$0xff]  }
 0xa2a   :  { %4084 = vmatpush2.bf16.msra.mxu0 %v8730_v24  ;;  %v8684_v24 = vld [vmem:[#allocation13 + $0x194] ss:$8 sps:$4 sm:$0xff]  }
 0xa2b   :  { %4085 = vmatprep.subr.bf16.mxu0 %v8735_v15  ;;  %v8775_v15 = vld [vmem:[#allocation13 + $0xa0] ss:$8 sps:$4 sm:$0xff]  }
 0xa2e   :  { %4086 = vmatpush2.bf16.msra.mxu0 %v8733_v51  ;;  %v8682_v51 = vld [vmem:[#allocation13 + $0x190] ss:$8 sps:$4 sm:$0xff]  }
 0xa2f   :  { %4640 = vmatprep.subr.bf16.mxu0 %v8738_v26  ;;  %v8687_v26 = vld [vmem:[#allocation13 + $0x184] ss:$8 sps:$4 sm:$0xff]  }
 0xa31   :  { %4088 = vmatmul.mubr.bf16.vlgmr.msra.gmra.mxu0 %v3849_v46  ;;  %v8778_v46 = vld [vmem:[#allocation13 + $0x90] ss:$8 sps:$4 sm:$0xff]  }
 0xa32   :  { %4641 = vmatpush1.bf16.msra.mxu0 %v8736_v48  ;;  %v8781_v48 = vld [vmem:[#allocation13 + $0x80] ss:$8 sps:$4 sm:$0xff]  }
 0xa33   :  { %4642 = vmatprep.subr.bf16.mxu0 %v8741_v29 }
 0xa36   :  { %4643 = vmatpush1.bf16.msra.mxu0 %v8739_v31 }
 0xa37   :  { %4644 = vmatprep.subr.bf16.mxu0 %v8744_v41 }
 0xa3a   :  { %4645 = vmatpush1.bf16.msra.mxu0 %v8742_v37 }
 0xa3b   :  { %4646 = vmatprep.subr.bf16.mxu0 %v8747_v18 }
 0xa3e   :  { %4647 = vmatpush1.bf16.msra.mxu0 %v8745_v30 }
 0xa3f   :  { %4648 = vmatprep.subr.bf16.mxu0 %v8750_v60  ;;  %v8784_v60 = vld [vmem:[#allocation11 + $0x10] sm:$0xff]  }
 0xa42   :  { %4649 = vmatpush1.bf16.msra.mxu0 %v8748_v47  ;;  %v8788_v47 = vld [vmem:[#allocation13 + $0x260] ss:$8 sps:$4 sm:$0xff]  }
 0xa43   :  { %4650 = vmatprep.subr.bf16.mxu0 %v8753_v63  ;;  %v8793_v63 = vld [vmem:[#allocation13 + $0x254] ss:$8 sps:$4 sm:$0xff]  }
 0xae5   :  { %v3763_v32 = vpop.f32.mrf.mxu1 }
 0xae6   :  { %v3772_v38 = vadd.f32 %v3763_v32, %v3472_v25  ;;  %v8660_v25 = vld [vmem:[#allocation13 + $0x114] ss:$8 sps:$4 sm:$0xff]   ;;  %v8751_v32 = vld [vmem:[#allocation13 + $0x20] ss:$8 sps:$4 sm:$0xff]  }
 0xae7   :  { %v3765_v43 = vpop.f32.mrf.mxu1  ;;  %4651 = vmatpush1.bf16.msra.mxu0 %v8751_v32  ;;  %v8794_v32 = vld [vmem:[#allocation13 + $0x240] ss:$8 sps:$4 sm:$0xff]  }
 0xae8   :  { %v3773_v62 = vadd.f32 %v3765_v43, %v3474_v36  ;;  %v3788_v49 = vadd.f32 %v3781_v40, %v3772_v38  ;;  %v8658_v36 = vld [vmem:[#allocation13 + $0x110] ss:$8 sps:$4 sm:$0xff]   ;;  %v8663_v38 = vld [vmem:[#allocation13 + $0x104] ss:$8 sps:$4 sm:$0xff]   ;;  %4652 = vmatprep.subr.bf16.mxu0 %v8756_v33  ;;  %v8661_v43 = vld [vmem:[#allocation13 + $0x100] ss:$8 sps:$4 sm:$0xff]  }
 0xae9   :  { %v3767_v34 = vpop.f32.mrf.mxu1  ;;  %v8797_v33 = vld [vmem:[#allocation13 + $0x230] ss:$8 sps:$4 sm:$0xff]  }
 0xaea   :  { %v3774_v50 = vadd.f32 %v3767_v34, %v3476_v45  ;;  %v3789_v5 = vadd.f32 %v3785_v2, %v3773_v62  ;;  %v3792_v52 = vmax.f32 %v3788_v49, 0.0  ;;  %v8666_v45 = vld [vmem:[#allocation13 + $0x1f4] ss:$8 sps:$4 sm:$0xff]   ;;  %v8757_v62 = vld [vmem:[#allocation13] ss:$8 sps:$4 sm:$0xff]  }
 0xaeb   :  { %v3769_v4 = vpop.f32.mrf.mxu1  ;;  %v8664_v34 = vld [vmem:[#allocation13 + $0x1f0] ss:$8 sps:$4 sm:$0xff]   ;;  %v8765_v49 = vld [vmem:[#allocation13 + $0xe4] ss:$8 sps:$4 sm:$0xff]  }
 0xaec   :  { %v3790_v6 = vadd.f32 %v3781_v40, %v3774_v50  ;;  %v3775_v3 = vadd.f32 %v3769_v4, %v3478_v0  ;;  %v3793_v13 = vmax.f32 %v3789_v5, 0.0  ;;  %v8754_v40 = vld [vmem:[#allocation13 + $0x10] ss:$8 sps:$4 sm:$0xff]   ;;  %v8667_v50 = vld [vmem:[#allocation13 + $0x1e0] ss:$8 sps:$4 sm:$0xff]  }
 0xaed   :  { %4653 = vmatpush1.bf16.msra.mxu0 %v8754_v40  ;;  %v8760_v0 = vld [vmem:[#allocation13 + $0xf0] ss:$8 sps:$4 sm:$0xff]   ;;  %v8763_v4 = vld [vmem:[#allocation13 + $0xe0] ss:$8 sps:$4 sm:$0xff]   ;;  %v8768_v5 = vld [vmem:[#allocation13 + $0xd4] ss:$8 sps:$4 sm:$0xff]  }
 0xaee   :  { %v3794_v54 = vmax.f32 %v3790_v6, 0.0  ;;  %v3791_v8 = vadd.f32 %v3785_v2, %v3775_v3  ;;  %4654 = vmatprep.subr.bf16.mxu0 %v8759_v42  ;;  %v8762_v2 = vld [vmem:[#allocation13 + $0xf4] ss:$8 sps:$4 sm:$0xff]   ;;  %v8670_v6 = vld [vmem:[#allocation13 + $0x1d0] ss:$8 sps:$4 sm:$0xff]  }
 0xaef   :  { %v8675_v3 = vld [vmem:[#allocation13 + $0x1c4] ss:$8 sps:$4 sm:$0xff]   ;;  %v8805_v40 = vld [vmem:[#allocation13 + $0x214] ss:$8 sps:$4 sm:$0xff]   ;;  %v8803_v42 = vld [vmem:[#allocation13 + $0x210] ss:$8 sps:$4 sm:$0xff]  }
 0xaf0   :  { %v10085_v17 = vpack.c.bf16 %v3794_v54, %v3792_v52  ;;  %v3795_v20 = vmax.f32 %v3791_v8, 0.0  ;;  %v8771_v52 = vld [vmem:[#allocation13 + $0xc4] ss:$8 sps:$4 sm:$0xff]   ;;  %v8673_v54 = vld [vmem:[#allocation13 + $0x1c0] ss:$8 sps:$4 sm:$0xff]  }
 0xaf1   :  { %4655 = vmatpush1.bf16.msra.mxu0 %v8757_v62  ;;  %v8678_v8 = vld [vmem:[#allocation13 + $0x1b4] ss:$8 sps:$4 sm:$0xff]  }
 0xaf2   :  { %v10088_v14 = vpack.c.bf16 %v3795_v20, %v3793_v13  ;;  %4656 = vmatprep.subr.bf16.mxu0 %v8762_v2  ;;  %v8774_v13 = vld [vmem:[#allocation13 + $0xb4] ss:$8 sps:$4 sm:$0xff]   ;;  %v8676_v20 = vld [vmem:[#allocation13 + $0x1b0] ss:$8 sps:$4 sm:$0xff]  }
 0xaf3   :  { %v8811_v62 = vld [vmem:[#allocation13 + $0x2f4] ss:$8 sps:$4 sm:$0xff]   ;;  %v8809_v2 = vld [vmem:[#allocation13 + $0x2f0] ss:$8 sps:$4 sm:$0xff]  }
 0xaf4   :  { %4125 = vmatprep.subr.bf16.mxu1 %v10088_v14 }
 0xaf5   :  { %4126 = vmatpush1.bf16.msra.mxu1 %v10085_v17  ;;  %4657 = vmatpush2.bf16.msra.mxu0 %v8760_v0  ;;  %v8817_v0 = vld [vmem:[#allocation13 + $0x2d4] ss:$8 sps:$4 sm:$0xff]  }
 0xaf6   :  { %4213 = vmatprep.subr.bf16.mxu1 %v10088_v14  ;;  %4658 = vmatprep.subr.bf16.mxu0 %v8765_v49  ;;  %v8815_v49 = vld [vmem:[#allocation13 + $0x2d0] ss:$8 sps:$4 sm:$0xff]  }
 0xaf8   :  { %7697 = vmatmul.mubr.msk.bf16.vlgmr.msra.gmra.mxu1 %vm4107_vm2, %v8638_v53  ;;  %v8777_v53 = vld [vmem:[#allocation13 + $0xa4] ss:$8 sps:$4 sm:$0xff]  }
 0xaf9   :  { %4214 = vmatpush1.bf16.msra.mxu1 %v10085_v17  ;;  %4231 = vmatprep.mubr.bf16.mxu1 %v9536_v19 }
 0xafa   :  { %4437 = vmatprep.subr.bf16.mxu1 %v8641_v9  ;;  %4659 = vmatpush2.bf16.msra.mxu0 %v8763_v4  ;;  %v8679_v9 = vld [vmem:[#allocation13 + $0x1a0] ss:$8 sps:$4 sm:$0xff]   ;;  %v8823_v4 = vld [vmem:[#allocation13 + $0x2b4] ss:$8 sps:$4 sm:$0xff]  }
 0xafb   :  { %4660 = vmatprep.subr.bf16.mxu0 %v8768_v5  ;;  %v8821_v5 = vld [vmem:[#allocation13 + $0x2b0] ss:$8 sps:$4 sm:$0xff]  }
 0xafe   :  { %4661 = vmatpush2.bf16.msra.mxu0 %v8766_v7  ;;  %v8829_v7 = vld [vmem:[#allocation13 + $0x294] ss:$8 sps:$4 sm:$0xff]  }
 0xaff   :  { %4662 = vmatprep.subr.bf16.mxu0 %v8771_v52  ;;  %v8827_v52 = vld [vmem:[#allocation13 + $0x290] ss:$8 sps:$4 sm:$0xff]  }
 0xb00   :  { %7699 = vmatmul.mubr.msk.bf16.vlgmr.msra.gmra.mxu1 %vm4107_vm2, %v8642_v23  ;;  %v8685_v23 = vld [vmem:[#allocation13 + $0x180] ss:$8 sps:$4 sm:$0xff]  }
 0xb01   :  { %4438 = vmatpush1.bf16.msra.mxu1 %v8639_v28  ;;  %v8780_v28 = vld [vmem:[#allocation13 + $0x94] ss:$8 sps:$4 sm:$0xff]  }
 0xb02   :  { %4439 = vmatprep.subr.bf16.mxu1 %v8645_v39  ;;  %4663 = vmatpush2.bf16.msra.mxu0 %v8769_v12  ;;  %v8783_v39 = vld [vmem:[#allocation13 + $0x84] ss:$8 sps:$4 sm:$0xff]   ;;  %v8835_v12 = vld [vmem:[#allocation16 + $0x74] ss:$8 sps:$4 sm:$0xff]  }
 0xb03   :  { %4664 = vmatprep.subr.bf16.mxu0 %v8774_v13 }
 0xb05   :  { %4440 = vmatpush1.bf16.msra.mxu1 %v8643_v57 }
 0xb06   :  { %4441 = vmatprep.subr.bf16.mxu1 %v8648_v58  ;;  %4665 = vmatpush2.bf16.msra.mxu0 %v8772_v16 }
 0xb07   :  { %4666 = vmatprep.subr.bf16.mxu0 %v8777_v53 }
 0xb09   :  { %4442 = vmatpush1.bf16.msra.mxu1 %v8646_v56 }
 0xb0a   :  { %4443 = vmatprep.subr.bf16.mxu1 %v8651_v44  ;;  %4667 = vmatpush2.bf16.msra.mxu0 %v8775_v15 }
 0xb0b   :  { %4668 = vmatprep.subr.bf16.mxu0 %v8780_v28  ;;  %v8838_v28 = vld [vmem:[#allocation16 + $0x64] ss:$8 sps:$4 sm:$0xff]  }
 0xb0d   :  { %4444 = vmatpush1.bf16.msra.mxu1 %v8649_v22 }
 0xb0e   :  { %4445 = vmatprep.subr.bf16.mxu1 %v8654_v21  ;;  %4669 = vmatpush2.bf16.msra.mxu0 %v8778_v46  ;;  %v8836_v46 = vld [vmem:[#allocation16 + $0x60] ss:$8 sps:$4 sm:$0xff]  }
 0xb0f   :  { %4670 = vmatprep.subr.bf16.mxu0 %v8783_v39  ;;  %v8841_v39 = vld [vmem:[#allocation16 + $0x54] ss:$8 sps:$4 sm:$0xff]  }
 0xb11   :  { %4446 = vmatpush1.bf16.msra.mxu1 %v8652_v27  ;;  %v8785_v27 = vld [vmem:[#allocation13 + $0x270] ss:$8 sps:$4 sm:$0xff]  }
 0xb12   :  { %4447 = vmatprep.subr.bf16.mxu1 %v8657_v61  ;;  %4671 = vmatpush2.bf16.msra.mxu0 %v8781_v48  ;;  %v8790_v61 = vld [vmem:[#allocation13 + $0x264] ss:$8 sps:$4 sm:$0xff]  }
 0xb13   :  { %v8839_v48 = vld [vmem:[#allocation16 + $0x50] ss:$8 sps:$4 sm:$0xff]  }
 0xb15   :  { %4448 = vmatpush1.bf16.msra.mxu1 %v8655_v1  ;;  %v8791_v1 = vld [vmem:[#allocation13 + $0x250] ss:$8 sps:$4 sm:$0xff]  }
 0xb16   :  { %4449 = vmatprep.subr.bf16.mxu1 %v8660_v25  ;;  %v8796_v25 = vld [vmem:[#allocation13 + $0x244] ss:$8 sps:$4 sm:$0xff]  }
 0xb19   :  { %4450 = vmatpush1.bf16.msra.mxu1 %v8658_v36  ;;  %v8802_v36 = vld [vmem:[#allocation13 + $0x224] ss:$8 sps:$4 sm:$0xff]  }
 0xb1a   :  { %4451 = vmatprep.subr.bf16.mxu1 %v8663_v38  ;;  %v8800_v38 = vld [vmem:[#allocation13 + $0x220] ss:$8 sps:$4 sm:$0xff]  }
 0xb1d   :  { %4452 = vmatpush1.bf16.msra.mxu1 %v8661_v43  ;;  %v8808_v43 = vld [vmem:[#allocation13 + $0x204] ss:$8 sps:$4 sm:$0xff]  }
 0xb1e   :  { %4453 = vmatprep.subr.bf16.mxu1 %v8666_v45  ;;  %v8806_v45 = vld [vmem:[#allocation13 + $0x200] ss:$8 sps:$4 sm:$0xff]  }
 0xb21   :  { %4454 = vmatpush2.bf16.msra.mxu1 %v8664_v34  ;;  %v8814_v34 = vld [vmem:[#allocation13 + $0x2e4] ss:$8 sps:$4 sm:$0xff]  }
 0xb22   :  { %4455 = vmatprep.subr.bf16.mxu1 %v8669_v59  ;;  %v8812_v59 = vld [vmem:[#allocation13 + $0x2e0] ss:$8 sps:$4 sm:$0xff]  }
 0xb25   :  { %4456 = vmatpush2.bf16.msra.mxu1 %v8667_v50  ;;  %v8820_v50 = vld [vmem:[#allocation13 + $0x2c4] ss:$8 sps:$4 sm:$0xff]  }
 0xb26   :  { %4457 = vmatprep.subr.bf16.mxu1 %v8672_v35  ;;  %v8818_v35 = vld [vmem:[#allocation13 + $0x2c0] ss:$8 sps:$4 sm:$0xff]  }
 0xb29   :  { %4458 = vmatpush2.bf16.msra.mxu1 %v8670_v6  ;;  %v8826_v6 = vld [vmem:[#allocation13 + $0x2a4] ss:$8 sps:$4 sm:$0xff]  }
 0xb2a   :  { %4459 = vmatprep.subr.bf16.mxu1 %v8675_v3  ;;  %v8824_v3 = vld [vmem:[#allocation13 + $0x2a0] ss:$8 sps:$4 sm:$0xff]  }
 0xb2d   :  { %4460 = vmatpush2.bf16.msra.mxu1 %v8673_v54  ;;  %v8832_v54 = vld [vmem:[#allocation13 + $0x284] ss:$8 sps:$4 sm:$0xff]  }
 0xb2e   :  { %4461 = vmatprep.subr.bf16.mxu1 %v8678_v8  ;;  %v8830_v8 = vld [vmem:[#allocation13 + $0x280] ss:$8 sps:$4 sm:$0xff]  }
 0xb31   :  { %4462 = vmatpush2.bf16.msra.mxu1 %v8676_v20 }
 0xb32   :  { %4463 = vmatprep.subr.bf16.mxu1 %v8681_v55 }
 0xb35   :  { %4464 = vmatpush2.bf16.msra.mxu1 %v8679_v9 }
 0xb36   :  { %4465 = vmatprep.subr.bf16.mxu1 %v8684_v24 }
 0xb39   :  { %4466 = vmatpush2.bf16.msra.mxu1 %v8682_v51 }
 0xb3a   :  { %4467 = vmatprep.subr.bf16.mxu1 %v8687_v26  ;;  %v8833_v26 = vld [vmem:[#allocation16 + $0x70] ss:$8 sps:$4 sm:$0xff]  }
 0xb3d   :  { %4468 = vmatpush2.bf16.msra.mxu1 %v8685_v23 }
 0xb3e   :  { %4708 = vmatprep.subr.bf16.mxu1 %v10088_v14  ;;  %v8787_v14 = vld [vmem:[#allocation13 + $0x274] ss:$8 sps:$4 sm:$0xff]  }
 0xbb8   :  { %v4145_v29 = vpop.f32.mrf.mxu1 }
 0xbba   :  { %v4147_v57 = vpop.f32.mrf.mxu1 }
 0xbbc   :  { %v4149_v58 = vpop.f32.mrf.mxu1 }
 0xbbd   :  { %v4154_v56 = vpack.c.bf16 %v4149_v58, %v4145_v29  ;;  %v8844_v29 = vld [vmem:[#allocation16 + $0x44] ss:$8 sps:$4 sm:$0xff]   ;;  %v8847_v58 = vld [vmem:[#allocation16 + $0x34] ss:$8 sps:$4 sm:$0xff]  }
 0xbbe   :  { %v4151_v31 = vpop.f32.mrf.mxu1 }
 0xbbf   :  { %v4155_v41 = vpack.c.bf16 %v4151_v31, %v4147_v57  ;;  %v8842_v57 = vld [vmem:[#allocation16 + $0x40] ss:$8 sps:$4 sm:$0xff]   ;;  %v8845_v31 = vld [vmem:[#allocation16 + $0x30] ss:$8 sps:$4 sm:$0xff]  }
 0xbc0   :  { %v4233_v44 = vpop.f32.mrf.mxu1 }
 0xbc1   :  { %4672 = vmatprep.mubr.bf16.mxu0 %v4155_v41  ;;  %v8850_v41 = vld [vmem:[#allocation16 + $0x24] ss:$8 sps:$4 sm:$0xff]  }
 0xbc2   :  { %v4235_v37 = vpop.f32.mrf.mxu1  ;;  %4673 = vmatmul.mubr.bf16.vlgmr.msra.gmra.mxu0 %v4154_v56  ;;  %v8848_v56 = vld [vmem:[#allocation16 + $0x20] ss:$8 sps:$4 sm:$0xff]  }
 0xbc3   :  { %5041 = vmatprep.mubr.bf16.mxu0 %v9536_v19 }
 0xbc4   :  { %v4237_v18 = vpop.f32.mrf.mxu1 }
 0xbc5   :  { %v4242_v30 = vpack.c.bf16 %v4237_v18, %v4233_v44  ;;  %v8853_v44 = vld [vmem:[#allocation16 + $0x14] ss:$8 sps:$4 sm:$0xff]   ;;  %v8856_v18 = vld [vmem:[#allocation16 + $0x4] ss:$8 sps:$4 sm:$0xff]  }
 0xbc6   :  { %v4239_v22 = vpop.f32.mrf.mxu1 }
 0xbc7   :  { %v4243_v21 = vpack.c.bf16 %v4239_v22, %v4235_v37  ;;  %v8851_v37 = vld [vmem:[#allocation16 + $0x10] ss:$8 sps:$4 sm:$0xff]   ;;  %v8854_v22 = vld [vmem:[#allocation16] ss:$8 sps:$4 sm:$0xff]  }
 0xbc9   :  { %4469 = vmatprep.mubr.bf16.mxu1 %v4243_v21  ;;  %v8859_v21 = vld [vmem:[#allocation16 + $0xf4] ss:$8 sps:$4 sm:$0xff]  }
 0xbca   :  { %4470 = vmatmul.mubr.bf16.vlgmr.msra.gmra.mxu1 %v4242_v30  ;;  %v8857_v30 = vld [vmem:[#allocation16 + $0xf0] ss:$8 sps:$4 sm:$0xff]  }
 0xbcb   :  { %4709 = vmatpush1.bf16.msra.mxu1 %v10085_v17  ;;  %4726 = vmatprep.mubr.bf16.mxu1 %v9536_v19  ;;  %v8799_v17 = vld [vmem:[#allocation13 + $0x234] ss:$8 sps:$4 sm:$0xff]  }
 0xbcc   :  { %4932 = vmatprep.subr.bf16.mxu1 %v8787_v14  ;;  %v8862_v14 = vld [vmem:[#allocation16 + $0xe4] ss:$8 sps:$4 sm:$0xff]  }
 0xbd2   :  { %7765 = vmatmul.mubr.msk.bf16.vlgmr.msra.gmra.mxu1 %vm4107_vm2, %v8784_v60  ;;  %v8860_v60 = vld [vmem:[#allocation16 + $0xe0] ss:$8 sps:$4 sm:$0xff]  }
 0xbd3   :  { %4933 = vmatpush1.bf16.msra.mxu1 %v8785_v27  ;;  %v8865_v27 = vld [vmem:[#allocation16 + $0xd4] ss:$8 sps:$4 sm:$0xff]  }
 0xbd4   :  { %4934 = vmatprep.subr.bf16.mxu1 %v8790_v61  ;;  %v8863_v61 = vld [vmem:[#allocation16 + $0xd0] ss:$8 sps:$4 sm:$0xff]  }
 0xbd7   :  { %4935 = vmatpush1.bf16.msra.mxu1 %v8788_v47  ;;  %v8868_v47 = vld [vmem:[#allocation16 + $0xc4] ss:$8 sps:$4 sm:$0xff]  }
 0xbd8   :  { %4936 = vmatprep.subr.bf16.mxu1 %v8793_v63  ;;  %v8866_v63 = vld [vmem:[#allocation16 + $0xc0] ss:$8 sps:$4 sm:$0xff]  }
 0xbdb   :  { %4937 = vmatpush1.bf16.msra.mxu1 %v8791_v1  ;;  %v8871_v1 = vld [vmem:[#allocation16 + $0xb4] ss:$8 sps:$4 sm:$0xff]  }
 0xbdc   :  { %4938 = vmatprep.subr.bf16.mxu1 %v8796_v25  ;;  %v8869_v25 = vld [vmem:[#allocation16 + $0xb0] ss:$8 sps:$4 sm:$0xff]  }
 0xbdf   :  { %4939 = vmatpush1.bf16.msra.mxu1 %v8794_v32  ;;  %v8874_v32 = vld [vmem:[#allocation16 + $0xa4] ss:$8 sps:$4 sm:$0xff]  }
 0xbe0   :  { %4940 = vmatprep.subr.bf16.mxu1 %v8799_v17  ;;  %v8872_v17 = vld [vmem:[#allocation16 + $0xa0] ss:$8 sps:$4 sm:$0xff]  }
 0xbe3   :  { %4941 = vmatpush1.bf16.msra.mxu1 %v8797_v33  ;;  %v8877_v33 = vld [vmem:[#allocation16 + $0x94] ss:$8 sps:$4 sm:$0xff]  }
 0xbe4   :  { %4942 = vmatprep.subr.bf16.mxu1 %v8802_v36  ;;  %v8875_v36 = vld [vmem:[#allocation16 + $0x90] ss:$8 sps:$4 sm:$0xff]  }
 0xbe7   :  { %4943 = vmatpush1.bf16.msra.mxu1 %v8800_v38  ;;  %v8880_v38 = vld [vmem:[#allocation16 + $0x84] ss:$8 sps:$4 sm:$0xff]  }
 0xbe8   :  { %4944 = vmatprep.subr.bf16.mxu1 %v8805_v40  ;;  %v8878_v40 = vld [vmem:[#allocation16 + $0x80] ss:$8 sps:$4 sm:$0xff]  }
 0xbeb   :  { %4945 = vmatpush1.bf16.msra.mxu1 %v8803_v42  ;;  %v4089_v42 = vpop.f32.mrf.mxu0 }
 0xbec   :  { %4946 = vmatprep.subr.bf16.mxu1 %v8808_v43 }
 0xbed   :  { %v4091_v43 = vpop.f32.mrf.mxu0 }
 0xbef   :  { %4947 = vmatpush1.bf16.msra.mxu1 %v8806_v45  ;;  %v4093_v45 = vpop.f32.mrf.mxu0 }
 0xbf0   :  { %4948 = vmatprep.subr.bf16.mxu1 %v8811_v62 }
 0xbf1   :  { %v4095_v62 = vpop.f32.mrf.mxu0 }
 0xbf3   :  { %4949 = vmatpush2.bf16.msra.mxu1 %v8809_v2 }
 0xbf4   :  { %4950 = vmatprep.subr.bf16.mxu1 %v8814_v34 }
 0xbf7   :  { %4951 = vmatpush2.bf16.msra.mxu1 %v8812_v59  ;;  %v4979_v59 = vld [vmem:[%s10223_s30] sm:$0x3] }
 0xbf8   :  { %4952 = vmatprep.subr.bf16.mxu1 %v8817_v0  ;;  %v3883_v0 = vld [vmem:[%s10224_s14] sm:$0x3] }
 0xbfb   :  { %4953 = vmatpush2.bf16.msra.mxu1 %v8815_v49 }
 0xbfc   :  { %4954 = vmatprep.subr.bf16.mxu1 %v8820_v50  ;;  %v4984_v50 = vrot.slane %v4979_v59, %v9821_v10 }
 0xbff   :  { %4955 = vmatpush2.bf16.msra.mxu1 %v8818_v35 }
 0xc00   :  { %4956 = vmatprep.subr.bf16.mxu1 %v8823_v4 }
 0xc03   :  { %4957 = vmatpush2.bf16.msra.mxu1 %v8821_v5  ;;  %v3888_v5 = vrot.slane %v3883_v0, %v9821_v10 }
 0xc04   :  { %4958 = vmatprep.subr.bf16.mxu1 %v8826_v6 }
 0xc07   :  { %4959 = vmatpush2.bf16.msra.mxu1 %v8824_v3 }
 0xc08   :  { %4960 = vmatprep.subr.bf16.mxu1 %v8829_v7  ;;  %v4988_v7 = vrot.slane %v4979_v59, %v9823_v11  ;;  %v8911_v59 = vld [vmem:[#allocation16 + $0x1d0] ss:$8 sps:$4 sm:$0xff]  }
 0xc0b   :  { %4961 = vmatpush2.bf16.msra.mxu1 %v8827_v52  ;;  %v3892_v52 = vrot.slane %v3883_v0, %v9823_v11  ;;  %v8916_v0 = vld [vmem:[#allocation16 + $0x1c4] ss:$8 sps:$4 sm:$0xff]  }
 0xc0c   :  { %4962 = vmatprep.subr.bf16.mxu1 %v8832_v54 }
 0xc0f   :  { %4963 = vmatpush2.bf16.msra.mxu1 %v8830_v8 }
 0xc10   :  { %5526 = vmatprep.subr.bf16.mxu1 %v8835_v12 }
 0xc82   :  { %v4674_v2 = vpop.f32.mrf.mxu0 }
 0xc84   :  { %v4676_v34 = vpop.f32.mrf.mxu0 }
 0xc86   :  { %v4678_v35 = vpop.f32.mrf.mxu0 }
 0xc8a   :  { %v10108_v13 = vpop.f32.mrf.mxu1 }
 0xc8b   :  { %v4675_v49 = vadd.f32 %v4674_v2, %v10108_v13  ;;  %v8908_v2 = vld [vmem:[#allocation16 + $0x1e0] ss:$8 sps:$4 sm:$0xff]  }
 0xc8c   :  { %v10110_v20 = vpop.f32.mrf.mxu1 }
 0xc8d   :  { %v4677_v6 = vadd.f32 %v4676_v34, %v10110_v20  ;;  %v4094_v20 = vadd.f32 %v4093_v45, %v3888_v5  ;;  %v8905_v45 = vld [vmem:[#allocation16 + $0x1f0] ss:$8 sps:$4 sm:$0xff]   ;;  %v8913_v34 = vld [vmem:[#allocation16 + $0x1d4] ss:$8 sps:$4 sm:$0xff]  }
 0xc8e   :  { %v10112_v55 = vpop.f32.mrf.mxu1 }
 0xc8f   :  { %v4679_v8 = vadd.f32 %v4678_v35, %v10112_v55  ;;  %v8917_v35 = vld [vmem:[#allocation16 + $0x1b0] ss:$8 sps:$4 sm:$0xff]  }
 0xc90   :  { %v10114_v16 = vpop.f32.mrf.mxu1 }
 0xc92   :  { %v4728_v53 = vpop.f32.mrf.mxu1 }
 0xc94   :  { %v4730_v9 = vpop.f32.mrf.mxu1 }
 0xc96   :  { %v4732_v24 = vpop.f32.mrf.mxu1 }
 0xc97   :  { %v4737_v23 = vpack.c.bf16 %v4732_v24, %v4728_v53  ;;  %v4090_v24 = vadd.f32 %v4089_v42, %v3888_v5  ;;  %v8902_v42 = vld [vmem:[#allocation16 + $0x100] ss:$8 sps:$4 sm:$0xff]  }
 0xc98   :  { %v4734_v15 = vpop.f32.mrf.mxu1  ;;  %v8920_v5 = vld [vmem:[#allocation16 + $0x1a0] ss:$8 sps:$4 sm:$0xff]  }
 0xc99   :  { %v4738_v51 = vpack.c.bf16 %v4734_v15, %v4730_v9  ;;  %v4680_v9 = vpop.f32.mrf.mxu0 }
 0xc9a   :  { %v4681_v15 = vadd.f32 %v4680_v9, %v10114_v16 }
 0xc9b   :  { %4964 = vmatprep.mubr.bf16.mxu1 %v4738_v51 }
 0xc9c   :  { %4965 = vmatmul.mubr.bf16.vlgmr.msra.gmra.mxu1 %v4737_v23  ;;  %v4092_v23 = vadd.f32 %v4091_v43, %v3892_v52  ;;  %v8907_v43 = vld [vmem:[#allocation16 + $0x1f4] ss:$8 sps:$4 sm:$0xff]  }
 0xc9d   :  { %5527 = vmatpush1.bf16.msra.mxu1 %v8833_v26 }
 0xc9e   :  { %5528 = vmatprep.subr.bf16.mxu1 %v8838_v28 }
 0xca1   :  { %5529 = vmatpush1.bf16.msra.mxu1 %v8836_v46 }
 0xca2   :  { %5530 = vmatprep.subr.bf16.mxu1 %v8841_v39 }
 0xca5   :  { %5531 = vmatpush1.bf16.msra.mxu1 %v8839_v48 }
 0xca6   :  { %5532 = vmatprep.subr.bf16.mxu1 %v8844_v29  ;;  %v4096_v29 = vadd.f32 %v4095_v62, %v3892_v52  ;;  %v8910_v62 = vld [vmem:[#allocation16 + $0x1e4] ss:$8 sps:$4 sm:$0xff]   ;;  %v8926_v52 = vld [vmem:[#allocation16 + $0x180] ss:$8 sps:$4 sm:$0xff]  }
 0xca9   :  { %5533 = vmatpush1.bf16.msra.mxu1 %v8842_v57 }
 0xcaa   :  { %5534 = vmatprep.subr.bf16.mxu1 %v8847_v58 }
 0xcad   :  { %5535 = vmatpush1.bf16.msra.mxu1 %v8845_v31 }
 0xcae   :  { %5536 = vmatprep.subr.bf16.mxu1 %v8850_v41 }
 0xcb1   :  { %5537 = vmatpush1.bf16.msra.mxu1 %v8848_v56 }
 0xcb2   :  { %5538 = vmatprep.subr.bf16.mxu1 %v8853_v44 }
 0xcb5   :  { %5539 = vmatpush1.bf16.msra.mxu1 %v8851_v37 }
 0xcb6   :  { %5540 = vmatprep.subr.bf16.mxu1 %v8856_v18 }
 0xcb9   :  { %5541 = vmatpush1.bf16.msra.mxu1 %v8854_v22  ;;  %v5005_v22 = vld [vmem:[#allocation14] sm:$0xf] }
 0xcba   :  { %5542 = vmatprep.subr.bf16.mxu1 %v8859_v21  ;;  %v8883_v21 = vld [vmem:[#allocation16 + $0x174] ss:$8 sps:$4 sm:$0xff]  }
 0xcbd   :  { %5543 = vmatpush2.bf16.msra.mxu1 %v8857_v30  ;;  %v8881_v30 = vld [vmem:[#allocation16 + $0x170] ss:$8 sps:$4 sm:$0xff]  }
 0xcbe   :  { %5544 = vmatprep.subr.bf16.mxu1 %v8862_v14  ;;  %v5085_v14 = vld [vmem:[#allocation14 + $0x4] sm:$0xf] }
 0xcc1   :  { %5545 = vmatpush2.bf16.msra.mxu1 %v8860_v60  ;;  %v8886_v60 = vld [vmem:[#allocation16 + $0x164] ss:$8 sps:$4 sm:$0xff]  }
 0xcc2   :  { %5546 = vmatprep.subr.bf16.mxu1 %v8865_v27  ;;  %v8884_v27 = vld [vmem:[#allocation16 + $0x160] ss:$8 sps:$4 sm:$0xff]  }
 0xcc5   :  { %5547 = vmatpush2.bf16.msra.mxu1 %v8863_v61  ;;  %v8889_v61 = vld [vmem:[#allocation16 + $0x154] ss:$8 sps:$4 sm:$0xff]  }
 0xcc6   :  { %5548 = vmatprep.subr.bf16.mxu1 %v8868_v47  ;;  %v8887_v47 = vld [vmem:[#allocation16 + $0x150] ss:$8 sps:$4 sm:$0xff]  }
 0xcc9   :  { %5549 = vmatpush2.bf16.msra.mxu1 %v8866_v63  ;;  %v8892_v63 = vld [vmem:[#allocation16 + $0x144] ss:$8 sps:$4 sm:$0xff]  }
 0xcca   :  { %5550 = vmatprep.subr.bf16.mxu1 %v8871_v1  ;;  %v8890_v1 = vld [vmem:[#allocation16 + $0x140] ss:$8 sps:$4 sm:$0xff]  }
 0xccd   :  { %5551 = vmatpush2.bf16.msra.mxu1 %v8869_v25  ;;  %v8895_v25 = vld [vmem:[#allocation16 + $0x134] ss:$8 sps:$4 sm:$0xff]  }
 0xcce   :  { %5552 = vmatprep.subr.bf16.mxu1 %v8874_v32  ;;  %v8893_v32 = vld [vmem:[#allocation16 + $0x130] ss:$8 sps:$4 sm:$0xff]  }
 0xcd1   :  { %5553 = vmatpush2.bf16.msra.mxu1 %v8872_v17  ;;  %v8898_v17 = vld [vmem:[#allocation16 + $0x124] ss:$8 sps:$4 sm:$0xff]  }
 0xcd2   :  { %5554 = vmatprep.subr.bf16.mxu1 %v8877_v33  ;;  %v8896_v33 = vld [vmem:[#allocation16 + $0x120] ss:$8 sps:$4 sm:$0xff]  }
 0xcd5   :  { %5555 = vmatpush2.bf16.msra.mxu1 %v8875_v36  ;;  %v8901_v36 = vld [vmem:[#allocation16 + $0x114] ss:$8 sps:$4 sm:$0xff]  }
 0xcd6   :  { %5556 = vmatprep.subr.bf16.mxu1 %v8880_v38  ;;  %v8899_v38 = vld [vmem:[#allocation16 + $0x110] ss:$8 sps:$4 sm:$0xff]  }
 0xcd9   :  { %5557 = vmatpush2.bf16.msra.mxu1 %v8878_v40  ;;  %v8904_v40 = vld [vmem:[#allocation16 + $0x104] ss:$8 sps:$4 sm:$0xff]  }
 0xd5c   :  { %v4966_v4 = vpop.f32.mrf.mxu1 }
 0xd5d   :  { %v4975_v3 = vadd.f32 %v4966_v4, %v4675_v49  ;;  %v8914_v49 = vld [vmem:[#allocation16 + $0x1c0] ss:$8 sps:$4 sm:$0xff]   ;;  %v8922_v4 = vld [vmem:[#allocation16 + $0x1a4] ss:$8 sps:$4 sm:$0xff]  }
 0xd5e   :  { %v4968_v54 = vpop.f32.mrf.mxu1 }
 0xd5f   :  { %v4991_v12 = vadd.f32 %v4984_v50, %v4975_v3  ;;  %v4976_v53 = vadd.f32 %v4968_v54, %v4677_v6  ;;  %v8925_v6 = vld [vmem:[#allocation16 + $0x194] ss:$8 sps:$4 sm:$0xff]   ;;  %v8923_v3 = vld [vmem:[#allocation16 + $0x190] ss:$8 sps:$4 sm:$0xff]  }
 0xd60   :  { %v4970_v13 = vpop.f32.mrf.mxu1 }
 0xd61   :  { %v4992_v51 = vadd.f32 %v4988_v7, %v4976_v53  ;;  %v4977_v26 = vadd.f32 %v4970_v13, %v4679_v8  ;;  %v4995_v46 = vadd.f32 %v4991_v12, %v4090_v24 }
 0xd62   :  { %v4972_v28 = vpop.f32.mrf.mxu1 }
 0xd63   :  { %v4993_v39 = vadd.f32 %v4984_v50, %v4977_v26  ;;  %v4978_v48 = vadd.f32 %v4972_v28, %v4681_v15  ;;  %v4996_v57 = vadd.f32 %v4992_v51, %v4092_v23  ;;  %v4999_v55 = vmax.f32 %v4995_v46, 0.0  ;;  %v8919_v50 = vld [vmem:[#allocation16 + $0x1b4] ss:$8 sps:$4 sm:$0xff]  }
 0xd64   :  { %v8931_v28 = vld [vmem:[#allocation16 + $0x274] ss:$8 sps:$4 sm:$0xff]  }
 0xd65   :  { %v4997_v58 = vadd.f32 %v4993_v39, %v4094_v20  ;;  %v4994_v31 = vadd.f32 %v4988_v7, %v4978_v48  ;;  %v5000_v44 = vmax.f32 %v4996_v57, 0.0  ;;  %v8928_v7 = vld [vmem:[#allocation16 + $0x184] ss:$8 sps:$4 sm:$0xff]   ;;  %v5568_v46 = vld [vmem:[#allocation14 + $0x8] sm:$0xf] }
 0xd66   :  { %v8929_v39 = vld [vmem:[#allocation16 + $0x270] ss:$8 sps:$4 sm:$0xff]   ;;  %v8934_v48 = vld [vmem:[#allocation16 + $0x264] ss:$8 sps:$4 sm:$0xff]   ;;  %v8937_v57 = vld [vmem:[#allocation16 + $0x254] ss:$8 sps:$4 sm:$0xff]  }
 0xd67   :  { %v5001_v41 = vmax.f32 %v4997_v58, 0.0  ;;  %v4998_v56 = vadd.f32 %v4994_v31, %v4096_v29  ;;  %v8932_v29 = vld [vmem:[#allocation16 + $0x260] ss:$8 sps:$4 sm:$0xff]   ;;  %v8935_v58 = vld [vmem:[#allocation16 + $0x250] ss:$8 sps:$4 sm:$0xff]  }
 0xd68   :  { %v8940_v31 = vld [vmem:[#allocation16 + $0x244] ss:$8 sps:$4 sm:$0xff]  }
 0xd69   :  { %v10126_v37 = vpack.c.bf16 %v5001_v41, %v4999_v55  ;;  %v5002_v18 = vmax.f32 %v4998_v56, 0.0  ;;  %v8938_v55 = vld [vmem:[#allocation16 + $0x240] ss:$8 sps:$4 sm:$0xff]   ;;  %v8943_v41 = vld [vmem:[#allocation16 + $0x234] ss:$8 sps:$4 sm:$0xff]  }
 0xd6a   :  { %v8941_v56 = vld [vmem:[#allocation16 + $0x230] ss:$8 sps:$4 sm:$0xff]  }
 0xd6b   :  { %v10128_v16 = vpack.c.bf16 %v5002_v18, %v5000_v44  ;;  %v8946_v44 = vld [vmem:[#allocation16 + $0x224] ss:$8 sps:$4 sm:$0xff]   ;;  %v8949_v18 = vld [vmem:[#allocation16 + $0x214] ss:$8 sps:$4 sm:$0xff]  }
 0xd6d   :  { %5023 = vmatprep.subr.bf16.mxu0 %v10128_v16  ;;  %5885 = vmatprep.subr.bf16.mxu1 %v10128_v16 }
 0xd6e   :  { %5024 = vmatpush1.bf16.msra.mxu0 %v10126_v37 }
 0xd6f   :  { %5103 = vmatprep.subr.bf16.mxu0 %v10128_v16 }
 0xd71   :  { %7798 = vmatmul.mubr.msk.bf16.vlgmr.msra.gmra.mxu0 %vm4107_vm2, %v5005_v22  ;;  %v8952_v22 = vld [vmem:[#allocation16 + $0x204] ss:$8 sps:$4 sm:$0xff]  }
 0xd72   :  { %5104 = vmatpush1.bf16.msra.mxu0 %v10126_v37  ;;  %5121 = vmatprep.mubr.bf16.mxu0 %v9536_v19 }
 0xd73   :  { %5325 = vmatprep.subr.bf16.mxu0 %v8883_v21  ;;  %v8950_v21 = vld [vmem:[#allocation16 + $0x200] ss:$8 sps:$4 sm:$0xff]  }
 0xd79   :  { %7799 = vmatmul.mubr.msk.bf16.vlgmr.msra.gmra.mxu0 %vm4107_vm2, %v5085_v14  ;;  %v8953_v14 = vld [vmem:[#allocation16 + $0x2f0] ss:$8 sps:$4 sm:$0xff]  }
 0xd7a   :  { %5326 = vmatpush1.bf16.msra.mxu0 %v8881_v30  ;;  %v8955_v30 = vld [vmem:[#allocation16 + $0x2f4] ss:$8 sps:$4 sm:$0xff]  }
 0xd7b   :  { %5327 = vmatprep.subr.bf16.mxu0 %v8886_v60  ;;  %v8958_v60 = vld [vmem:[#allocation16 + $0x2e4] ss:$8 sps:$4 sm:$0xff]  }
 0xd7e   :  { %5328 = vmatpush1.bf16.msra.mxu0 %v8884_v27  ;;  %v8956_v27 = vld [vmem:[#allocation16 + $0x2e0] ss:$8 sps:$4 sm:$0xff]  }
 0xd7f   :  { %5329 = vmatprep.subr.bf16.mxu0 %v8889_v61  ;;  %v8961_v61 = vld [vmem:[#allocation16 + $0x2d4] ss:$8 sps:$4 sm:$0xff]  }
 0xd82   :  { %5330 = vmatpush1.bf16.msra.mxu0 %v8887_v47  ;;  %v8959_v47 = vld [vmem:[#allocation16 + $0x2d0] ss:$8 sps:$4 sm:$0xff]  }
 0xd83   :  { %5331 = vmatprep.subr.bf16.mxu0 %v8892_v63  ;;  %v8964_v63 = vld [vmem:[#allocation16 + $0x2c4] ss:$8 sps:$4 sm:$0xff]  }
 0xd86   :  { %5332 = vmatpush1.bf16.msra.mxu0 %v8890_v1  ;;  %v8962_v1 = vld [vmem:[#allocation16 + $0x2c0] ss:$8 sps:$4 sm:$0xff]  }
 0xd87   :  { %5333 = vmatprep.subr.bf16.mxu0 %v8895_v25  ;;  %v8967_v25 = vld [vmem:[#allocation16 + $0x2b4] ss:$8 sps:$4 sm:$0xff]  }
 0xd8a   :  { %5334 = vmatpush1.bf16.msra.mxu0 %v8893_v32  ;;  %v8965_v32 = vld [vmem:[#allocation16 + $0x2b0] ss:$8 sps:$4 sm:$0xff]  }
 0xd8b   :  { %5335 = vmatprep.subr.bf16.mxu0 %v8898_v17  ;;  %v8970_v17 = vld [vmem:[#allocation16 + $0x2a4] ss:$8 sps:$4 sm:$0xff]  }
 0xd8e   :  { %5336 = vmatpush1.bf16.msra.mxu0 %v8896_v33  ;;  %v8968_v33 = vld [vmem:[#allocation16 + $0x2a0] ss:$8 sps:$4 sm:$0xff]  }
 0xd8f   :  { %5337 = vmatprep.subr.bf16.mxu0 %v8901_v36  ;;  %v8973_v36 = vld [vmem:[#allocation16 + $0x294] ss:$8 sps:$4 sm:$0xff]  }
 0xd92   :  { %5338 = vmatpush1.bf16.msra.mxu0 %v8899_v38  ;;  %v8971_v38 = vld [vmem:[#allocation16 + $0x290] ss:$8 sps:$4 sm:$0xff]  }
 0xd93   :  { %5339 = vmatprep.subr.bf16.mxu0 %v8904_v40  ;;  %v8976_v40 = vld [vmem:[#allocation16 + $0x284] ss:$8 sps:$4 sm:$0xff]  }
 0xd96   :  { %5340 = vmatpush1.bf16.msra.mxu0 %v8902_v42  ;;  %v8974_v42 = vld [vmem:[#allocation16 + $0x280] ss:$8 sps:$4 sm:$0xff]  }
 0xd97   :  { %5341 = vmatprep.subr.bf16.mxu0 %v8907_v43  ;;  %v5867_v43 = vld [vmem:[#allocation17] sm:$0xf] }
 0xd9a   :  { %5342 = vmatpush2.bf16.msra.mxu0 %v8905_v45 }
 0xd9b   :  { %5343 = vmatprep.subr.bf16.mxu0 %v8910_v62 }
 0xd9e   :  { %5344 = vmatpush2.bf16.msra.mxu0 %v8908_v2 }
 0xd9f   :  { %5345 = vmatprep.subr.bf16.mxu0 %v8913_v34 }
 0xda2   :  { %5346 = vmatpush2.bf16.msra.mxu0 %v8911_v59 }
 0xda3   :  { %5347 = vmatprep.subr.bf16.mxu0 %v8916_v0 }
 0xda6   :  { %5348 = vmatpush2.bf16.msra.mxu0 %v8914_v49 }
 0xda7   :  { %5349 = vmatprep.subr.bf16.mxu0 %v8919_v50 }
 0xdaa   :  { %5350 = vmatpush2.bf16.msra.mxu0 %v8917_v35 }
 0xdab   :  { %5351 = vmatprep.subr.bf16.mxu0 %v8922_v4 }
 0xdae   :  { %5352 = vmatpush2.bf16.msra.mxu0 %v8920_v5 }
 0xdaf   :  { %5353 = vmatprep.subr.bf16.mxu0 %v8925_v6 }
 0xdb2   :  { %5354 = vmatpush2.bf16.msra.mxu0 %v8923_v3 }
 0xdb3   :  { %5355 = vmatprep.subr.bf16.mxu0 %v8928_v7 }
 0xdb6   :  { %5356 = vmatpush2.bf16.msra.mxu0 %v8926_v52 }
 0xdb7   :  { %5586 = vmatprep.subr.bf16.mxu0 %v10128_v16  ;;  %v8947_v16 = vld [vmem:[#allocation16 + $0x210] ss:$8 sps:$4 sm:$0xff]  }
 0xe31   :  { %v5043_v54 = vpop.f32.mrf.mxu0 }
 0xe32   :  { %v5050_v53 = vpack.c.bf16 %v5043_v54, %v5043_v54 }
 0xe33   :  { %v5045_v8 = vpop.f32.mrf.mxu0 }
 0xe34   :  { %v5051_v12 = vpack.c.bf16 %v5045_v8, %v5045_v8  ;;  %v9027_v8 = vld [vmem:[#allocation19 + $0x74] ss:$8 sps:$4 sm:$0xff]  }
 0xe35   :  { %v5047_v9 = vpop.f32.mrf.mxu0 }
 0xe36   :  { %5558 = vmatprep.mubr.bf16.mxu1 %v5051_v12  ;;  %v9025_v12 = vld [vmem:[#allocation19 + $0x70] ss:$8 sps:$4 sm:$0xff]  }
 0xe37   :  { %v5048_v13 = vpop.f32.mrf.mxu0  ;;  %5559 = vmatmul.mubr.bf16.vlgmr.msra.gmra.mxu1 %v5050_v53  ;;  %v9030_v53 = vld [vmem:[#allocation19 + $0x64] ss:$8 sps:$4 sm:$0xff]  }
 0xe38   :  { %5886 = vmatpush1.bf16.msra.mxu1 %v10126_v37  ;;  %5903 = vmatprep.mubr.bf16.mxu1 %v9536_v19  ;;  %v9028_v13 = vld [vmem:[#allocation19 + $0x60] ss:$8 sps:$4 sm:$0xff]  }
 0xe39   :  { %v5123_v24 = vpop.f32.mrf.mxu0  ;;  %6118 = vmatprep.subr.bf16.mxu1 %v9027_v8  ;;  %v8982_v8 = vld [vmem:[#allocation22 + $0x164] ss:$8 sps:$4 sm:$0xff]  }
 0xe3a   :  { %v5130_v26 = vpack.c.bf16 %v5123_v24, %v5123_v24 }
 0xe3b   :  { %v5125_v15 = vpop.f32.mrf.mxu0 }
 0xe3c   :  { %v5131_v51 = vpack.c.bf16 %v5125_v15, %v5125_v15  ;;  %v9033_v15 = vld [vmem:[#allocation19 + $0x54] ss:$8 sps:$4 sm:$0xff]  }
 0xe3d   :  { %v5127_v23 = vpop.f32.mrf.mxu0 }
 0xe3e   :  { %5357 = vmatprep.mubr.bf16.mxu0 %v5131_v51  ;;  %v9031_v23 = vld [vmem:[#allocation19 + $0x50] ss:$8 sps:$4 sm:$0xff]  }
 0xe3f   :  { %v5128_v20 = vpop.f32.mrf.mxu0  ;;  %5358 = vmatmul.mubr.bf16.vlgmr.msra.gmra.mxu0 %v5130_v26  ;;  %7897 = vmatmul.mubr.msk.bf16.vlgmr.msra.gmra.mxu1 %vm4107_vm2, %v5867_v43 }
 0xe40   :  { %5587 = vmatpush1.bf16.msra.mxu0 %v10126_v37  ;;  %5604 = vmatprep.mubr.bf16.mxu0 %v9536_v19  ;;  %v8944_v37 = vld [vmem:[#allocation16 + $0x220] ss:$8 sps:$4 sm:$0xff]  }
 0xe41   :  { %5808 = vmatprep.subr.bf16.mxu0 %v8931_v28  ;;  %6119 = vmatpush1.bf16.msra.mxu1 %v9025_v12  ;;  %v9036_v20 = vld [vmem:[#allocation19 + $0x44] ss:$8 sps:$4 sm:$0xff]  }
 0xe42   :  { %6120 = vmatprep.subr.bf16.mxu1 %v9030_v53  ;;  %v9076_v12 = vld [vmem:[#allocation22 + $0x60] ss:$8 sps:$4 sm:$0xff]  }
 0xe43   :  { %v8980_v53 = vld [vmem:[#allocation22 + $0x160] ss:$8 sps:$4 sm:$0xff]  }
 0xe45   :  { %6121 = vmatpush1.bf16.msra.mxu1 %v9028_v13  ;;  %v9081_v13 = vld [vmem:[#allocation22 + $0x54] ss:$8 sps:$4 sm:$0xff]  }
 0xe46   :  { %6122 = vmatprep.subr.bf16.mxu1 %v9033_v15  ;;  %v8983_v15 = vld [vmem:[#allocation22 + $0x150] ss:$8 sps:$4 sm:$0xff]  }
 0xe47   :  { %7864 = vmatmul.mubr.msk.bf16.vlgmr.msra.gmra.mxu0 %vm4107_vm2, %v5568_v46  ;;  %v9034_v46 = vld [vmem:[#allocation19 + $0x40] ss:$8 sps:$4 sm:$0xff]  }
 0xe48   :  { %5809 = vmatpush1.bf16.msra.mxu0 %v8929_v39  ;;  %v9039_v39 = vld [vmem:[#allocation19 + $0x34] ss:$8 sps:$4 sm:$0xff]  }
 0xe49   :  { %5810 = vmatprep.subr.bf16.mxu0 %v8934_v48  ;;  %6123 = vmatpush1.bf16.msra.mxu1 %v9031_v23  ;;  %v9037_v48 = vld [vmem:[#allocation19 + $0x30] ss:$8 sps:$4 sm:$0xff]   ;;  %v9082_v23 = vld [vmem:[#allocation22 + $0x40] ss:$8 sps:$4 sm:$0xff]  }
 0xe4a   :  { %6124 = vmatprep.subr.bf16.mxu1 %v9036_v20  ;;  %v9087_v20 = vld [vmem:[#allocation22 + $0x34] ss:$8 sps:$4 sm:$0xff]  }
 0xe4c   :  { %5811 = vmatpush1.bf16.msra.mxu0 %v8932_v29  ;;  %v9042_v29 = vld [vmem:[#allocation19 + $0x24] ss:$8 sps:$4 sm:$0xff]  }
 0xe4d   :  { %5812 = vmatprep.subr.bf16.mxu0 %v8937_v57  ;;  %6125 = vmatpush1.bf16.msra.mxu1 %v9034_v46  ;;  %v9040_v57 = vld [vmem:[#allocation19 + $0x20] ss:$8 sps:$4 sm:$0xff]  }
 0xe4e   :  { %6126 = vmatprep.subr.bf16.mxu1 %v9039_v39  ;;  %v8991_v46 = vld [vmem:[#allocation22 + $0x134] ss:$8 sps:$4 sm:$0xff]   ;;  %v9085_v39 = vld [vmem:[#allocation22 + $0x30] ss:$8 sps:$4 sm:$0xff]  }
 0xe50   :  { %5813 = vmatpush1.bf16.msra.mxu0 %v8935_v58  ;;  %v9045_v58 = vld [vmem:[#allocation19 + $0x14] ss:$8 sps:$4 sm:$0xff]  }
 0xe51   :  { %5814 = vmatprep.subr.bf16.mxu0 %v8940_v31  ;;  %6127 = vmatpush1.bf16.msra.mxu1 %v9037_v48  ;;  %v9043_v31 = vld [vmem:[#allocation19 + $0x10] ss:$8 sps:$4 sm:$0xff]   ;;  %v8989_v48 = vld [vmem:[#allocation22 + $0x130] ss:$8 sps:$4 sm:$0xff]  }
 0xe52   :  { %6128 = vmatprep.subr.bf16.mxu1 %v9042_v29  ;;  %v9090_v29 = vld [vmem:[#allocation22 + $0x24] ss:$8 sps:$4 sm:$0xff]  }
 0xe54   :  { %5815 = vmatpush1.bf16.msra.mxu0 %v8938_v55  ;;  %v9048_v55 = vld [vmem:[#allocation19 + $0x4] ss:$8 sps:$4 sm:$0xff]  }
 0xe55   :  { %5816 = vmatprep.subr.bf16.mxu0 %v8943_v41  ;;  %6129 = vmatpush1.bf16.msra.mxu1 %v9040_v57  ;;  %v9046_v41 = vld [vmem:[#allocation19] ss:$8 sps:$4 sm:$0xff]   ;;  %v8994_v57 = vld [vmem:[#allocation22 + $0x124] ss:$8 sps:$4 sm:$0xff]  }
 0xe56   :  { %6130 = vmatprep.subr.bf16.mxu1 %v9045_v58  ;;  %v9088_v58 = vld [vmem:[#allocation22 + $0x20] ss:$8 sps:$4 sm:$0xff]  }
 0xe58   :  { %5817 = vmatpush1.bf16.msra.mxu0 %v8941_v56  ;;  %v9051_v56 = vld [vmem:[#allocation19 + $0xf4] ss:$8 sps:$4 sm:$0xff]  }
 0xe59   :  { %5818 = vmatprep.subr.bf16.mxu0 %v8946_v44  ;;  %6131 = vmatpush1.bf16.msra.mxu1 %v9043_v31  ;;  %v9049_v44 = vld [vmem:[#allocation19 + $0xf0] ss:$8 sps:$4 sm:$0xff]   ;;  %v8992_v31 = vld [vmem:[#allocation22 + $0x120] ss:$8 sps:$4 sm:$0xff]  }
 0xe5a   :  { %6132 = vmatprep.subr.bf16.mxu1 %v9048_v55  ;;  %v9093_v55 = vld [vmem:[#allocation22 + $0x14] ss:$8 sps:$4 sm:$0xff]  }
 0xe5c   :  { %5819 = vmatpush1.bf16.msra.mxu0 %v8944_v37  ;;  %v9054_v37 = vld [vmem:[#allocation19 + $0xe4] ss:$8 sps:$4 sm:$0xff]  }
 0xe5d   :  { %5820 = vmatprep.subr.bf16.mxu0 %v8949_v18  ;;  %6133 = vmatpush1.bf16.msra.mxu1 %v9046_v41  ;;  %v9052_v18 = vld [vmem:[#allocation19 + $0xe0] ss:$8 sps:$4 sm:$0xff]  }
 0xe5e   :  { %6134 = vmatprep.subr.bf16.mxu1 %v9051_v56  ;;  %v8997_v41 = vld [vmem:[#allocation22 + $0x114] ss:$8 sps:$4 sm:$0xff]   ;;  %v9091_v56 = vld [vmem:[#allocation22 + $0x10] ss:$8 sps:$4 sm:$0xff]  }
 0xe60   :  { %5821 = vmatpush1.bf16.msra.mxu0 %v8947_v16  ;;  %v9057_v16 = vld [vmem:[#allocation19 + $0xd4] ss:$8 sps:$4 sm:$0xff]  }
 0xe61   :  { %5822 = vmatprep.subr.bf16.mxu0 %v8952_v22  ;;  %6135 = vmatpush2.bf16.msra.mxu1 %v9049_v44  ;;  %v9055_v22 = vld [vmem:[#allocation19 + $0xd0] ss:$8 sps:$4 sm:$0xff]   ;;  %v8995_v44 = vld [vmem:[#allocation22 + $0x110] ss:$8 sps:$4 sm:$0xff]  }
 0xe62   :  { %6136 = vmatprep.subr.bf16.mxu1 %v9054_v37  ;;  %v9096_v37 = vld [vmem:[#allocation22 + $0x4] ss:$8 sps:$4 sm:$0xff]  }
 0xe64   :  { %5823 = vmatpush1.bf16.msra.mxu0 %v8950_v21  ;;  %v5851_v21 = vld [vmem:[%s10225_s18] sm:$0x3] }
 0xe65   :  { %5824 = vmatprep.subr.bf16.mxu0 %v8955_v30  ;;  %6137 = vmatpush2.bf16.msra.mxu1 %v9052_v18  ;;  %v9060_v30 = vld [vmem:[#allocation19 + $0xc4] ss:$8 sps:$4 sm:$0xff]   ;;  %v9000_v18 = vld [vmem:[#allocation22 + $0x104] ss:$8 sps:$4 sm:$0xff]  }
 0xe66   :  { %6138 = vmatprep.subr.bf16.mxu1 %v9057_v16  ;;  %v9094_v16 = vld [vmem:[#allocation22] ss:$8 sps:$4 sm:$0xff]  }
 0xe68   :  { %5825 = vmatpush2.bf16.msra.mxu0 %v8953_v14  ;;  %v5856_v14 = vrot.slane %v5851_v21, %v9821_v10 }
 0xe69   :  { %5826 = vmatprep.subr.bf16.mxu0 %v8958_v60  ;;  %6139 = vmatpush2.bf16.msra.mxu1 %v9055_v22  ;;  %v9058_v60 = vld [vmem:[#allocation19 + $0xc0] ss:$8 sps:$4 sm:$0xff]   ;;  %v8998_v22 = vld [vmem:[#allocation22 + $0x100] ss:$8 sps:$4 sm:$0xff]  }
 0xe6a   :  { %6140 = vmatprep.subr.bf16.mxu1 %v9060_v30  ;;  %v9003_v30 = vld [vmem:[#allocation22 + $0x1f4] ss:$8 sps:$4 sm:$0xff]  }
 0xe6c   :  { %5827 = vmatpush2.bf16.msra.mxu0 %v8956_v27 }
 0xe6d   :  { %5828 = vmatprep.subr.bf16.mxu0 %v8961_v61  ;;  %v9063_v61 = vld [vmem:[#allocation19 + $0xb4] ss:$8 sps:$4 sm:$0xff]   ;;  %6141 = vmatpush2.bf16.msra.mxu1 %v9058_v60 }
 0xe6e   :  { %6142 = vmatprep.subr.bf16.mxu1 %v9063_v61  ;;  %v9001_v60 = vld [vmem:[#allocation22 + $0x1f0] ss:$8 sps:$4 sm:$0xff]   ;;  %v9006_v61 = vld [vmem:[#allocation22 + $0x1e4] ss:$8 sps:$4 sm:$0xff]  }
 0xe70   :  { %5829 = vmatpush2.bf16.msra.mxu0 %v8959_v47 }
 0xe71   :  { %5830 = vmatprep.subr.bf16.mxu0 %v8964_v63  ;;  %v5860_v63 = vrot.slane %v5851_v21, %v9823_v11  ;;  %v9099_v21 = vld [vmem:[#allocation22 + $0xf4] ss:$8 sps:$4 sm:$0xff]  }
 0xe74   :  { %5831 = vmatpush2.bf16.msra.mxu0 %v8962_v1 }
 0xe75   :  { %5832 = vmatprep.subr.bf16.mxu0 %v8967_v25 }
 0xe78   :  { %5833 = vmatpush2.bf16.msra.mxu0 %v8965_v32 }
 0xe79   :  { %5834 = vmatprep.subr.bf16.mxu0 %v8970_v17  ;;  %v9061_v17 = vld [vmem:[#allocation19 + $0xb0] ss:$8 sps:$4 sm:$0xff]  }
 0xe7a   :  { %6143 = vmatpush2.bf16.msra.mxu1 %v9061_v17  ;;  %v9007_v17 = vld [vmem:[#allocation22 + $0x1d0] ss:$8 sps:$4 sm:$0xff]  }
 0xe7c   :  { %5835 = vmatpush2.bf16.msra.mxu0 %v8968_v33 }
 0xe7d   :  { %5836 = vmatprep.subr.bf16.mxu0 %v8973_v36  ;;  %v9066_v36 = vld [vmem:[#allocation19 + $0xa4] ss:$8 sps:$4 sm:$0xff]  }
 0xe7e   :  { %6144 = vmatprep.subr.bf16.mxu1 %v9066_v36  ;;  %v9012_v36 = vld [vmem:[#allocation22 + $0x1c4] ss:$8 sps:$4 sm:$0xff]  }
 0xe80   :  { %5837 = vmatpush2.bf16.msra.mxu0 %v8971_v38 }
 0xe81   :  { %5838 = vmatprep.subr.bf16.mxu0 %v8976_v40 }
 0xe84   :  { %5839 = vmatpush2.bf16.msra.mxu0 %v8974_v42 }
 0xef7   :  { %v5560_v45 = vpop.f32.mrf.mxu1 }
 0xef9   :  { %v5562_v62 = vpop.f32.mrf.mxu1 }
 0xefb   :  { %v5564_v2 = vpop.f32.mrf.mxu1 }
 0xefc   :  { %v9069_v2 = vld [vmem:[#allocation19 + $0x94] ss:$8 sps:$4 sm:$0xff]  }
 0xefd   :  { %v5565_v34 = vpop.f32.mrf.mxu1 }
 0xeff   :  { %v5359_v59 = vpop.f32.mrf.mxu0  ;;  %v10150_v9 = vpop.f32.mrf.mxu1 }
 0xf00   :  { %v10145_v0 = vadd.f32 %v5560_v45, %v5359_v59 }
 0xf01   :  { %v5361_v49 = vpop.f32.mrf.mxu0  ;;  %v5907_v24 = vpop.f32.mrf.mxu1 }
 0xf02   :  { %v10147_v50 = vadd.f32 %v5562_v62, %v5361_v49  ;;  %v5913_v51 = vpack.c.bf16 %v5907_v24, %v5907_v24  ;;  %v9064_v62 = vld [vmem:[#allocation19 + $0xa0] ss:$8 sps:$4 sm:$0xff]  }
 0xf03   :  { %v5363_v35 = vpop.f32.mrf.mxu0  ;;  %v5909_v26 = vpop.f32.mrf.mxu1  ;;  %6145 = vmatpush2.bf16.msra.mxu1 %v9064_v62  ;;  %v6161_v49 = vld [vmem:[#allocation20] sm:$0xf]  ;;  %v9013_v62 = vld [vmem:[#allocation22 + $0x1b0] ss:$8 sps:$4 sm:$0xff]  }
 0xf04   :  { %6150 = vmatprep.mubr.bf16.mxu1 %v5913_v51  ;;  %6146 = vmatprep.subr.bf16.mxu1 %v9069_v2  ;;  %v9072_v35 = vld [vmem:[#allocation19 + $0x84] ss:$8 sps:$4 sm:$0xff]   ;;  %v8985_v24 = vld [vmem:[#allocation22 + $0x154] ss:$8 sps:$4 sm:$0xff]   ;;  %v9084_v51 = vld [vmem:[#allocation22 + $0x44] ss:$8 sps:$4 sm:$0xff]  }
 0xf05   :  { %v5364_v4 = vpop.f32.mrf.mxu0  ;;  %v5910_v28 = vpop.f32.mrf.mxu1  ;;  %v8988_v26 = vld [vmem:[#allocation22 + $0x144] ss:$8 sps:$4 sm:$0xff]  }
 0xf06   :  { %v9070_v4 = vld [vmem:[#allocation19 + $0x80] ss:$8 sps:$4 sm:$0xff]   ;;  %v8986_v28 = vld [vmem:[#allocation22 + $0x140] ss:$8 sps:$4 sm:$0xff]   ;;  %v9114_v2 = vld [vmem:[#allocation22 + $0xa4] ss:$8 sps:$4 sm:$0xff]  }
 0xf07   :  { %v5606_v5 = vpop.f32.mrf.mxu0 }
 0xf08   :  { %v5613_v7 = vpack.c.bf16 %v5606_v5, %v5606_v5  ;;  %v9075_v5 = vld [vmem:[#allocation22 + $0x74] ss:$8 sps:$4 sm:$0xff]  }
 0xf09   :  { %v5608_v6 = vpop.f32.mrf.mxu0 }
 0xf0a   :  { %v5614_v3 = vpack.c.bf16 %v5608_v6, %v5608_v6  ;;  %v5912_v6 = vpack.c.bf16 %v10150_v9, %v10150_v9  ;;  %v9079_v9 = vld [vmem:[#allocation22 + $0x50] ss:$8 sps:$4 sm:$0xff]  }
 0xf0b   :  { %v5610_v52 = vpop.f32.mrf.mxu0 }
 0xf0c   :  { %5840 = vmatprep.mubr.bf16.mxu0 %v5614_v3  ;;  %v9073_v3 = vld [vmem:[#allocation22 + $0x70] ss:$8 sps:$4 sm:$0xff]  }
 0xf0d   :  { %v5611_v54 = vpop.f32.mrf.mxu0  ;;  %5841 = vmatmul.mubr.bf16.vlgmr.msra.gmra.mxu0 %v5613_v7  ;;  %v8977_v7 = vld [vmem:[#allocation22 + $0x170] ss:$8 sps:$4 sm:$0xff]  }
 0xf0e   :  { %6205 = vmatprep.mubr.bf16.mxu0 %v9536_v19  ;;  %v6249_v52 = vld [vmem:[#allocation20 + $0x4] sm:$0xf]  ;;  %v9078_v54 = vld [vmem:[#allocation22 + $0x64] ss:$8 sps:$4 sm:$0xff]  }
 0xfcd   :  { %v5842_v27 = vpop.f32.mrf.mxu0 }
 0xfce   :  { %v5849_v47 = vadd.f32 %v5842_v27, %v10145_v0  ;;  %v9067_v0 = vld [vmem:[#allocation19 + $0x90] ss:$8 sps:$4 sm:$0xff]  }
 0xfcf   :  { %v5844_v1 = vpop.f32.mrf.mxu0  ;;  %6147 = vmatpush2.bf16.msra.mxu1 %v9067_v0  ;;  %v9102_v27 = vld [vmem:[#allocation22 + $0xe4] ss:$8 sps:$4 sm:$0xff]  }
 0xfd0   :  { %v5863_v25 = vadd.f32 %v5856_v14, %v5849_v47  ;;  %v5850_v32 = vadd.f32 %v5844_v1, %v10147_v50  ;;  %v8979_v50 = vld [vmem:[#allocation22 + $0x174] ss:$8 sps:$4 sm:$0xff]   ;;  %6148 = vmatprep.subr.bf16.mxu1 %v9072_v35  ;;  %v9097_v14 = vld [vmem:[#allocation22 + $0xf0] ss:$8 sps:$4 sm:$0xff]   ;;  %v9100_v47 = vld [vmem:[#allocation22 + $0xe0] ss:$8 sps:$4 sm:$0xff]  }
 0xfd1   :  { %v5846_v33 = vpop.f32.mrf.mxu0  ;;  %v9105_v1 = vld [vmem:[#allocation22 + $0xd4] ss:$8 sps:$4 sm:$0xff]   ;;  %v9018_v0 = vld [vmem:[#allocation22 + $0x1a4] ss:$8 sps:$4 sm:$0xff]  }
 0xfd2   :  { %v5865_v38 = vmax.f32 %v5863_v25, 0.0  ;;  %v5864_v40 = vadd.f32 %v5860_v63, %v5850_v32  ;;  %v9004_v63 = vld [vmem:[#allocation22 + $0x1e0] ss:$8 sps:$4 sm:$0xff]   ;;  %v9009_v25 = vld [vmem:[#allocation22 + $0x1d4] ss:$8 sps:$4 sm:$0xff]  }
 0xfd3   :  { %v5847_v42 = vpop.f32.mrf.mxu0  ;;  %6149 = vmatpush2.bf16.msra.mxu1 %v9070_v4  ;;  %v9103_v32 = vld [vmem:[#allocation22 + $0xd0] ss:$8 sps:$4 sm:$0xff]   ;;  %v9108_v33 = vld [vmem:[#allocation22 + $0xc4] ss:$8 sps:$4 sm:$0xff]   ;;  %v9117_v35 = vld [vmem:[#allocation22 + $0x94] ss:$8 sps:$4 sm:$0xff]  }
 0xfd4   :  { %v6159_v43 = vpack.c.bf16 %v5865_v38, %v5865_v38  ;;  %v5866_v45 = vmax.f32 %v5864_v40, 0.0  ;;  %6690 = vmatprep.subr.bf16.mxu1 %v9075_v5  ;;  %v9106_v38 = vld [vmem:[#allocation22 + $0xc0] ss:$8 sps:$4 sm:$0xff]   ;;  %v9111_v42 = vld [vmem:[#allocation22 + $0xb4] ss:$8 sps:$4 sm:$0xff]  }
 0xfd5   :  { %v9010_v40 = vld [vmem:[#allocation22 + $0x1c0] ss:$8 sps:$4 sm:$0xff]   ;;  %v9021_v4 = vld [vmem:[#allocation22 + $0x194] ss:$8 sps:$4 sm:$0xff]   ;;  %v9115_v5 = vld [vmem:[#allocation22 + $0x90] ss:$8 sps:$4 sm:$0xff]  }
 0xfd6   :  { %v10157_v34 = vpack.c.bf16 %v5866_v45, %v5866_v45  ;;  %v10162_v59 = vsel %vm6166_vm3, %v6159_v43, 0  ;;  %6151 = vmatmul.mubr.bf16.vlgmr.msra.gmra.mxu1 %v5912_v6  ;;  %v9015_v43 = vld [vmem:[#allocation22 + $0x1b4] ss:$8 sps:$4 sm:$0xff]   ;;  %v9109_v45 = vld [vmem:[#allocation22 + $0xb0] ss:$8 sps:$4 sm:$0xff]  }
 0xfd7   :  { %6691 = vmatpush1.bf16.msra.mxu1 %v9073_v3  ;;  %v9019_v6 = vld [vmem:[#allocation22 + $0x190] ss:$8 sps:$4 sm:$0xff]   ;;  %v9024_v3 = vld [vmem:[#allocation22 + $0x184] ss:$8 sps:$4 sm:$0xff]  }
 0xfd8   :  { %7930 = vmatprep.subr.msk.bf16.mxu0 %vm6166_vm3, %v10157_v34  ;;  %6692 = vmatprep.subr.bf16.mxu1 %v9078_v54  ;;  %v9118_v54 = vld [vmem:[#allocation22 + $0x80] ss:$8 sps:$4 sm:$0xff]  }
 0xfd9   :  { %6188 = vmatpush1.bf16.msra.mxu0 %v10162_v59 }
 0xfda   :  { %7932 = vmatprep.subr.msk.bf16.mxu0 %vm6166_vm3, %v10157_v34 }
 0xfdb   :  { %6693 = vmatpush1.bf16.msra.mxu1 %v9076_v12 }
 0xfdc   :  { %7931 = vmatmul.mubr.msk.bf16.vlgmr.msra.gmra.mxu0 %vm6162_vm4, %v6161_v49  ;;  %6694 = vmatprep.subr.bf16.mxu1 %v9081_v13  ;;  %v9112_v49 = vld [vmem:[#allocation22 + $0xa0] ss:$8 sps:$4 sm:$0xff]  }
 0xfdd   :  { %6268 = vmatpush1.bf16.msra.mxu0 %v10162_v59  ;;  %6285 = vmatprep.mubr.bf16.mxu0 %v9536_v19 }
 0xfde   :  { %6489 = vmatprep.subr.bf16.mxu0 %v8979_v50  ;;  %v9016_v50 = vld [vmem:[#allocation22 + $0x1a0] ss:$8 sps:$4 sm:$0xff]  }
 0xfdf   :  { %6695 = vmatpush1.bf16.msra.mxu1 %v9079_v9 }
 0xfe0   :  { %6696 = vmatprep.subr.bf16.mxu1 %v9084_v51 }
 0xfe3   :  { %6697 = vmatpush1.bf16.msra.mxu1 %v9082_v23 }
 0xfe4   :  { %7933 = vmatmul.mubr.msk.bf16.vlgmr.msra.gmra.mxu0 %vm6162_vm4, %v6249_v52  ;;  %6698 = vmatprep.subr.bf16.mxu1 %v9087_v20  ;;  %v9120_v52 = vld [vmem:[#allocation22 + $0x84] ss:$8 sps:$4 sm:$0xff]  }
 0xfe5   :  { %6490 = vmatpush1.bf16.msra.mxu0 %v8977_v7  ;;  %v9022_v7 = vld [vmem:[#allocation22 + $0x180] ss:$8 sps:$4 sm:$0xff]  }
 0xfe6   :  { %6491 = vmatprep.subr.bf16.mxu0 %v8982_v8 }
 0xfe7   :  { %6699 = vmatpush1.bf16.msra.mxu1 %v9085_v39 }
 0xfe8   :  { %6700 = vmatprep.subr.bf16.mxu1 %v9090_v29 }
 0xfe9   :  { %6492 = vmatpush1.bf16.msra.mxu0 %v8980_v53 }
 0xfea   :  { %6493 = vmatprep.subr.bf16.mxu0 %v8985_v24 }
 0xfeb   :  { %6701 = vmatpush1.bf16.msra.mxu1 %v9088_v58  ;;  %v9121_v58 = vld [vmem:[#allocation22 + $0x270] ss:$8 sps:$4 sm:$0xff]  }
 0xfec   :  { %6702 = vmatprep.subr.bf16.mxu1 %v9093_v55  ;;  %v9124_v55 = vld [vmem:[#allocation22 + $0x260] ss:$8 sps:$4 sm:$0xff]  }
 0xfed   :  { %6494 = vmatpush1.bf16.msra.mxu0 %v8983_v15 }
 0xfee   :  { %6495 = vmatprep.subr.bf16.mxu0 %v8988_v26 }
 0xfef   :  { %6703 = vmatpush1.bf16.msra.mxu1 %v9091_v56  ;;  %v9127_v56 = vld [vmem:[#allocation22 + $0x250] ss:$8 sps:$4 sm:$0xff]  }
 0xff0   :  { %6704 = vmatprep.subr.bf16.mxu1 %v9096_v37  ;;  %v9130_v37 = vld [vmem:[#allocation22 + $0x240] ss:$8 sps:$4 sm:$0xff]  }
 0xff1   :  { %6496 = vmatpush1.bf16.msra.mxu0 %v8986_v28 }
 0xff2   :  { %6497 = vmatprep.subr.bf16.mxu0 %v8991_v46 }
 0xff3   :  { %6705 = vmatpush1.bf16.msra.mxu1 %v9094_v16  ;;  %v9136_v16 = vld [vmem:[#allocation22 + $0x220] ss:$8 sps:$4 sm:$0xff]  }
 0xff4   :  { %6706 = vmatprep.subr.bf16.mxu1 %v9099_v21  ;;  %v9139_v21 = vld [vmem:[#allocation22 + $0x210] ss:$8 sps:$4 sm:$0xff]  }
 0xff5   :  { %6498 = vmatpush1.bf16.msra.mxu0 %v8989_v48  ;;  %v9123_v48 = vld [vmem:[#allocation22 + $0x274] ss:$8 sps:$4 sm:$0xff]  }
 0xff6   :  { %6499 = vmatprep.subr.bf16.mxu0 %v8994_v57  ;;  %v6732_v57 = vld [vmem:[#allocation20 + $0x8] sm:$0xf] }
 0xff7   :  { %6707 = vmatpush2.bf16.msra.mxu1 %v9097_v14  ;;  %v9142_v14 = vld [vmem:[#allocation22 + $0x200] ss:$8 sps:$4 sm:$0xff]  }
 0xff8   :  { %6708 = vmatprep.subr.bf16.mxu1 %v9102_v27  ;;  %v9145_v27 = vld [vmem:[#allocation22 + $0x2f0] ss:$8 sps:$4 sm:$0xff]  }
 0xff9   :  { %6500 = vmatpush1.bf16.msra.mxu0 %v8992_v31  ;;  %v9126_v31 = vld [vmem:[#allocation22 + $0x264] ss:$8 sps:$4 sm:$0xff]  }
 0xffa   :  { %6501 = vmatprep.subr.bf16.mxu0 %v8997_v41  ;;  %v9129_v41 = vld [vmem:[#allocation22 + $0x254] ss:$8 sps:$4 sm:$0xff]  }
 0xffb   :  { %6709 = vmatpush2.bf16.msra.mxu1 %v9100_v47  ;;  %v9148_v47 = vld [vmem:[#allocation22 + $0x2e0] ss:$8 sps:$4 sm:$0xff]  }
 0xffc   :  { %6710 = vmatprep.subr.bf16.mxu1 %v9105_v1  ;;  %v9151_v1 = vld [vmem:[#allocation22 + $0x2d0] ss:$8 sps:$4 sm:$0xff]  }
 0xffd   :  { %6502 = vmatpush1.bf16.msra.mxu0 %v8995_v44  ;;  %v9132_v44 = vld [vmem:[#allocation22 + $0x244] ss:$8 sps:$4 sm:$0xff]  }
 0xffe   :  { %6503 = vmatprep.subr.bf16.mxu0 %v9000_v18  ;;  %v9138_v18 = vld [vmem:[#allocation22 + $0x224] ss:$8 sps:$4 sm:$0xff]  }
 0xfff   :  { %6711 = vmatpush2.bf16.msra.mxu1 %v9103_v32  ;;  %v9154_v32 = vld [vmem:[#allocation22 + $0x2c0] ss:$8 sps:$4 sm:$0xff]  }
0x1000   :  { %6712 = vmatprep.subr.bf16.mxu1 %v9108_v33  ;;  %v9157_v33 = vld [vmem:[#allocation22 + $0x2b0] ss:$8 sps:$4 sm:$0xff]  }
0x1001   :  { %6504 = vmatpush1.bf16.msra.mxu0 %v8998_v22  ;;  %v9141_v22 = vld [vmem:[#allocation22 + $0x214] ss:$8 sps:$4 sm:$0xff]  }
0x1002   :  { %6505 = vmatprep.subr.bf16.mxu0 %v9003_v30  ;;  %v9144_v30 = vld [vmem:[#allocation22 + $0x204] ss:$8 sps:$4 sm:$0xff]  }
0x1003   :  { %6713 = vmatpush2.bf16.msra.mxu1 %v9106_v38  ;;  %v9160_v38 = vld [vmem:[#allocation22 + $0x2a0] ss:$8 sps:$4 sm:$0xff]  }
0x1004   :  { %6714 = vmatprep.subr.bf16.mxu1 %v9111_v42  ;;  %v9163_v42 = vld [vmem:[#allocation22 + $0x290] ss:$8 sps:$4 sm:$0xff]  }
0x1005   :  { %6506 = vmatpush2.bf16.msra.mxu0 %v9001_v60  ;;  %v9147_v60 = vld [vmem:[#allocation22 + $0x2f4] ss:$8 sps:$4 sm:$0xff]  }
0x1006   :  { %6507 = vmatprep.subr.bf16.mxu0 %v9006_v61  ;;  %v9150_v61 = vld [vmem:[#allocation22 + $0x2e4] ss:$8 sps:$4 sm:$0xff]  }
0x1007   :  { %6715 = vmatpush2.bf16.msra.mxu1 %v9109_v45  ;;  %v9166_v45 = vld [vmem:[#allocation22 + $0x280] ss:$8 sps:$4 sm:$0xff]  }
0x1008   :  { %6716 = vmatprep.subr.bf16.mxu1 %v9114_v2 }
0x1009   :  { %6508 = vmatpush2.bf16.msra.mxu0 %v9004_v63  ;;  %v9153_v63 = vld [vmem:[#allocation22 + $0x2d4] ss:$8 sps:$4 sm:$0xff]  }
0x100a   :  { %6509 = vmatprep.subr.bf16.mxu0 %v9009_v25  ;;  %v9156_v25 = vld [vmem:[#allocation22 + $0x2c4] ss:$8 sps:$4 sm:$0xff]  }
0x100b   :  { %6717 = vmatpush2.bf16.msra.mxu1 %v9112_v49 }
0x100c   :  { %6718 = vmatprep.subr.bf16.mxu1 %v9117_v35 }
0x100d   :  { %6510 = vmatpush2.bf16.msra.mxu0 %v9007_v17  ;;  %v9159_v17 = vld [vmem:[#allocation22 + $0x2b4] ss:$8 sps:$4 sm:$0xff]  }
0x100e   :  { %6511 = vmatprep.subr.bf16.mxu0 %v9012_v36  ;;  %v9162_v36 = vld [vmem:[#allocation22 + $0x2a4] ss:$8 sps:$4 sm:$0xff]  }
0x100f   :  { %6719 = vmatpush2.bf16.msra.mxu1 %v9115_v5 }
0x1010   :  { %6720 = vmatprep.subr.bf16.mxu1 %v9120_v52 }
0x1011   :  { %6512 = vmatpush2.bf16.msra.mxu0 %v9010_v40  ;;  %v9165_v40 = vld [vmem:[#allocation22 + $0x294] ss:$8 sps:$4 sm:$0xff]  }
0x1012   :  { %6513 = vmatprep.subr.bf16.mxu0 %v9015_v43  ;;  %v9168_v43 = vld [vmem:[#allocation22 + $0x284] ss:$8 sps:$4 sm:$0xff]  }
0x1013   :  { %6721 = vmatpush2.bf16.msra.mxu1 %v9118_v54 }
0x1015   :  { %6514 = vmatpush2.bf16.msra.mxu0 %v9013_v62 }
0x1016   :  { %6515 = vmatprep.subr.bf16.mxu0 %v9018_v0 }
0x1019   :  { %6516 = vmatpush2.bf16.msra.mxu0 %v9016_v50 }
0x101a   :  { %6517 = vmatprep.subr.bf16.mxu0 %v9021_v4 }
0x101d   :  { %6518 = vmatpush2.bf16.msra.mxu0 %v9019_v6 }
0x101e   :  { %6519 = vmatprep.subr.bf16.mxu0 %v9024_v3 }
0x1021   :  { %6520 = vmatpush2.bf16.msra.mxu0 %v9022_v7 }
0x1022   :  { %7998 = vmatprep.subr.msk.bf16.mxu0 %vm6166_vm3, %v10157_v34 }
0x1096   :  { %v10175_v15 = vpop.f32.mrf.mxu1 }
0x1098   :  { %v10177_v26 = vpop.f32.mrf.mxu1 }
0x109a   :  { %v6156_v20 = vpop.f32.mrf.mxu1 }
0x109c   :  { %v6207_v8 = vpop.f32.mrf.mxu0  ;;  %v6157_v34 = vpop.f32.mrf.mxu1 }
0x109d   :  { %v6214_v13 = vpack.c.bf16 %v6207_v8, %v6207_v8 }
0x109e   :  { %v6209_v12 = vpop.f32.mrf.mxu0 }
0x109f   :  { %v6215_v53 = vpack.c.bf16 %v6209_v12, %v6209_v12 }
0x10a0   :  { %v6211_v24 = vpop.f32.mrf.mxu0 }
0x10a1   :  { %6722 = vmatprep.mubr.bf16.mxu1 %v6215_v53  ;;  %v5946_v24 = vld [vmem:[%s10226_s24] sm:$0x3] }
0x10a2   :  { %v6212_v9 = vpop.f32.mrf.mxu0  ;;  %6723 = vmatmul.mubr.bf16.vlgmr.msra.gmra.mxu1 %v6214_v13  ;;  %v9537_v13 = vmov 0.0   ;;  %v5955_v20 = vrot.slane %v5946_v24, %v9823_v11 }
0x10a3   :  { %7101 = vmatprep.mubr.f32.mxu1 %v9537_v13  ;;  %v7015_v9 = vld [vmem:[%s10227_s23] sm:$0x3] }
0x10a4   :  { %v6287_v51 = vpop.f32.mrf.mxu0 }
0x10a5   :  { %v6294_v46 = vpack.c.bf16 %v6287_v51, %v6287_v51  ;;  %v5951_v51 = vrot.slane %v5946_v24, %v9821_v10 }
0x10a6   :  { %v6289_v23 = vpop.f32.mrf.mxu0 }
0x10a7   :  { %v6295_v28 = vpack.c.bf16 %v6289_v23, %v6289_v23  ;;  %v7020_v23 = vrot.slane %v7015_v9, %v9821_v10  ;;  %v6153_v34 = vadd.f32 %v10175_v15, %v5951_v51  ;;  %v7122_v15 = vld [vmem:[#allocation23 + $0x70] sm:$0xff] }
0x10a8   :  { %v6291_v39 = vpop.f32.mrf.mxu0 }
0x10a9   :  { %6521 = vmatprep.mubr.bf16.mxu0 %v6295_v28  ;;  %v7024_v39 = vrot.slane %v7015_v9, %v9823_v11  ;;  %v7138_v11 = vld [vmem:[#allocation23 + $0xf0] sm:$0xff] }
0x10aa   :  { %v6292_v29 = vpop.f32.mrf.mxu0  ;;  %6522 = vmatmul.mubr.bf16.vlgmr.msra.gmra.mxu0 %v6294_v46 }
0x10ab   :  { %6751 = vmatpush1.bf16.msra.mxu0 %v10162_v59  ;;  %6768 = vmatprep.mubr.bf16.mxu0 %v9536_v19  ;;  %v9135_v59 = vld [vmem:[#allocation22 + $0x234] ss:$8 sps:$4 sm:$0xff]   ;;  %v9133_v19 = vld [vmem:[#allocation22 + $0x230] ss:$8 sps:$4 sm:$0xff]  }
0x10ac   :  { %6972 = vmatprep.subr.bf16.mxu0 %v9123_v48 }
0x10b2   :  { %7999 = vmatmul.mubr.msk.bf16.vlgmr.msra.gmra.mxu0 %vm6162_vm4, %v6732_v57 }
0x10b3   :  { %6973 = vmatpush1.bf16.msra.mxu0 %v9121_v58 }
0x10b4   :  { %6974 = vmatprep.subr.bf16.mxu0 %v9126_v31  ;;  %v6155_v31 = vadd.f32 %v10177_v26, %v5955_v20  ;;  %v7121_v26 = vld [vmem:[#allocation23 + $0x68] sm:$0xff] }
0x10b7   :  { %6975 = vmatpush1.bf16.msra.mxu0 %v9124_v55 }
0x10b8   :  { %6976 = vmatprep.subr.bf16.mxu0 %v9129_v41 }
0x10bb   :  { %6977 = vmatpush1.bf16.msra.mxu0 %v9127_v56 }
0x10bc   :  { %6978 = vmatprep.subr.bf16.mxu0 %v9132_v44 }
0x10bf   :  { %6979 = vmatpush1.bf16.msra.mxu0 %v9130_v37 }
0x10c0   :  { %6980 = vmatprep.subr.bf16.mxu0 %v9135_v59  ;;  %v7033_v59 = vld [vmem:[%s9687_s29] sm:$0x3]  ;;  %s9538_s29 = smov [#allocation25]  }
0x10c1   :  { %s7225_s26 = sshll.u32 %s9538_s29, 4  ;;  %s7226_s26 = int_to_ptr.vmem [resolvable:$true] %s7225_s26 }
0x10c2   :  { %s9449_s25 = scalar_lea.vmem %s7226_s26, 32  ;;  %p9454_p1 = scmp.lt.s32.totalorder %s7226_s26, %s7226_s26 }
0x10c3   :  { %6981 = vmatpush1.bf16.msra.mxu0 %v9133_v19  ;;  %v7139_v19 = vld [vmem:[#allocation23 + $0xf8] sm:$0xff]  ;;  %p9450_p0 = scmp.ne.s32.totalorder %s7226_s26, %s9449_s25  ;;  %p9455_p2 = scmp.lt.s32.totalorder %s9449_s25, %s9449_s25 }
0x10c4   :  { %6982 = vmatprep.subr.bf16.mxu0 %v9138_v18  ;;  %v7123_v18 = vld [vmem:[#allocation23 + $0x78] sm:$0xff] }
0x10c5   :  { %p9456_p3 = por %p9455_p2, %p9454_p1 }
0x10c7   :  { %6983 = vmatpush1.bf16.msra.mxu0 %v9136_v16  ;;  %v7137_v16 = vld [vmem:[#allocation23 + $0xe8] sm:$0xff]  ;;  %p9457_p4 = pnand %p9456_p3, %p9450_p0 }
0x10c8   :  { %6984 = vmatprep.subr.bf16.mxu0 %v9141_v22  ;;  %v7136_v22 = vld [vmem:[#allocation23 + $0xe0] sm:$0xff] }
0x10cb   :  { %6985 = vmatpush1.bf16.msra.mxu0 %v9139_v21  ;;  %v7120_v21 = vld [vmem:[#allocation23 + $0x60] sm:$0xff] }
0x10cc   :  { %6986 = vmatprep.subr.bf16.mxu0 %v9144_v30  ;;  %v7135_v30 = vld [vmem:[#allocation23 + $0xd8] sm:$0xff] }
0x10cf   :  { %6987 = vmatpush1.bf16.msra.mxu0 %v9142_v14  ;;  %v7119_v14 = vld [vmem:[#allocation23 + $0x58] sm:$0xff] }
0x10d0   :  { %6988 = vmatprep.subr.bf16.mxu0 %v9147_v60  ;;  %v7134_v60 = vld [vmem:[#allocation23 + $0xd0] sm:$0xff] }
0x10d3   :  { %6989 = vmatpush2.bf16.msra.mxu0 %v9145_v27  ;;  %v7118_v27 = vld [vmem:[#allocation23 + $0x50] sm:$0xff] }
0x10d4   :  { %6990 = vmatprep.subr.bf16.mxu0 %v9150_v61  ;;  %v7133_v61 = vld [vmem:[#allocation23 + $0xc8] sm:$0xff] }
0x10d7   :  { %6991 = vmatpush2.bf16.msra.mxu0 %v9148_v47  ;;  %v7117_v47 = vld [vmem:[#allocation23 + $0x48] sm:$0xff] }
0x10d8   :  { %6992 = vmatprep.subr.bf16.mxu0 %v9153_v63  ;;  %v7132_v63 = vld [vmem:[#allocation23 + $0xc0] sm:$0xff] }
0x10db   :  { %6993 = vmatpush2.bf16.msra.mxu0 %v9151_v1  ;;  %v7116_v1 = vld [vmem:[#allocation23 + $0x40] sm:$0xff] }
0x10dc   :  { %6994 = vmatprep.subr.bf16.mxu0 %v9156_v25  ;;  %v7131_v25 = vld [vmem:[#allocation23 + $0xb8] sm:$0xff] }
0x10df   :  { %6995 = vmatpush2.bf16.msra.mxu0 %v9154_v32  ;;  %v7115_v32 = vld [vmem:[#allocation23 + $0x38] sm:$0xff] }
0x10e0   :  { %6996 = vmatprep.subr.bf16.mxu0 %v9159_v17  ;;  %v7130_v17 = vld [vmem:[#allocation23 + $0xb0] sm:$0xff] }
0x10e3   :  { %6997 = vmatpush2.bf16.msra.mxu0 %v9157_v33  ;;  %v7114_v33 = vld [vmem:[#allocation23 + $0x30] sm:$0xff] }
0x10e4   :  { %6998 = vmatprep.subr.bf16.mxu0 %v9162_v36  ;;  %v7129_v36 = vld [vmem:[#allocation23 + $0xa8] sm:$0xff] }
0x10e7   :  { %6999 = vmatpush2.bf16.msra.mxu0 %v9160_v38  ;;  %v7113_v38 = vld [vmem:[#allocation23 + $0x28] sm:$0xff] }
0x10e8   :  { %7000 = vmatprep.subr.bf16.mxu0 %v9165_v40  ;;  %v7128_v40 = vld [vmem:[#allocation23 + $0xa0] sm:$0xff] }
0x10eb   :  { %7001 = vmatpush2.bf16.msra.mxu0 %v9163_v42  ;;  %v7112_v42 = vld [vmem:[#allocation23 + $0x20] sm:$0xff] }
0x10ec   :  { %7002 = vmatprep.subr.bf16.mxu0 %v9168_v43  ;;  %v7127_v43 = vld [vmem:[#allocation23 + $0x98] sm:$0xff] }
0x10ef   :  { %7003 = vmatpush2.bf16.msra.mxu0 %v9166_v45  ;;  %v7111_v45 = vld [vmem:[#allocation23 + $0x18] sm:$0xff] }
0x1162   :  { %v6724_v62 = vpop.f32.mrf.mxu1 }
0x1164   :  { %v6726_v2 = vpop.f32.mrf.mxu1 }
0x1166   :  { %v6728_v0 = vpop.f32.mrf.mxu1 }
0x1167   :  { %v7125_v0 = vld [vmem:[#allocation23 + $0x88] sm:$0xff] }
0x1168   :  { %v6729_v49 = vpop.f32.mrf.mxu1 }
0x1169   :  { %v7109_v49 = vld [vmem:[#allocation23 + $0x8] sm:$0xff] }
0x116a   :  { %v6523_v50 = vpop.f32.mrf.mxu0 }
0x116b   :  { %v6725_v35 = vadd.f32 %v6724_v62, %v6523_v50  ;;  %v7126_v62 = vld [vmem:[#allocation23 + $0x90] sm:$0xff]  ;;  %v7124_v50 = vld [vmem:[#allocation23 + $0x80] sm:$0xff] }
0x116c   :  { %v6525_v4 = vpop.f32.mrf.mxu0 }
0x116d   :  { %v6727_v5 = vadd.f32 %v6726_v2, %v6525_v4  ;;  %v7110_v2 = vld [vmem:[#allocation23 + $0x10] sm:$0xff] }
0x116e   :  { %v6527_v6 = vpop.f32.mrf.mxu0 }
0x1170   :  { %v6528_v3 = vpop.f32.mrf.mxu0 }
0x1171   :  { %v8033_v3 = vld [vmem:[%s9697_s9] ss:$0 sm:$0xff] }
0x1172   :  { %v6770_v7 = vpop.f32.mrf.mxu0 }
0x1173   :  { %v6777_v8 = vpack.c.bf16 %v6770_v7, %v6770_v7 }
0x1174   :  { %v6772_v52 = vpop.f32.mrf.mxu0 }
0x1175   :  { %v6778_v54 = vpack.c.bf16 %v6772_v52, %v6772_v52 }
0x1176   :  { %v6774_v12 = vpop.f32.mrf.mxu0 }
0x1177   :  { %7004 = vmatprep.mubr.bf16.mxu0 %v6778_v54 }
0x1178   :  { %v6775_v53 = vpop.f32.mrf.mxu0  ;;  %7005 = vmatmul.mubr.bf16.vlgmr.msra.gmra.mxu0 %v6777_v8 }
0x1238   :  { %v7006_v28 = vpop.f32.mrf.mxu0 }
0x1239   :  { %v7013_v46 = vadd.f32 %v7006_v28, %v6725_v35  ;;  %v7108_v35 = vld [vmem:[#allocation23] sm:$0xff] }
0x123a   :  { %v7008_v48 = vpop.f32.mrf.mxu0 }
0x123b   :  { %v7027_v29 = vadd.f32 %v7020_v23, %v7013_v46  ;;  %v7014_v57 = vadd.f32 %v7008_v48, %v6727_v5 }
0x123c   :  { %v7010_v58 = vpop.f32.mrf.mxu0 }
0x123d   :  { %v7029_v55 = vadd.f32 %v7027_v29, %v6153_v34  ;;  %v7028_v41 = vadd.f32 %v7024_v39, %v7014_v57 }
0x123e   :  { %v7011_v56 = vpop.f32.mrf.mxu0 }
0x123f   :  { %v7030_v44 = vadd.f32 %v7028_v41, %v6155_v31  ;;  %v7031_v37 = vmax.f32 %v7029_v55, 0.0 }
0x1241   :  { %v7032_v10 = vmax.f32 %v7030_v44, 0.0 }
0x1243   :  { %7067 = vmatprep.subr.mxu1 %v7032_v10 }
0x1244   :  { %7068 = vmatpush1.msra.mxu1 %v7031_v37 }
0x1245   :  { %8032 = vmatmul.mubr.msk.f32.vlgmr.msra.gmra.mxu1 %vm6162_vm4, %v7033_v59  ;;  %8046 = vmatprep.subr.mxu1 %v7139_v19 }
0x1246   :  { %8047 = vmatpush3.msra.mxu1 %v7123_v18 }
0x1247   :  { %8048 = vmatprep.subr.mxu1 %v7138_v11 }
0x1248   :  { %8049 = vmatpush3.msra.mxu1 %v7122_v15 }
0x1249   :  { %8050 = vmatprep.subr.mxu1 %v7137_v16 }
0x124a   :  { %8051 = vmatpush3.msra.mxu1 %v7121_v26 }
0x124b   :  { %8052 = vmatprep.subr.mxu1 %v7136_v22 }
0x124c   :  { %8053 = vmatpush3.msra.mxu1 %v7120_v21 }
0x124d   :  { %8054 = vmatprep.subr.mxu1 %v7135_v30 }
0x124e   :  { %8055 = vmatpush3.msra.mxu1 %v7119_v14 }
0x124f   :  { %8056 = vmatprep.subr.mxu1 %v7134_v60 }
0x1250   :  { %8057 = vmatpush3.msra.mxu1 %v7118_v27 }
0x1251   :  { %8058 = vmatprep.subr.mxu1 %v7133_v61 }
0x1252   :  { %8059 = vmatpush3.msra.mxu1 %v7117_v47 }
0x1253   :  { %8060 = vmatprep.subr.mxu1 %v7132_v63 }
0x1254   :  { %8061 = vmatpush3.msra.mxu1 %v7116_v1 }
0x1255   :  { %8062 = vmatprep.subr.mxu1 %v7131_v25 }
0x1256   :  { %8063 = vmatpush3.msra.mxu1 %v7115_v32 }
0x1257   :  { %8064 = vmatprep.subr.mxu1 %v7130_v17 }
0x1258   :  { %8065 = vmatpush3.msra.mxu1 %v7114_v33 }
0x1259   :  { %8066 = vmatprep.subr.mxu1 %v7129_v36 }
0x125a   :  { %8067 = vmatpush3.msra.mxu1 %v7113_v38 }
0x125b   :  { %8068 = vmatprep.subr.mxu1 %v7128_v40 }
0x125c   :  { %8069 = vmatpush3.msra.mxu1 %v7112_v42 }
0x125d   :  { %8070 = vmatprep.subr.mxu1 %v7127_v43 }
0x125e   :  { %8071 = vmatpush3.msra.mxu1 %v7111_v45 }
0x125f   :  { %8072 = vmatprep.subr.mxu1 %v7126_v62 }
0x1260   :  { %8073 = vmatpush3.msra.mxu1 %v7110_v2 }
0x1261   :  { %8074 = vmatprep.subr.mxu1 %v7125_v0 }
0x1262   :  { %8075 = vmatpush3.msra.mxu1 %v7109_v49 }
0x1263   :  { %8076 = vmatprep.subr.mxu1 %v7124_v50 }
0x1264   :  { %8077 = vmatpush3.msra.mxu1 %v7108_v35 }
0x1305   :  { %v7103_v4 = vpop.f32.mrf.mxu1 }
0x1307   :  { %v7105_v5 = vpop.f32.mrf.mxu1 }
0x1308   :  { %7211 = vmatprep.mubr.f32.mxu1 %v7105_v5 }
0x1309   :  { %7212 = vmatmul.mubr.f32.vlgmr.msra.gmra.mxu1 %v7103_v4 }
0x13c9   :  { %v8078_v6 = vpop.f32.mrf.mxu1 }
0x13cb   :  { %v8079_v7 = vpop.f32.mrf.mxu1 }
0x13cc   :  { %v8080_v52 = vadd.f32 %v8079_v7, %v8078_v6 }
0x13ce   :  { %v7214_v54 = vadd.f32 %v8080_v52, %v8033_v3 }
0x13d0   :  { %7218 = vst.msk [vmem:[#allocation25] sm:$0x3] %vm7217_vm5, %v7214_v54 }
0x13d1   :  { %9460 = shalt.err (!%p9457_p4)
}
0x13d2   :  { %7228 = dma.vmem_to_hbm [thread:$0]  %s7226_s26, 32, %s9702_s17, [#allocation4]  }
0x13d3   :  { %9485 = dma.done.wait [#allocation4], 32  }
0x13d4   :  { %9486 = vsyncadd [#allocation4], 4294967264 }
0x13d5   :  { %7232 = vsyncpa [#allocation3], 1 }
0x13d6   :  { %7233 = vsyncpa [#allocation6], 1 }
0x13d7   :  { %7234 = vsyncpa [#allocation9], 1 }
0x13d8   :  { %7235 = vsyncpa [#allocation12], 1 }
0x13d9   :  { %7236 = vsyncpa [#allocation15], 1 }
0x13da   :  { %7237 = vsyncpa [#allocation18], 1 }
0x13db   :  { %7238 = vsyncpa [#allocation21], 1 }
0x13dc   :  { %7239 = vsyncpa [#allocation24], 1 }
0x13dd   :  { %7240 = vsyncpa [#allocation4], 1 }

</bundles_post_ra>
